<compile_context>
chip_gen: v7x
topology: tpu7x:2x2x1
jax: 0.10.0
libtpu: 0.0.40
codegen_flags: <defaults>
</compile_context>

<pallas_src>
import jax
import jax.numpy as jnp
from jax.experimental import pallas as pl
from jax.experimental.pallas import tpu as pltpu

_LPAD = 8  # left W-halo padded to one full sublane tile -> aligned interior store


def _fused_kernel(x_ref, w_ref, gamma_ref, beta_ref, o_ref, xp_ref):
    # x_ref:     (N, H, W, C)              raw input (pre-ReLU), NHWC
    # w_ref:     (3, 3, C)                 depthwise 3x3 taps [dy, dx, c]
    # gamma_ref: (1, 1, 1, C)              BN weight
    # beta_ref:  (1, 1, 1, C)              BN bias
    # o_ref:     (N, H, W, C)              output (also used as the accumulator)
    # xp_ref:    (N, H+2, LPAD+W+1, C)     VMEM scratch: ReLU(x) with halos
    N, H, W, C = x_ref.shape
    Wp = xp_ref.shape[2]

    # ---- fused ReLU + halo build (border-only zeroing, aligned interior) ----
    zero_row = jnp.zeros((N, 1, Wp, C), jnp.float32)
    xp_ref[:, 0:1, :, :] = zero_row            # top halo row
    xp_ref[:, H + 1:H + 2, :, :] = zero_row    # bottom halo row
    # Interior at column offset LPAD (= 8, a sublane-tile boundary): unmasked,
    # non-realigned store.  Columns LPAD-1 and LPAD+W stay UNINITIALIZED; the
    # only output positions they could reach are masked out below.
    xp_ref[:, 1:H + 1, _LPAD:_LPAD + W, :] = jnp.maximum(x_ref[...], 0.0)

    # ---- depthwise 3x3 conv --------------------------------------------------
    # Hoist the 9 per-tap (1,1,1,C) views once (no re-broadcast inside the loop).
    w_all = w_ref[...]  # (3, 3, C)
    taps = [[w_all[dy, dx, :].reshape(1, 1, 1, C) for dx in range(3)]
            for dy in range(3)]

    def col_sum(dx):
        # Column sum over the 3 dy taps.  The +/-1 column offsets are absorbed
        # into the (cheap, XLU-realigned) loads from the padded scratch, so all
        # stores to o_ref below stay full-width and sublane-aligned.
        base = _LPAD - 1 + dx
        c = xp_ref[:, 0:H, base:base + W, :] * taps[0][dx]          # rows h+0
        c = c + xp_ref[:, 1:H + 1, base:base + W, :] * taps[1][dx]  # rows h+1
        c = c + xp_ref[:, 2:H + 2, base:base + W, :] * taps[2][dx]  # rows h+2
        return c                                                    # (N,H,W,C)

    # Accumulate per-dx into o_ref (VMEM) so at most one column-sum tensor is
    # live at a time (bounded vreg live ranges; the VMEM store between steps is
    # needed anyway since BN re-reads the pre-norm activations).
    o_ref[...] = col_sum(1)                    # center column, aligned loads

    wi = jax.lax.broadcasted_iota(jnp.int32, (1, 1, W, C), 2)
    # dx=0 uses input column w-1: invalid (uninitialized halo col) only at w==0.
    o_ref[...] += jnp.where(wi >= 1, col_sum(0), 0.0)
    # dx=2 uses input column w+1: invalid only at w==W-1.
    o_ref[...] += jnp.where(wi <= W - 2, col_sum(2), 0.0)

    # ---- BatchNorm2d (training mode, batch stats) fused with final ReLU ------
    # Two-pass statistics (mean, then sum of squared deviations) for numerical
    # robustness; folded per-channel scale/shift; in-place normalize on o_ref.
    inv_cnt = 1.0 / float(N * H * W)
    mean = jnp.sum(o_ref[...], axis=(0, 1, 2), keepdims=True) * inv_cnt   # (1,1,1,C)
    d = o_ref[...] - mean
    var = jnp.sum(d * d, axis=(0, 1, 2), keepdims=True) * inv_cnt         # biased var
    inv_std = jax.lax.rsqrt(var + 1e-5)
    scale = gamma_ref[...] * inv_std                                       # (1,1,1,C)
    shift = beta_ref[...] - mean * scale                                   # (1,1,1,C)
    o_ref[...] = jnp.maximum(o_ref[...] * scale + shift, 0.0)


def fused_relu_dwconv_bn_relu(x_nchw, w_dw, gamma, beta):
    """x_nchw: (N, C, H, W) float32
       w_dw:   (C, 1, 3, 3) depthwise conv weight (PyTorch layout)
       gamma, beta: (C,) batchnorm affine params
       returns (N, C, H, W) float32, matching the PyTorch module's train-mode
       forward output."""
    N, C, H, W = x_nchw.shape

    # Layout glue only: NCHW -> NHWC (C on lanes), taps -> (3, 3, C).
    x_nhwc = jnp.transpose(x_nchw, (0, 2, 3, 1))                 # (N, H, W, C)
    w33c = jnp.transpose(w_dw[:, 0, :, :], (1, 2, 0))            # (3, 3, C)
    gamma4 = gamma.reshape(1, 1, 1, C)
    beta4 = beta.reshape(1, 1, 1, C)

    out_nhwc = pl.pallas_call(
        _fused_kernel,
        out_shape=jax.ShapeDtypeStruct((N, H, W, C), jnp.float32),
        in_specs=[
            pl.BlockSpec(memory_space=pltpu.MemorySpace.VMEM),
            pl.BlockSpec(memory_space=pltpu.MemorySpace.VMEM),
            pl.BlockSpec(memory_space=pltpu.MemorySpace.VMEM),
            pl.BlockSpec(memory_space=pltpu.MemorySpace.VMEM),
        ],
        out_specs=pl.BlockSpec(memory_space=pltpu.MemorySpace.VMEM),
        scratch_shapes=[pltpu.VMEM((N, H + 2, _LPAD + W + 1, C), jnp.float32)],
    )(x_nhwc, w33c, gamma4, beta4)

    return jnp.transpose(out_nhwc, (0, 3, 1, 2))                 # back to NCHW


def _reference(x_nchw, w_dw, gamma, beta):
    # pure-JAX reference (matches PyTorch train-mode forward)
    x = jnp.maximum(x_nchw, 0.0)
    xp = jnp.pad(x, ((0, 0), (0, 0), (1, 1), (1, 1)))
    N, C, H, W = x_nchw.shape
    acc = jnp.zeros_like(x_nchw)
    for dy in range(3):
        for dx in range(3):
            acc = acc + xp[:, :, dy:dy + H, dx:dx + W] * w_dw[:, 0, dy, dx][None, :, None, None]
    mean = jnp.mean(acc, axis=(0, 2, 3), keepdims=True)
    var = jnp.mean((acc - mean) ** 2, axis=(0, 2, 3), keepdims=True)
    y = (acc - mean) * jax.lax.rsqrt(var + 1e-5)
    y = y * gamma[None, :, None, None] + beta[None, :, None, None]
    return jnp.maximum(y, 0.0)


if __name__ == "__main__":
    key = jax.random.PRNGKey(0)
    k_x, k_w, k_g, k_b = jax.random.split(key, 4)

    # Shapes match the module's spec input: (1, 240, 14, 14)
    N, C, H, W = 1, 240, 14, 14
    x = jax.random.normal(k_x, (N, C, H, W), dtype=jnp.float32)

    # deterministic synthetic parameters (module __init__ shapes)
    w_dw = 0.1 * jax.random.normal(k_w, (C, 1, 3, 3), dtype=jnp.float32)   # depthwise weight
    gamma = 1.0 + 0.1 * jax.random.normal(k_g, (C,), dtype=jnp.float32)    # BN weight
    beta = 0.05 * jax.random.normal(k_b, (C,), dtype=jnp.float32)          # BN bias

    out = fused_relu_dwconv_bn_relu(x, w_dw, gamma, beta)
    out = jax.block_until_ready(out)

    ref = jax.block_until_ready(_reference(x, w_dw, gamma, beta))
    assert out.shape == (N, C, H, W)
    assert jnp.allclose(out, ref, atol=1e-4, rtol=1e-4)

    print("KERNEL_OK")
</pallas_src>

<mosaic_0001>
module attributes {stable_mosaic.version = 11 : i64} {
  func.func @_fused_kernel(%arg0: memref<1x14x14x240xf32, #tpu.memory_space<vmem>>, %arg1: memref<3x3x240xf32, #tpu.memory_space<vmem>>, %arg2: memref<1x1x1x240xf32, #tpu.memory_space<vmem>>, %arg3: memref<1x1x1x240xf32, #tpu.memory_space<vmem>>, %arg4: memref<1x14x14x240xf32, #tpu.memory_space<vmem>>, %arg5: memref<1x16x23x240xf32, #tpu.memory_space<vmem>>) attributes {dimension_semantics = [], scalar_prefetch = 0 : i64, scratch_operands = 1 : i64, tpu.core_type = #tpu.core_type<tc>} {
    %cst = arith.constant 0.000000e+00 : f32
    %0 = vector.broadcast %cst : f32 to vector<1x1x23x240xf32>
    %c0 = arith.constant 0 : index
    %c0_0 = arith.constant 0 : index
    %c0_1 = arith.constant 0 : index
    %c0_2 = arith.constant 0 : index
    %1 = vector.load %arg5[%c0, %c0_0, %c0_1, %c0_2] : memref<1x16x23x240xf32, #tpu.memory_space<vmem>>, vector<1x1x23x240xf32>
    tpu.vector_store %arg5[%c0, %c0_0, %c0_1, %c0_2], %0 {strides = array<i32>} : memref<1x16x23x240xf32, #tpu.memory_space<vmem>>, vector<1x1x23x240xf32>,
    %c0_3 = arith.constant 0 : index
    %c15 = arith.constant 15 : index
    %c0_4 = arith.constant 0 : index
    %c0_5 = arith.constant 0 : index
    %2 = vector.load %arg5[%c0_3, %c15, %c0_4, %c0_5] : memref<1x16x23x240xf32, #tpu.memory_space<vmem>>, vector<1x1x23x240xf32>
    tpu.vector_store %arg5[%c0_3, %c15, %c0_4, %c0_5], %0 {strides = array<i32>} : memref<1x16x23x240xf32, #tpu.memory_space<vmem>>, vector<1x1x23x240xf32>,
    %c0_6 = arith.constant 0 : index
    %c0_7 = arith.constant 0 : index
    %c0_8 = arith.constant 0 : index
    %c0_9 = arith.constant 0 : index
    %3 = vector.load %arg0[%c0_6, %c0_7, %c0_8, %c0_9] : memref<1x14x14x240xf32, #tpu.memory_space<vmem>>, vector<1x14x14x240xf32>
    %cst_10 = arith.constant 0.000000e+00 : f32
    %4 = vector.broadcast %cst_10 : f32 to vector<1x14x14x240xf32>
    %5 = arith.maximumf %3, %4 : vector<1x14x14x240xf32>
    %c0_11 = arith.constant 0 : index
    %c1 = arith.constant 1 : index
    %c8 = arith.constant 8 : index
    %c0_12 = arith.constant 0 : index
    %6 = vector.load %arg5[%c0_11, %c1, %c8, %c0_12] : memref<1x16x23x240xf32, #tpu.memory_space<vmem>>, vector<1x14x14x240xf32>
    tpu.vector_store %arg5[%c0_11, %c1, %c8, %c0_12], %5 {strides = array<i32>} : memref<1x16x23x240xf32, #tpu.memory_space<vmem>>, vector<1x14x14x240xf32>,
    %c0_13 = arith.constant 0 : index
    %c0_14 = arith.constant 0 : index
    %c0_15 = arith.constant 0 : index
    %7 = vector.load %arg1[%c0_13, %c0_14, %c0_15] : memref<3x3x240xf32, #tpu.memory_space<vmem>>, vector<3x3x240xf32>
    %8 = vector.extract_strided_slice %7 {offsets = [0, 0, 0], sizes = [1, 1, 240], strides = [1, 1, 1]} : vector<3x3x240xf32> to vector<1x1x240xf32>
    %9 = vector.shape_cast %8 : vector<1x1x240xf32> to vector<240xf32>
    %10 = vector.shape_cast %9 : vector<240xf32> to vector<1x1x1x240xf32>
    %11 = vector.extract_strided_slice %7 {offsets = [0, 1, 0], sizes = [1, 1, 240], strides = [1, 1, 1]} : vector<3x3x240xf32> to vector<1x1x240xf32>
    %12 = vector.shape_cast %11 : vector<1x1x240xf32> to vector<240xf32>
    %13 = vector.shape_cast %12 : vector<240xf32> to vector<1x1x1x240xf32>
    %14 = vector.extract_strided_slice %7 {offsets = [0, 2, 0], sizes = [1, 1, 240], strides = [1, 1, 1]} : vector<3x3x240xf32> to vector<1x1x240xf32>
    %15 = vector.shape_cast %14 : vector<1x1x240xf32> to vector<240xf32>
    %16 = vector.shape_cast %15 : vector<240xf32> to vector<1x1x1x240xf32>
    %17 = vector.extract_strided_slice %7 {offsets = [1, 0, 0], sizes = [1, 1, 240], strides = [1, 1, 1]} : vector<3x3x240xf32> to vector<1x1x240xf32>
    %18 = vector.shape_cast %17 : vector<1x1x240xf32> to vector<240xf32>
    %19 = vector.shape_cast %18 : vector<240xf32> to vector<1x1x1x240xf32>
    %20 = vector.extract_strided_slice %7 {offsets = [1, 1, 0], sizes = [1, 1, 240], strides = [1, 1, 1]} : vector<3x3x240xf32> to vector<1x1x240xf32>
    %21 = vector.shape_cast %20 : vector<1x1x240xf32> to vector<240xf32>
    %22 = vector.shape_cast %21 : vector<240xf32> to vector<1x1x1x240xf32>
    %23 = vector.extract_strided_slice %7 {offsets = [1, 2, 0], sizes = [1, 1, 240], strides = [1, 1, 1]} : vector<3x3x240xf32> to vector<1x1x240xf32>
    %24 = vector.shape_cast %23 : vector<1x1x240xf32> to vector<240xf32>
    %25 = vector.shape_cast %24 : vector<240xf32> to vector<1x1x1x240xf32>
    %26 = vector.extract_strided_slice %7 {offsets = [2, 0, 0], sizes = [1, 1, 240], strides = [1, 1, 1]} : vector<3x3x240xf32> to vector<1x1x240xf32>
    %27 = vector.shape_cast %26 : vector<1x1x240xf32> to vector<240xf32>
    %28 = vector.shape_cast %27 : vector<240xf32> to vector<1x1x1x240xf32>
    %29 = vector.extract_strided_slice %7 {offsets = [2, 1, 0], sizes = [1, 1, 240], strides = [1, 1, 1]} : vector<3x3x240xf32> to vector<1x1x240xf32>
    %30 = vector.shape_cast %29 : vector<1x1x240xf32> to vector<240xf32>
    %31 = vector.shape_cast %30 : vector<240xf32> to vector<1x1x1x240xf32>
    %32 = vector.extract_strided_slice %7 {offsets = [2, 2, 0], sizes = [1, 1, 240], strides = [1, 1, 1]} : vector<3x3x240xf32> to vector<1x1x240xf32>
    %33 = vector.shape_cast %32 : vector<1x1x240xf32> to vector<240xf32>
    %34 = vector.shape_cast %33 : vector<240xf32> to vector<1x1x1x240xf32>
    %c0_16 = arith.constant 0 : index
    %c0_17 = arith.constant 0 : index
    %c8_18 = arith.constant 8 : index
    %c0_19 = arith.constant 0 : index
    %35 = vector.load %arg5[%c0_16, %c0_17, %c8_18, %c0_19] : memref<1x16x23x240xf32, #tpu.memory_space<vmem>>, vector<1x14x14x240xf32>
    %36 = vector.broadcast %13 : vector<1x1x1x240xf32> to vector<1x14x14x240xf32>
    %37 = arith.mulf %35, %36 : vector<1x14x14x240xf32>
    %c0_20 = arith.constant 0 : index
    %c1_21 = arith.constant 1 : index
    %c8_22 = arith.constant 8 : index
    %c0_23 = arith.constant 0 : index
    %38 = vector.load %arg5[%c0_20, %c1_21, %c8_22, %c0_23] : memref<1x16x23x240xf32, #tpu.memory_space<vmem>>, vector<1x14x14x240xf32>
    %39 = vector.broadcast %22 : vector<1x1x1x240xf32> to vector<1x14x14x240xf32>
    %40 = arith.mulf %38, %39 : vector<1x14x14x240xf32>
    %41 = arith.addf %37, %40 : vector<1x14x14x240xf32>
    %c0_24 = arith.constant 0 : index
    %c2 = arith.constant 2 : index
    %c8_25 = arith.constant 8 : index
    %c0_26 = arith.constant 0 : index
    %42 = vector.load %arg5[%c0_24, %c2, %c8_25, %c0_26] : memref<1x16x23x240xf32, #tpu.memory_space<vmem>>, vector<1x14x14x240xf32>
    %43 = vector.broadcast %31 : vector<1x1x1x240xf32> to vector<1x14x14x240xf32>
    %44 = arith.mulf %42, %43 : vector<1x14x14x240xf32>
    %45 = arith.addf %41, %44 : vector<1x14x14x240xf32>
    %c0_27 = arith.constant 0 : index
    %c0_28 = arith.constant 0 : index
    %c0_29 = arith.constant 0 : index
    %c0_30 = arith.constant 0 : index
    %46 = vector.load %arg4[%c0_27, %c0_28, %c0_29, %c0_30] : memref<1x14x14x240xf32, #tpu.memory_space<vmem>>, vector<1x14x14x240xf32>
    tpu.vector_store %arg4[%c0_27, %c0_28, %c0_29, %c0_30], %45 {strides = array<i32>} : memref<1x14x14x240xf32, #tpu.memory_space<vmem>>, vector<1x14x14x240xf32>,
    %47 = tpu.iota {dimensions = array<i32: 2>} : vector<1x1x14x240xi32>
    %c0_31 = arith.constant 0 : index
    %c0_32 = arith.constant 0 : index
    %c0_33 = arith.constant 0 : index
    %c0_34 = arith.constant 0 : index
    %48 = vector.load %arg4[%c0_31, %c0_32, %c0_33, %c0_34] : memref<1x14x14x240xf32, #tpu.memory_space<vmem>>, vector<1x14x14x240xf32>
    %c1_i32 = arith.constant 1 : i32
    %49 = vector.broadcast %c1_i32 : i32 to vector<1x1x14x240xi32>
    %50 = arith.cmpi sge, %47, %49 : vector<1x1x14x240xi32>
    %c0_35 = arith.constant 0 : index
    %c0_36 = arith.constant 0 : index
    %c7 = arith.constant 7 : index
    %c0_37 = arith.constant 0 : index
    %51 = vector.load %arg5[%c0_35, %c0_36, %c7, %c0_37] : memref<1x16x23x240xf32, #tpu.memory_space<vmem>>, vector<1x14x14x240xf32>
    %52 = vector.broadcast %10 : vector<1x1x1x240xf32> to vector<1x14x14x240xf32>
    %53 = arith.mulf %51, %52 : vector<1x14x14x240xf32>
    %c0_38 = arith.constant 0 : index
    %c1_39 = arith.constant 1 : index
    %c7_40 = arith.constant 7 : index
    %c0_41 = arith.constant 0 : index
    %54 = vector.load %arg5[%c0_38, %c1_39, %c7_40, %c0_41] : memref<1x16x23x240xf32, #tpu.memory_space<vmem>>, vector<1x14x14x240xf32>
    %55 = vector.broadcast %19 : vector<1x1x1x240xf32> to vector<1x14x14x240xf32>
    %56 = arith.mulf %54, %55 : vector<1x14x14x240xf32>
    %57 = arith.addf %53, %56 : vector<1x14x14x240xf32>
    %c0_42 = arith.constant 0 : index
    %c2_43 = arith.constant 2 : index
    %c7_44 = arith.constant 7 : index
    %c0_45 = arith.constant 0 : index
    %58 = vector.load %arg5[%c0_42, %c2_43, %c7_44, %c0_45] : memref<1x16x23x240xf32, #tpu.memory_space<vmem>>, vector<1x14x14x240xf32>
    %59 = vector.broadcast %28 : vector<1x1x1x240xf32> to vector<1x14x14x240xf32>
    %60 = arith.mulf %58, %59 : vector<1x14x14x240xf32>
    %61 = arith.addf %57, %60 : vector<1x14x14x240xf32>
    %cst_46 = arith.constant 0.000000e+00 : f32
    %62 = vector.shape_cast %50 : vector<1x1x14x240xi1> to vector<1x1x14x240xi1>
    %63 = vector.broadcast %62 : vector<1x1x14x240xi1> to vector<1x14x14x240xi1>
    %64 = vector.broadcast %cst_46 : f32 to vector<1x14x14x240xf32>
    %65 = arith.select %63, %61, %64 : vector<1x14x14x240xi1>, vector<1x14x14x240xf32>
    %66 = arith.addf %48, %65 : vector<1x14x14x240xf32>
    %c0_47 = arith.constant 0 : index
    %c0_48 = arith.constant 0 : index
    %c0_49 = arith.constant 0 : index
    %c0_50 = arith.constant 0 : index
    %67 = vector.load %arg4[%c0_47, %c0_48, %c0_49, %c0_50] : memref<1x14x14x240xf32, #tpu.memory_space<vmem>>, vector<1x14x14x240xf32>
    tpu.vector_store %arg4[%c0_47, %c0_48, %c0_49, %c0_50], %66 {strides = array<i32>} : memref<1x14x14x240xf32, #tpu.memory_space<vmem>>, vector<1x14x14x240xf32>,
    %c0_51 = arith.constant 0 : index
    %c0_52 = arith.constant 0 : index
    %c0_53 = arith.constant 0 : index
    %c0_54 = arith.constant 0 : index
    %68 = vector.load %arg4[%c0_51, %c0_52, %c0_53, %c0_54] : memref<1x14x14x240xf32, #tpu.memory_space<vmem>>, vector<1x14x14x240xf32>
    %c12_i32 = arith.constant 12 : i32
    %69 = vector.broadcast %c12_i32 : i32 to vector<1x1x14x240xi32>
    %70 = arith.cmpi sle, %47, %69 : vector<1x1x14x240xi32>
    %c0_55 = arith.constant 0 : index
    %c0_56 = arith.constant 0 : index
    %c9 = arith.constant 9 : index
    %c0_57 = arith.constant 0 : index
    %71 = vector.load %arg5[%c0_55, %c0_56, %c9, %c0_57] : memref<1x16x23x240xf32, #tpu.memory_space<vmem>>, vector<1x14x14x240xf32>
    %72 = vector.broadcast %16 : vector<1x1x1x240xf32> to vector<1x14x14x240xf32>
    %73 = arith.mulf %71, %72 : vector<1x14x14x240xf32>
    %c0_58 = arith.constant 0 : index
    %c1_59 = arith.constant 1 : index
    %c9_60 = arith.constant 9 : index
    %c0_61 = arith.constant 0 : index
    %74 = vector.load %arg5[%c0_58, %c1_59, %c9_60, %c0_61] : memref<1x16x23x240xf32, #tpu.memory_space<vmem>>, vector<1x14x14x240xf32>
    %75 = vector.broadcast %25 : vector<1x1x1x240xf32> to vector<1x14x14x240xf32>
    %76 = arith.mulf %74, %75 : vector<1x14x14x240xf32>
    %77 = arith.addf %73, %76 : vector<1x14x14x240xf32>
    %c0_62 = arith.constant 0 : index
    %c2_63 = arith.constant 2 : index
    %c9_64 = arith.constant 9 : index
    %c0_65 = arith.constant 0 : index
    %78 = vector.load %arg5[%c0_62, %c2_63, %c9_64, %c0_65] : memref<1x16x23x240xf32, #tpu.memory_space<vmem>>, vector<1x14x14x240xf32>
    %79 = vector.broadcast %34 : vector<1x1x1x240xf32> to vector<1x14x14x240xf32>
    %80 = arith.mulf %78, %79 : vector<1x14x14x240xf32>
    %81 = arith.addf %77, %80 : vector<1x14x14x240xf32>
    %cst_66 = arith.constant 0.000000e+00 : f32
    %82 = vector.shape_cast %70 : vector<1x1x14x240xi1> to vector<1x1x14x240xi1>
    %83 = vector.broadcast %82 : vector<1x1x14x240xi1> to vector<1x14x14x240xi1>
    %84 = vector.broadcast %cst_66 : f32 to vector<1x14x14x240xf32>
    %85 = arith.select %83, %81, %84 : vector<1x14x14x240xi1>, vector<1x14x14x240xf32>
    %86 = arith.addf %68, %85 : vector<1x14x14x240xf32>
    %c0_67 = arith.constant 0 : index
    %c0_68 = arith.constant 0 : index
    %c0_69 = arith.constant 0 : index
    %c0_70 = arith.constant 0 : index
    %87 = vector.load %arg4[%c0_67, %c0_68, %c0_69, %c0_70] : memref<1x14x14x240xf32, #tpu.memory_space<vmem>>, vector<1x14x14x240xf32>
    tpu.vector_store %arg4[%c0_67, %c0_68, %c0_69, %c0_70], %86 {strides = array<i32>} : memref<1x14x14x240xf32, #tpu.memory_space<vmem>>, vector<1x14x14x240xf32>,
    %c0_71 = arith.constant 0 : index
    %c0_72 = arith.constant 0 : index
    %c0_73 = arith.constant 0 : index
    %c0_74 = arith.constant 0 : index
    %88 = vector.load %arg4[%c0_71, %c0_72, %c0_73, %c0_74] : memref<1x14x14x240xf32, #tpu.memory_space<vmem>>, vector<1x14x14x240xf32>
    %cst_75 = arith.constant dense<0.000000e+00> : vector<240xf32>
    %89 = vector.multi_reduction <add>, %88, %cst_75 [0, 1, 2] : vector<1x14x14x240xf32> to vector<240xf32>
    %90 = vector.shape_cast %89 : vector<240xf32> to vector<1x1x1x240xf32>
    %cst_76 = arith.constant 0.00510204071 : f32
    %91 = vector.broadcast %cst_76 : f32 to vector<1x1x1x240xf32>
    %92 = arith.mulf %90, %91 : vector<1x1x1x240xf32>
    %c0_77 = arith.constant 0 : index
    %c0_78 = arith.constant 0 : index
    %c0_79 = arith.constant 0 : index
    %c0_80 = arith.constant 0 : index
    %93 = vector.load %arg4[%c0_77, %c0_78, %c0_79, %c0_80] : memref<1x14x14x240xf32, #tpu.memory_space<vmem>>, vector<1x14x14x240xf32>
    %94 = vector.broadcast %92 : vector<1x1x1x240xf32> to vector<1x14x14x240xf32>
    %95 = arith.subf %93, %94 : vector<1x14x14x240xf32>
    %96 = arith.mulf %95, %95 : vector<1x14x14x240xf32>
    %cst_81 = arith.constant dense<0.000000e+00> : vector<240xf32>
    %97 = vector.multi_reduction <add>, %96, %cst_81 [0, 1, 2] : vector<1x14x14x240xf32> to vector<240xf32>
    %98 = vector.shape_cast %97 : vector<240xf32> to vector<1x1x1x240xf32>
    %cst_82 = arith.constant 0.00510204071 : f32
    %99 = vector.broadcast %cst_82 : f32 to vector<1x1x1x240xf32>
    %100 = arith.mulf %98, %99 : vector<1x1x1x240xf32>
    %cst_83 = arith.constant 9.99999974E-6 : f32
    %101 = vector.broadcast %cst_83 : f32 to vector<1x1x1x240xf32>
    %102 = arith.addf %100, %101 : vector<1x1x1x240xf32>
    %103 = math.rsqrt %102 : vector<1x1x1x240xf32>
    %c0_84 = arith.constant 0 : index
    %c0_85 = arith.constant 0 : index
    %c0_86 = arith.constant 0 : index
    %c0_87 = arith.constant 0 : index
    %104 = vector.load %arg2[%c0_84, %c0_85, %c0_86, %c0_87] : memref<1x1x1x240xf32, #tpu.memory_space<vmem>>, vector<1x1x1x240xf32>
    %105 = arith.mulf %104, %103 : vector<1x1x1x240xf32>
    %c0_88 = arith.constant 0 : index
    %c0_89 = arith.constant 0 : index
    %c0_90 = arith.constant 0 : index
    %c0_91 = arith.constant 0 : index
    %106 = vector.load %arg3[%c0_88, %c0_89, %c0_90, %c0_91] : memref<1x1x1x240xf32, #tpu.memory_space<vmem>>, vector<1x1x1x240xf32>
    %107 = arith.mulf %92, %105 : vector<1x1x1x240xf32>
    %108 = arith.subf %106, %107 : vector<1x1x1x240xf32>
    %c0_92 = arith.constant 0 : index
    %c0_93 = arith.constant 0 : index
    %c0_94 = arith.constant 0 : index
    %c0_95 = arith.constant 0 : index
    %109 = vector.load %arg4[%c0_92, %c0_93, %c0_94, %c0_95] : memref<1x14x14x240xf32, #tpu.memory_space<vmem>>, vector<1x14x14x240xf32>
    %110 = vector.broadcast %105 : vector<1x1x1x240xf32> to vector<1x14x14x240xf32>
    %111 = arith.mulf %109, %110 : vector<1x14x14x240xf32>
    %112 = vector.broadcast %108 : vector<1x1x1x240xf32> to vector<1x14x14x240xf32>
    %113 = arith.addf %111, %112 : vector<1x14x14x240xf32>
    %cst_96 = arith.constant 0.000000e+00 : f32
    %114 = vector.broadcast %cst_96 : f32 to vector<1x14x14x240xf32>
    %115 = arith.maximumf %113, %114 : vector<1x14x14x240xf32>
    %c0_97 = arith.constant 0 : index
    %c0_98 = arith.constant 0 : index
    %c0_99 = arith.constant 0 : index
    %c0_100 = arith.constant 0 : index
    %116 = vector.load %arg4[%c0_97, %c0_98, %c0_99, %c0_100] : memref<1x14x14x240xf32, #tpu.memory_space<vmem>>, vector<1x14x14x240xf32>
    tpu.vector_store %arg4[%c0_97, %c0_98, %c0_99, %c0_100], %115 {strides = array<i32>} : memref<1x14x14x240xf32, #tpu.memory_space<vmem>>, vector<1x14x14x240xf32>,
    return
  }
}

</mosaic_0001>

<bundles_post_ra>
// kernel: tpu_custom_call.1
= control target key start
LH: loop header
LB: loop body
LE: loop exit
PB: predicated region body
PF: predicated region fallthrough
CT: control target
= control target key end

     0   :  { %vm18_vm0 = vcmask 916480   ;;  %vm23_vm1 = vcmask 915456   ;;  %v3660_v0 = vmov 0.0   ;;  %vm148_vm2 = vcmask 914432   ;;  %s7061_s0 = inlined_call_operand.vmem [shape: f32[1,14,14,240], index: 0, kind: input, shape index: {}]   ;;  %s7062_s1 = inlined_call_operand.vmem [shape: f32[3,3,240], index: 1, kind: input, shape index: {}]   ;;  %s7063_s4 = inlined_call_operand.vmem [shape: f32[1,14,14,240], index: 4, kind: output, shape index: {}]   ;;  %s7064_s2 = inlined_call_operand.vmem [shape: f32[1,1,1,240], index: 2, kind: input, shape index: {}]   ;;  %s7065_s3 = inlined_call_operand.vmem [shape: f32[1,1,1,240], index: 3, kind: input, shape index: {}]  }
   0x1   :  { %19 = vst.msk [vmem:[#allocation2 + $0x8] sm:$0xff] %vm18_vm0, %v3660_v0  ;;  %17 = vst [vmem:[#allocation2] sm:$0xff] %v3660_v0  ;;  %v32_v1 = vld [vmem:[%s7061_s0] sm:$0xff]  ;;  %v33_v2 = vld [vmem:[%s7061_s0 + $0x8] sm:$0xff]  ;;  %v262_v62 = vlaneseq  ;;  %vm1642_vm3 = vcmask 1040384   ;;  %vm2627_vm5 = vcmask 1046528  }
   0x2   :  { %20 = vst [vmem:[#allocation2 + $0x10] sm:$0xff] %v3660_v0  ;;  %21 = vst.msk [vmem:[#allocation2 + $0x18] sm:$0xff] %vm18_vm0, %v3660_v0  ;;  %v34_v3 = vld [vmem:[%s7061_s0 + $0x10] sm:$0x3f]  ;;  %v3700_v4 = vmax.f32 %v32_v1, 0.0  ;;  %v89_v5 = vmax.f32 %v33_v2, 0.0 }
   0x3   :  { %22 = vst [vmem:[#allocation2 + $0x20] sm:$0x7f] %v3660_v0  ;;  %26 = vst [vmem:[#allocation2 + $0x2d0] sm:$0xff] %v3660_v0  ;;  %v90_v6 = vmax.f32 %v34_v3, 0.0  ;;  %v35_v7 = vld [vmem:[%s7061_s0 + $0x18] sm:$0x3f] }
   0x4   :  { %27 = vst.msk [vmem:[#allocation2 + $0x2d8] sm:$0xff] %vm18_vm0, %v3660_v0  ;;  %28 = vst [vmem:[#allocation2 + $0x2e0] sm:$0xff] %v3660_v0  ;;  %v36_v8 = vld [vmem:[%s7061_s0 + $0x20] sm:$0xff]  ;;  %v91_v9 = vmax.f32 %v35_v7, 0.0  ;;  %v37_v11 = vld [vmem:[%s7061_s0 + $0x28] sm:$0xff]  ;;  %vm2992_vm7 = vcmask 1045504  }
   0x5   :  { %29 = vst.msk [vmem:[#allocation2 + $0x2e8] sm:$0xff] %vm18_vm0, %v3660_v0  ;;  %30 = vst [vmem:[#allocation2 + $0x2f0] sm:$0x7f] %v3660_v0  ;;  %v3708_v10 = vmax.f32 %v36_v8, 0.0  ;;  %v38_v12 = vld [vmem:[%s7061_s0 + $0x30] sm:$0x3f] }
   0x6   :  { %24 = vst.msk [vmem:[#allocation2 + $0x28] sm:$0x7f] %vm23_vm1, %v3660_v0  ;;  %31 = vst.msk [vmem:[#allocation2 + $0x2f8] sm:$0x7f] %vm23_vm1, %v3660_v0  ;;  %v40_v13 = vld [vmem:[%s7061_s0 + $0x40] sm:$0xff]  ;;  %v93_v14 = vmax.f32 %v37_v11, 0.0 }
   0x7   :  { %145 = vst [vmem:[#allocation2 + $0x40] sm:$0xff] %v3700_v4  ;;  %146 = vst.msk [vmem:[#allocation2 + $0x48] sm:$0xff] %vm18_vm0, %v89_v5  ;;  %v94_v15 = vmax.f32 %v38_v12, 0.0  ;;  %v39_v16 = vld [vmem:[%s7061_s0 + $0x38] sm:$0x3f]  ;;  %v3724_v17 = vmax.f32 %v40_v13, 0.0 }
   0x8   :  { %147 = vst [vmem:[#allocation2 + $0x50] sm:$0x3f] %v90_v6  ;;  %v41_v18 = vld [vmem:[%s7061_s0 + $0x48] sm:$0xff]  ;;  %149 = vst.msk [vmem:[#allocation2 + $0x58] sm:$0x3f] %vm148_vm2, %v91_v9  ;;  %v95_v19 = vmax.f32 %v39_v16, 0.0 }
   0x9   :  { %150 = vst [vmem:[#allocation2 + $0x70] sm:$0xff] %v3708_v10  ;;  %v97_v20 = vmax.f32 %v41_v18, 0.0  ;;  %v42_v21 = vld [vmem:[%s7061_s0 + $0x50] sm:$0x3f]  ;;  %v43_v22 = vld [vmem:[%s7061_s0 + $0x58] sm:$0x3f] }
   0xa   :  { %151 = vst.msk [vmem:[#allocation2 + $0x78] sm:$0xff] %vm18_vm0, %v93_v14  ;;  %152 = vst [vmem:[#allocation2 + $0x80] sm:$0x3f] %v94_v15  ;;  %v98_v23 = vmax.f32 %v42_v21, 0.0  ;;  %v99_v24 = vmax.f32 %v43_v22, 0.0  ;;  %v44_v25 = vld [vmem:[%s7061_s0 + $0x60] sm:$0xff] }
   0xb   :  { %154 = vst [vmem:[#allocation2 + $0xa0] sm:$0xff] %v3724_v17  ;;  %v45_v26 = vld [vmem:[%s7061_s0 + $0x68] sm:$0xff]  ;;  %v46_v27 = vld [vmem:[%s7061_s0 + $0x70] sm:$0x3f]  ;;  %153 = vst.msk [vmem:[#allocation2 + $0x88] sm:$0x3f] %vm148_vm2, %v95_v19 }
   0xc   :  { %155 = vst.msk [vmem:[#allocation2 + $0xa8] sm:$0xff] %vm18_vm0, %v97_v20  ;;  %v3750_v28 = vmax.f32 %v44_v25, 0.0  ;;  %v101_v29 = vmax.f32 %v45_v26, 0.0  ;;  %v102_v30 = vmax.f32 %v46_v27, 0.0  ;;  %v47_v31 = vld [vmem:[%s7061_s0 + $0x78] sm:$0x3f] }
   0xd   :  { %v48_v32 = vld [vmem:[%s7061_s0 + $0x80] sm:$0xff]  ;;  %156 = vst [vmem:[#allocation2 + $0xb0] sm:$0x3f] %v98_v23  ;;  %157 = vst.msk [vmem:[#allocation2 + $0xb8] sm:$0x3f] %vm148_vm2, %v99_v24  ;;  %v103_v33 = vmax.f32 %v47_v31, 0.0 }
   0xe   :  { %v3759_v34 = vmax.f32 %v48_v32, 0.0  ;;  %v49_v35 = vld [vmem:[%s7061_s0 + $0x88] sm:$0xff]  ;;  %v50_v36 = vld [vmem:[%s7061_s0 + $0x90] sm:$0x3f]  ;;  %v52_v37 = vld [vmem:[%s7061_s0 + $0xa0] sm:$0xff]  ;;  %158 = vst [vmem:[#allocation2 + $0xd0] sm:$0xff] %v3750_v28 }
   0xf   :  { %159 = vst.msk [vmem:[#allocation2 + $0xd8] sm:$0xff] %vm18_vm0, %v101_v29  ;;  %160 = vst [vmem:[#allocation2 + $0xe0] sm:$0x3f] %v102_v30  ;;  %v105_v38 = vmax.f32 %v49_v35, 0.0  ;;  %v106_v39 = vmax.f32 %v50_v36, 0.0  ;;  %v3775_v41 = vmax.f32 %v52_v37, 0.0 }
  0x10   :  { %v51_v40 = vld [vmem:[%s7061_s0 + $0x98] sm:$0x3f]  ;;  %v53_v42 = vld [vmem:[%s7061_s0 + $0xa8] sm:$0xff]  ;;  %161 = vst.msk [vmem:[#allocation2 + $0xe8] sm:$0x3f] %vm148_vm2, %v103_v33  ;;  %162 = vst [vmem:[#allocation2 + $0x100] sm:$0xff] %v3759_v34 }
  0x11   :  { %v107_v43 = vmax.f32 %v51_v40, 0.0  ;;  %v109_v44 = vmax.f32 %v53_v42, 0.0  ;;  %v54_v45 = vld [vmem:[%s7061_s0 + $0xb0] sm:$0x3f]  ;;  %v55_v46 = vld [vmem:[%s7061_s0 + $0xb8] sm:$0x3f] }
  0x12   :  { %163 = vst.msk [vmem:[#allocation2 + $0x108] sm:$0xff] %vm18_vm0, %v105_v38  ;;  %164 = vst [vmem:[#allocation2 + $0x110] sm:$0x3f] %v106_v39  ;;  %v110_v47 = vmax.f32 %v54_v45, 0.0  ;;  %v111_v48 = vmax.f32 %v55_v46, 0.0  ;;  %v57_v49 = vld [vmem:[%s7061_s0 + $0xc8] sm:$0xff] }
  0x13   :  { %166 = vst [vmem:[#allocation2 + $0x130] sm:$0xff] %v3775_v41  ;;  %v56_v50 = vld [vmem:[%s7061_s0 + $0xc0] sm:$0xff]  ;;  %v58_v51 = vld [vmem:[%s7061_s0 + $0xd0] sm:$0x3f]  ;;  %165 = vst.msk [vmem:[#allocation2 + $0x118] sm:$0x3f] %vm148_vm2, %v107_v43 }
  0x14   :  { %167 = vst.msk [vmem:[#allocation2 + $0x138] sm:$0xff] %vm18_vm0, %v109_v44  ;;  %v113_v52 = vmax.f32 %v57_v49, 0.0  ;;  %v3801_v53 = vmax.f32 %v56_v50, 0.0  ;;  %v114_v54 = vmax.f32 %v58_v51, 0.0  ;;  %v59_v55 = vld [vmem:[%s7061_s0 + $0xd8] sm:$0x3f] }
  0x15   :  { %v61_v56 = vld [vmem:[%s7061_s0 + $0xe8] sm:$0xff]  ;;  %168 = vst [vmem:[#allocation2 + $0x140] sm:$0x3f] %v110_v47  ;;  %169 = vst.msk [vmem:[#allocation2 + $0x148] sm:$0x3f] %vm148_vm2, %v111_v48  ;;  %v115_v57 = vmax.f32 %v59_v55, 0.0 }
  0x16   :  { %v117_v58 = vmax.f32 %v61_v56, 0.0  ;;  %v60_v59 = vld [vmem:[%s7061_s0 + $0xe0] sm:$0xff]  ;;  %v62_v60 = vld [vmem:[%s7061_s0 + $0xf0] sm:$0x3f]  ;;  %v65_v61 = vld [vmem:[%s7061_s0 + $0x108] sm:$0xff]  ;;  %171 = vst.msk [vmem:[#allocation2 + $0x168] sm:$0xff] %vm18_vm0, %v113_v52 }
  0x17   :  { %170 = vst [vmem:[#allocation2 + $0x160] sm:$0xff] %v3801_v53  ;;  %172 = vst [vmem:[#allocation2 + $0x170] sm:$0x3f] %v114_v54  ;;  %v3821_v63 = vmax.f32 %v60_v59, 0.0  ;;  %v118_v0 = vmax.f32 %v62_v60, 0.0  ;;  %v121_v2 = vmax.f32 %v65_v61, 0.0 }
  0x18   :  { %v63_v1 = vld [vmem:[%s7061_s0 + $0xf8] sm:$0x3f]  ;;  %v64_v3 = vld [vmem:[%s7061_s0 + $0x100] sm:$0xff]  ;;  %173 = vst.msk [vmem:[#allocation2 + $0x178] sm:$0x3f] %vm148_vm2, %v115_v57  ;;  %v69_v12 = vld [vmem:[%s7061_s0 + $0x128] sm:$0xff] }
  0x19   :  { %175 = vst.msk [vmem:[#allocation2 + $0x198] sm:$0xff] %vm18_vm0, %v117_v58  ;;  %v119_v5 = vmax.f32 %v63_v1, 0.0  ;;  %v3831_v6 = vmax.f32 %v64_v3, 0.0  ;;  %v66_v7 = vld [vmem:[%s7061_s0 + $0x110] sm:$0x3f]  ;;  %174 = vst [vmem:[#allocation2 + $0x190] sm:$0xff] %v3821_v63 }
  0x1a   :  { %v67_v8 = vld [vmem:[%s7061_s0 + $0x118] sm:$0x3f]  ;;  %176 = vst [vmem:[#allocation2 + $0x1a0] sm:$0x3f] %v118_v0  ;;  %179 = vst.msk [vmem:[#allocation2 + $0x1c8] sm:$0xff] %vm18_vm0, %v121_v2  ;;  %v122_v9 = vmax.f32 %v66_v7, 0.0 }
  0x1b   :  { %v123_v11 = vmax.f32 %v67_v8, 0.0  ;;  %v3847_v13 = vld [vmem:[%s7061_s0 + $0x120] sm:$0xff]  ;;  %v70_v14 = vld [vmem:[%s7061_s0 + $0x130] sm:$0x3f]  ;;  %177 = vst.msk [vmem:[#allocation2 + $0x1a8] sm:$0x3f] %vm148_vm2, %v119_v5 }
  0x1c   :  { %178 = vst [vmem:[#allocation2 + $0x1c0] sm:$0xff] %v3831_v6  ;;  %v125_v15 = vmax.f32 %v69_v12, 0.0  ;;  %v7066_v16 = vmax.f32 %v3847_v13, 0.0  ;;  %v126_v18 = vmax.f32 %v70_v14, 0.0  ;;  %v71_v19 = vld [vmem:[%s7061_s0 + $0x138] sm:$0x3f] }
  0x1d   :  { %v3858_v20 = vshrl.u32 %v262_v62, 7  ;;  %180 = vst [vmem:[#allocation2 + $0x1d0] sm:$0x3f] %v122_v9  ;;  %181 = vst.msk [vmem:[#allocation2 + $0x1d8] sm:$0x3f] %vm148_vm2, %v123_v11  ;;  %v127_v21 = vmax.f32 %v71_v19, 0.0 }
  0x1e   :  { %v202_v22 = vld [vmem:[%s7062_s1] sm:$0x77]  ;;  %v203_v23 = vld [vmem:[%s7062_s1 + $0x8] sm:$0x77]  ;;  %183 = vst.msk [vmem:[#allocation2 + $0x1f8] sm:$0xff] %vm18_vm0, %v125_v15  ;;  %182 = vst [vmem:[#allocation2 + $0x1f0] sm:$0xff] %v7066_v16 }
  0x1f   :  { %184 = vst [vmem:[#allocation2 + $0x200] sm:$0x3f] %v126_v18  ;;  %v204_v24 = vld [vmem:[%s7062_s1 + $0x10] sm:$0x77]  ;;  %v3874_v25 = vsub.s32 1, %v3858_v20  ;;  %v3877_v26 = vsub.s32 0, %v3858_v20 }
  0x20   :  { %v918_v27 = vsub.s32 4, %v3858_v20  ;;  %185 = vst.msk [vmem:[#allocation2 + $0x208] sm:$0x3f] %vm148_vm2, %v127_v21  ;;  %v268_v29 = vsub.s32 5, %v3858_v20  ;;  %v207_v48 = vld [vmem:[#allocation2 + $0x20] sm:$0x3f] }
  0x21   :  { %7097 = vst [vmem:[#allocation3_spill] sm:$0xff] %v3874_v25  ;;  %7098 = vst [vmem:[#allocation4_spill] sm:$0xff] %v3877_v26  ;;  %v265_v30 = vrot.slane %v202_v22, %v3874_v25  ;;  %v396_v31 = vrot.slane %v203_v23, %v3874_v25  ;;  %v584_v32 = vrot.slane %v204_v24, %v3874_v25  ;;  %v338_v49 = vld [vmem:[#allocation2 + $0x50] sm:$0x3f]  ;;  %v526_v50 = vld [vmem:[#allocation2 + $0x80] sm:$0x3f] }
  0x22   :  { %v915_v33 = vrot.slane %v202_v22, %v3877_v26  ;;  %v919_v35 = vrot.slane %v202_v22, %v918_v27  ;;  %v1101_v36 = vrot.slane %v203_v23, %v3877_v26  ;;  %v1105_v37 = vrot.slane %v203_v23, %v918_v27  ;;  %v3920_v61 = vld [vmem:[#allocation2 + $0x18] sm:$0xff]  ;;  %v3922_v62 = vld [vmem:[#allocation2 + $0x48] sm:$0xff]  ;;  %v76_v16 = vld [vmem:[%s7061_s0 + $0x160] sm:$0xff] }
  0x23   :  { %v1371_v38 = vrot.slane %v204_v24, %v3877_v26  ;;  %v3889_v39 = vrot.slane %v265_v30, %v3874_v25  ;;  %v3892_v40 = vrot.slane %v396_v31, %v3874_v25  ;;  %v3895_v42 = vrot.slane %v584_v32, %v3874_v25  ;;  %v208_v3 = vld [vmem:[#allocation2 + $0x28] sm:$0x3f]  ;;  %v339_v9 = vld [vmem:[#allocation2 + $0x58] sm:$0x3f]  ;;  %v342_v30 = vld [vmem:[#allocation2 + $0x80] sm:$0x3f] }
  0x24   :  { %v3898_v43 = vrot.slane %v915_v33, %v3877_v26  ;;  %v3901_v44 = vrot.slane %v919_v35, %v3877_v26  ;;  %v3904_v45 = vrot.slane %v1101_v36, %v3877_v26  ;;  %v3907_v46 = vrot.slane %v1105_v37, %v3877_v26  ;;  %v527_v11 = vld [vmem:[#allocation2 + $0x88] sm:$0x3f]  ;;  %v3940_v15 = vld [vmem:[#allocation2 + $0x78] sm:$0xff]  ;;  %v530_v37 = vld [vmem:[#allocation2 + $0xb0] sm:$0x3f] }
  0x25   :  { %v1375_v47 = vrot.slane %v204_v24, %v918_v27  ;;  %v280_v51 = vmul.f32 0.0, %v3889_v39  ;;  %v411_v52 = vmul.f32 %v3892_v40, %v3700_v4  ;;  %v599_v54 = vmul.f32 %v3895_v42, %v3708_v10  ;;  %v3955_v36 = vld [vmem:[#allocation2 + $0xa8] sm:$0xff] }
  0x26   :  { %v3915_v55 = vrot.slane %v1371_v38, %v3877_v26  ;;  %v269_v57 = vrot.slane %v202_v22, %v268_v29  ;;  %v400_v58 = vrot.slane %v203_v23, %v268_v29  ;;  %v588_v59 = vrot.slane %v204_v24, %v268_v29  ;;  %v211_v29 = vld [vmem:[#allocation2 + $0x50] sm:$0x3f]  ;;  %v212_v38 = vld [vmem:[#allocation2 + $0x58] sm:$0x3f] }
  0x27   :  { %v3918_v56 = vrot.slane %v1375_v47, %v3877_v26  ;;  %v467_v60 = vadd.f32 %v411_v52, %v280_v51  ;;  %v282_v0 = vmul.f32 %v3889_v39, %v207_v48  ;;  %v413_v1 = vmul.f32 %v3892_v40, %v338_v49  ;;  %v343_v51 = vld [vmem:[#allocation2 + $0x88] sm:$0x3f]  ;;  %v531_v52 = vld [vmem:[#allocation2 + $0xb8] sm:$0x3f] }
  0x28   :  { %v601_v2 = vmul.f32 %v3895_v42, %v526_v50  ;;  %v3928_v5 = vrot.slane %v269_v57, %v3874_v25  ;;  %v3931_v7 = vrot.slane %v400_v58, %v3874_v25  ;;  %v3934_v8 = vrot.slane %v588_v59, %v3874_v25 }
  0x29   :  { %v284_v12 = vmul.f32 %v3889_v39, %v3700_v4  ;;  %v3938_v14 = vadd.f32 %v599_v54, %v467_v60  ;;  %v469_v18 = vadd.f32 %v413_v1, %v282_v0  ;;  %v415_v19 = vmul.f32 %v3892_v40, %v3708_v10 }
  0x2a   :  { %v603_v21 = vmul.f32 %v3895_v42, %v3724_v17  ;;  %v281_v22 = vmul.f32 %v3928_v5, %v3920_v61  ;;  %v412_v23 = vmul.f32 %v3931_v7, %v3922_v62  ;;  %v600_v24 = vmul.f32 %v3934_v8, %v3940_v15 }
  0x2b   :  { %v283_v27 = vmul.f32 %v3928_v5, %v208_v3  ;;  %v657_v31 = vadd.f32 %v601_v2, %v469_v18  ;;  %v414_v32 = vmul.f32 %v3931_v7, %v339_v9  ;;  %v602_v33 = vmul.f32 %v3934_v8, %v527_v11  ;;  %v215_v18 = vld [vmem:[#allocation2 + $0x80] sm:$0x3f] }
  0x2c   :  { %v471_v35 = vadd.f32 %v415_v19, %v284_v12  ;;  %v468_v47 = vadd.f32 %v412_v23, %v281_v22  ;;  %v285_v48 = vmul.f32 %v3922_v62, %v3928_v5  ;;  %v416_v49 = vmul.f32 %v3940_v15, %v3931_v7  ;;  %v346_v19 = vld [vmem:[#allocation2 + $0xb0] sm:$0x3f] }
  0x2d   :  { %v604_v50 = vmul.f32 %v3934_v8, %v3955_v36  ;;  %713 = vst [vmem:[%s7063_s4 + $0x10] sm:$0x3f] %v657_v31  ;;  %v470_v54 = vadd.f32 %v414_v32, %v283_v27  ;;  %v286_v58 = vmul.f32 %v3889_v39, %v211_v29  ;;  %v417_v59 = vmul.f32 %v3892_v40, %v342_v30  ;;  %v534_v27 = vld [vmem:[#allocation2 + $0xe0] sm:$0x3f]  ;;  %v216_v29 = vld [vmem:[#allocation2 + $0x88] sm:$0x3f] }
  0x2e   :  { %v3966_v57 = vadd.f32 %v603_v21, %v471_v35  ;;  %v656_v60 = vadd.f32 %v600_v24, %v468_v47  ;;  %v472_v0 = vadd.f32 %v416_v49, %v285_v48  ;;  %v605_v1 = vmul.f32 %v3895_v42, %v530_v37  ;;  %v3992_v35 = vld [vmem:[#allocation2 + $0xd8] sm:$0xff] }
  0x2f   :  { %v287_v2 = vmul.f32 %v3928_v5, %v212_v38  ;;  %v658_v3 = vadd.f32 %v602_v33, %v470_v54  ;;  %v473_v9 = vadd.f32 %v417_v59, %v286_v58  ;;  %v418_v11 = vmul.f32 %v3931_v7, %v343_v51  ;;  %v347_v37 = vld [vmem:[#allocation2 + $0xb8] sm:$0x3f]  ;;  %v535_v38 = vld [vmem:[#allocation2 + $0xe8] sm:$0x3f] }
  0x30   :  { %v606_v12 = vmul.f32 %v3934_v8, %v531_v52  ;;  %712 = vst.msk [vmem:[%s7063_s4 + $0x8] sm:$0xff] %vm18_vm0, %v656_v60  ;;  %v660_v21 = vadd.f32 %v604_v50, %v472_v0  ;;  %v288_v22 = vmul.f32 %v3889_v39, %v3708_v10  ;;  %v419_v23 = vmul.f32 %v3892_v40, %v3724_v17 }
  0x31   :  { %v607_v24 = vmul.f32 %v3895_v42, %v3750_v28  ;;  %714 = vst.msk [vmem:[%s7063_s4 + $0x18] sm:$0x3f] %vm148_vm2, %v658_v3  ;;  %v661_v30 = vadd.f32 %v605_v1, %v473_v9  ;;  %v474_v31 = vadd.f32 %v418_v11, %v287_v2  ;;  %v289_v32 = vmul.f32 %v3940_v15, %v3928_v5  ;;  %v219_v2 = vld [vmem:[#allocation2 + $0xb0] sm:$0x3f]  ;;  %v350_v3 = vld [vmem:[#allocation2 + $0xe0] sm:$0x3f] }
  0x32   :  { %v420_v33 = vmul.f32 %v3955_v36, %v3931_v7  ;;  %716 = vst.msk [vmem:[%s7063_s4 + $0x28] sm:$0xff] %vm18_vm0, %v660_v21  ;;  %v475_v47 = vadd.f32 %v419_v23, %v288_v22  ;;  %v608_v48 = vmul.f32 %v3934_v8, %v3992_v35  ;;  %v290_v49 = vmul.f32 %v3889_v39, %v215_v18  ;;  %v220_v21 = vld [vmem:[#allocation2 + $0xb8] sm:$0x3f] }
  0x33   :  { %v421_v50 = vmul.f32 %v3892_v40, %v346_v19  ;;  %717 = vst [vmem:[%s7063_s4 + $0x30] sm:$0x3f] %v661_v30  ;;  %v662_v51 = vadd.f32 %v606_v12, %v474_v31  ;;  %v609_v54 = vmul.f32 %v3895_v42, %v534_v27  ;;  %v291_v58 = vmul.f32 %v3928_v5, %v216_v29  ;;  %v538_v19 = vld [vmem:[#allocation2 + $0x110] sm:$0x3f]  ;;  %v4025_v29 = vld [vmem:[#allocation2 + $0x108] sm:$0xff] }
  0x34   :  { %v476_v52 = vadd.f32 %v420_v33, %v289_v32  ;;  %v4007_v59 = vadd.f32 %v607_v24, %v475_v47  ;;  %v422_v0 = vmul.f32 %v3931_v7, %v347_v37  ;;  %v610_v1 = vmul.f32 %v3934_v8, %v535_v38  ;;  %v351_v30 = vld [vmem:[#allocation2 + $0xe8] sm:$0x3f] }
  0x35   :  { %v477_v60 = vadd.f32 %v421_v50, %v290_v49  ;;  %718 = vst.msk [vmem:[%s7063_s4 + $0x38] sm:$0x3f] %vm148_vm2, %v662_v51  ;;  %v292_v11 = vmul.f32 %v3889_v39, %v3724_v17  ;;  %v423_v12 = vmul.f32 %v3892_v40, %v3750_v28  ;;  %v611_v18 = vmul.f32 %v3895_v42, %v3759_v34  ;;  %v539_v17 = vld [vmem:[#allocation2 + $0x118] sm:$0x3f] }
  0x36   :  { %v664_v9 = vadd.f32 %v608_v48, %v476_v52  ;;  %v478_v23 = vadd.f32 %v422_v0, %v291_v58  ;;  %v293_v24 = vmul.f32 %v3955_v36, %v3928_v5  ;;  %v424_v27 = vmul.f32 %v3992_v35, %v3931_v7  ;;  %v223_v58 = vld [vmem:[#allocation2 + $0xe0] sm:$0x3f] }
  0x37   :  { %v665_v22 = vadd.f32 %v609_v54, %v477_v60  ;;  %v479_v31 = vadd.f32 %v423_v12, %v292_v11  ;;  %v612_v32 = vmul.f32 %v3934_v8, %v4025_v29  ;;  %v294_v33 = vmul.f32 %v3889_v39, %v219_v2  ;;  %v354_v60 = vld [vmem:[#allocation2 + $0x110] sm:$0x3f]  ;;  %v224_v11 = vld [vmem:[#allocation2 + $0xe8] sm:$0x3f] }
  0x38   :  { %720 = vst.msk [vmem:[%s7063_s4 + $0x48] sm:$0xff] %vm18_vm0, %v664_v9  ;;  %v425_v37 = vmul.f32 %v3892_v40, %v350_v3  ;;  %v666_v38 = vadd.f32 %v610_v1, %v478_v23  ;;  %v480_v47 = vadd.f32 %v424_v27, %v293_v24  ;;  %v613_v48 = vmul.f32 %v3895_v42, %v538_v19  ;;  %v542_v9 = vld [vmem:[#allocation2 + $0x140] sm:$0x3f]  ;;  %v355_v23 = vld [vmem:[#allocation2 + $0x118] sm:$0x3f] }
  0x39   :  { %721 = vst [vmem:[%s7063_s4 + $0x50] sm:$0x3f] %v665_v22  ;;  %v295_v49 = vmul.f32 %v3928_v5, %v220_v21  ;;  %v4040_v50 = vadd.f32 %v611_v18, %v479_v31  ;;  %v426_v52 = vmul.f32 %v3931_v7, %v351_v30  ;;  %v614_v54 = vmul.f32 %v3934_v8, %v539_v17  ;;  %v4058_v22 = vld [vmem:[#allocation2 + $0x138] sm:$0xff] }
  0x3a   :  { %v481_v51 = vadd.f32 %v425_v37, %v294_v33  ;;  %722 = vst.msk [vmem:[%s7063_s4 + $0x58] sm:$0x3f] %vm148_vm2, %v666_v38  ;;  %v668_v0 = vadd.f32 %v612_v32, %v480_v47  ;;  %v296_v1 = vmul.f32 %v3889_v39, %v3750_v28  ;;  %v427_v2 = vmul.f32 %v3892_v40, %v3759_v34  ;;  %v543_v28 = vld [vmem:[#allocation2 + $0x148] sm:$0x3f] }
  0x3b   :  { %v615_v3 = vmul.f32 %v3895_v42, %v3775_v41  ;;  %v482_v18 = vadd.f32 %v426_v52, %v295_v49  ;;  %v297_v19 = vmul.f32 %v3992_v35, %v3928_v5  ;;  %v428_v21 = vmul.f32 %v4025_v29, %v3931_v7  ;;  %v227_v52 = vld [vmem:[#allocation2 + $0x110] sm:$0x3f] }
  0x3c   :  { %v669_v12 = vadd.f32 %v613_v48, %v481_v51  ;;  %724 = vst.msk [vmem:[%s7063_s4 + $0x68] sm:$0xff] %vm18_vm0, %v668_v0  ;;  %v483_v24 = vadd.f32 %v427_v2, %v296_v1  ;;  %v616_v27 = vmul.f32 %v3934_v8, %v4058_v22  ;;  %v298_v30 = vmul.f32 %v3889_v39, %v223_v58  ;;  %v4077_v51 = vld [vmem:[#allocation2 + $0x168] sm:$0xff]  ;;  %v358_v58 = vld [vmem:[#allocation2 + $0x140] sm:$0x3f]  ;;  %v546_v2 = vld [vmem:[#allocation2 + $0x170] sm:$0x3f] }
  0x3d   :  { %v429_v17 = vmul.f32 %v3892_v40, %v354_v60  ;;  %v670_v31 = vadd.f32 %v614_v54, %v482_v18  ;;  %v484_v32 = vadd.f32 %v428_v21, %v297_v19  ;;  %v617_v33 = vmul.f32 %v3895_v42, %v542_v9  ;;  %v359_v19 = vld [vmem:[#allocation2 + $0x148] sm:$0x3f]  ;;  %v547_v21 = vld [vmem:[#allocation2 + $0x178] sm:$0x3f] }
  0x3e   :  { %725 = vst [vmem:[%s7063_s4 + $0x70] sm:$0x3f] %v669_v12  ;;  %v299_v37 = vmul.f32 %v3928_v5, %v224_v11  ;;  %v4073_v38 = vadd.f32 %v615_v3, %v483_v24  ;;  %v430_v48 = vmul.f32 %v3931_v7, %v355_v23  ;;  %v618_v49 = vmul.f32 %v3934_v8, %v543_v28  ;;  %v228_v3 = vld [vmem:[#allocation2 + $0x118] sm:$0x3f] }
  0x3f   :  { %v485_v47 = vadd.f32 %v429_v17, %v298_v30  ;;  %726 = vst.msk [vmem:[%s7063_s4 + $0x78] sm:$0x3f] %vm148_vm2, %v670_v31  ;;  %v672_v54 = vadd.f32 %v616_v27, %v484_v32  ;;  %v300_v60 = vmul.f32 %v3889_v39, %v3759_v34  ;;  %v431_v0 = vmul.f32 %v3892_v40, %v3775_v41  ;;  %v73_v27 = vld [vmem:[%s7061_s0 + $0x148] sm:$0xff] }
  0x40   :  { %v619_v1 = vmul.f32 %v3895_v42, %v3801_v53  ;;  %v486_v11 = vadd.f32 %v430_v48, %v299_v37  ;;  %v301_v12 = vmul.f32 %v4025_v29, %v3928_v5  ;;  %v432_v18 = vmul.f32 %v4058_v22, %v3931_v7  ;;  %v72_v37 = vld [vmem:[%s7061_s0 + $0x140] sm:$0xff] }
  0x41   :  { %v673_v9 = vadd.f32 %v617_v33, %v485_v47  ;;  %728 = vst.msk [vmem:[%s7063_s4 + $0x88] sm:$0xff] %vm18_vm0, %v672_v54  ;;  %v487_v34 = vadd.f32 %v431_v0, %v300_v60  ;;  %v620_v23 = vmul.f32 %v3934_v8, %v4077_v51  ;;  %v302_v28 = vmul.f32 %v3889_v39, %v227_v52  ;;  %v4109_v33 = vld [vmem:[#allocation2 + $0x198] sm:$0xff] }
  0x42   :  { %v433_v24 = vmul.f32 %v3892_v40, %v358_v58  ;;  %v674_v30 = vadd.f32 %v618_v49, %v486_v11  ;;  %v488_v17 = vadd.f32 %v432_v18, %v301_v12  ;;  %v621_v31 = vmul.f32 %v3895_v42, %v546_v2  ;;  %v74_v49 = vld [vmem:[%s7061_s0 + $0x150] sm:$0x3f]  ;;  %v75_v54 = vld [vmem:[%s7061_s0 + $0x158] sm:$0x3f] }
  0x43   :  { %729 = vst [vmem:[%s7063_s4 + $0x90] sm:$0x3f] %v673_v9  ;;  %v303_v32 = vmul.f32 %v3928_v5, %v228_v3  ;;  %v4114_v47 = vadd.f32 %v619_v1, %v487_v34  ;;  %v434_v52 = vmul.f32 %v3931_v7, %v359_v19  ;;  %v622_v58 = vmul.f32 %v3934_v8, %v547_v21  ;;  %v231_v3 = vld [vmem:[#allocation2 + $0x140] sm:$0x3f]  ;;  %v362_v9 = vld [vmem:[#allocation2 + $0x170] sm:$0x3f] }
  0x44   :  { %v489_v48 = vadd.f32 %v433_v24, %v302_v28  ;;  %730 = vst.msk [vmem:[%s7063_s4 + $0x98] sm:$0x3f] %vm148_vm2, %v674_v30  ;;  %v676_v60 = vadd.f32 %v620_v23, %v488_v17  ;;  %v129_v0 = vmax.f32 %v73_v27, 0.0  ;;  %v305_v1 = vmul.f32 %v4058_v22, %v3928_v5  ;;  %v550_v21 = vld [vmem:[#allocation2 + $0x1a0] sm:$0x3f] }
  0x45   :  { %v436_v2 = vmul.f32 %v4077_v51, %v3931_v7  ;;  %v490_v12 = vadd.f32 %v434_v52, %v303_v32  ;;  %v624_v18 = vmul.f32 %v3934_v8, %v4109_v33  ;;  %v128_v19 = vmax.f32 %v72_v37, 0.0  ;;  %v232_v34 = vld [vmem:[#allocation2 + $0x148] sm:$0x3f]  ;;  %v363_v30 = vld [vmem:[#allocation2 + $0x178] sm:$0x3f] }
  0x46   :  { %v677_v11 = vadd.f32 %v621_v31, %v489_v48  ;;  %732 = vst.msk [vmem:[%s7063_s4 + $0xa8] sm:$0xff] %vm18_vm0, %v676_v60  ;;  %187 = vst.msk [vmem:[#allocation2 + $0x228] sm:$0xff] %vm18_vm0, %v129_v0  ;;  %v304_v28 = vmul.f32 %v3889_v39, %v3775_v41  ;;  %v435_v24 = vmul.f32 %v3892_v40, %v3801_v53  ;;  %v551_v17 = vld [vmem:[#allocation2 + $0x1a8] sm:$0x3f]  ;;  %v130_v37 = vmax.f32 %v74_v49, 0.0 }
  0x47   :  { %v492_v23 = vadd.f32 %v436_v2, %v305_v1  ;;  %v623_v27 = vmul.f32 %v3895_v42, %v3821_v63  ;;  %v77_v31 = vld [vmem:[%s7061_s0 + $0x168] sm:$0xff]  ;;  %v678_v32 = vadd.f32 %v622_v58, %v490_v12  ;;  %186 = vst [vmem:[#allocation2 + $0x220] sm:$0xff] %v128_v19  ;;  %v131_v41 = vmax.f32 %v75_v54, 0.0 }
  0x48   :  { %733 = vst [vmem:[%s7063_s4 + $0xb0] sm:$0x3f] %v677_v11  ;;  %v306_v48 = vmul.f32 %v3889_v39, %v231_v3  ;;  %v491_v60 = vadd.f32 %v435_v24, %v304_v28  ;;  %v437_v0 = vmul.f32 %v3892_v40, %v362_v9  ;;  %v625_v1 = vmul.f32 %v3895_v42, %v550_v21  ;;  %v553_v2 = vld [vmem:[#allocation2 + $0x1c8] sm:$0xff]  ;;  %v78_v9 = vld [vmem:[%s7061_s0 + $0x170] sm:$0x3f] }
  0x49   :  { %v680_v52 = vadd.f32 %v624_v18, %v492_v23  ;;  %734 = vst.msk [vmem:[%s7063_s4 + $0xb8] sm:$0x3f] %vm148_vm2, %v678_v32  ;;  %188 = vst [vmem:[#allocation2 + $0x230] sm:$0x3f] %v130_v37  ;;  %v307_v58 = vmul.f32 %v3928_v5, %v232_v34  ;;  %v438_v49 = vmul.f32 %v3931_v7, %v363_v30  ;;  %v133_v3 = vmax.f32 %v77_v31, 0.0 }
  0x4a   :  { %189 = vst.msk [vmem:[#allocation2 + $0x238] sm:$0x3f] %vm148_vm2, %v131_v41  ;;  %v626_v54 = vmul.f32 %v3934_v8, %v551_v17  ;;  %v679_v11 = vadd.f32 %v623_v27, %v491_v60  ;;  %v493_v12 = vadd.f32 %v437_v0, %v306_v48  ;;  %v309_v18 = vmul.f32 %v4077_v51, %v3928_v5  ;;  %v79_v21 = vld [vmem:[%s7061_s0 + $0x178] sm:$0x3f]  ;;  %v235_v34 = vld [vmem:[#allocation2 + $0x170] sm:$0x3f] }
  0x4b   :  { %736 = vst.msk [vmem:[%s7063_s4 + $0xc8] sm:$0xff] %vm18_vm0, %v680_v52  ;;  %v440_v19 = vmul.f32 %v4109_v33, %v3931_v7  ;;  %v366_v23 = vld [vmem:[#allocation2 + $0x1a0] sm:$0x3f]  ;;  %v494_v28 = vadd.f32 %v438_v49, %v307_v58  ;;  %191 = vst.msk [vmem:[#allocation2 + $0x258] sm:$0xff] %vm18_vm0, %v133_v3  ;;  %v628_v24 = vmul.f32 %v3934_v8, %v553_v2  ;;  %v132_v30 = vmax.f32 %v76_v16, 0.0 }
  0x4c   :  { %v308_v27 = vmul.f32 %v3889_v39, %v3801_v53  ;;  %v554_v17 = vld [vmem:[#allocation2 + $0x1d0] sm:$0x3f]  ;;  %v236_v51 = vld [vmem:[#allocation2 + $0x178] sm:$0x3f]  ;;  %735 = vst [vmem:[%s7063_s4 + $0xc0] sm:$0xff] %v679_v11  ;;  %v681_v31 = vadd.f32 %v625_v1, %v493_v12  ;;  %v439_v37 = vmul.f32 %v3892_v40, %v3821_v63  ;;  %v627_v41 = vmul.f32 %v3895_v42, %v3831_v6  ;;  %v81_v53 = vld [vmem:[%s7061_s0 + $0x188] sm:$0xff] }
  0x4d   :  { %v496_v32 = vadd.f32 %v440_v19, %v309_v18  ;;  %v367_v48 = vld [vmem:[#allocation2 + $0x1a8] sm:$0x3f]  ;;  %v555_v52 = vld [vmem:[#allocation2 + $0x1d8] sm:$0x3f]  ;;  %v682_v16 = vadd.f32 %v626_v54, %v494_v28  ;;  %190 = vst [vmem:[#allocation2 + $0x250] sm:$0xff] %v132_v30  ;;  %v134_v60 = vmax.f32 %v78_v9, 0.0  ;;  %v310_v58 = vmul.f32 %v3889_v39, %v235_v34 }
  0x4e   :  { %v135_v0 = vmax.f32 %v79_v21, 0.0  ;;  %737 = vst [vmem:[%s7063_s4 + $0xd0] sm:$0x3f] %v681_v31  ;;  %v495_v49 = vadd.f32 %v439_v37, %v308_v27  ;;  %v441_v3 = vmul.f32 %v3892_v40, %v366_v23  ;;  %v629_v11 = vmul.f32 %v3895_v42, %v554_v17  ;;  %v557_v12 = vld [vmem:[#allocation2 + $0x1f8] sm:$0xff]  ;;  %v80_v54 = vld [vmem:[%s7061_s0 + $0x180] sm:$0xff] }
  0x4f   :  { %v684_v1 = vadd.f32 %v628_v24, %v496_v32  ;;  %738 = vst.msk [vmem:[%s7063_s4 + $0xd8] sm:$0x3f] %vm148_vm2, %v682_v16  ;;  %192 = vst [vmem:[#allocation2 + $0x260] sm:$0x3f] %v134_v60  ;;  %v311_v9 = vmul.f32 %v3928_v5, %v236_v51  ;;  %v442_v18 = vmul.f32 %v3931_v7, %v367_v48  ;;  %v137_v21 = vmax.f32 %v81_v53, 0.0 }
  0x50   :  { %193 = vst.msk [vmem:[#allocation2 + $0x268] sm:$0x3f] %vm148_vm2, %v135_v0  ;;  %v630_v19 = vmul.f32 %v3934_v8, %v555_v52  ;;  %v683_v34 = vadd.f32 %v627_v41, %v495_v49  ;;  %v497_v23 = vadd.f32 %v441_v3, %v310_v58  ;;  %v313_v28 = vmul.f32 %v4109_v33, %v3928_v5  ;;  %v828_v30 = vld [vmem:[#allocation2] sm:$0x80]  ;;  %v1014_v27 = vld [vmem:[#allocation2 + $0x30] sm:$0x80] }
  0x51   :  { %740 = vst.msk [vmem:[%s7063_s4 + $0xe8] sm:$0xff] %vm18_vm0, %v684_v1  ;;  %v444_v24 = vmul.f32 %v553_v2, %v3931_v7  ;;  %v498_v17 = vadd.f32 %v442_v18, %v311_v9  ;;  %195 = vst.msk [vmem:[#allocation2 + $0x288] sm:$0xff] %vm18_vm0, %v137_v21  ;;  %v632_v51 = vmul.f32 %v3934_v8, %v557_v12  ;;  %v136_v31 = vmax.f32 %v80_v54, 0.0  ;;  %v1284_v37 = vld [vmem:[#allocation2 + $0x60] sm:$0x80] }
  0x52   :  { %v312_v32 = vmul.f32 %v3889_v39, %v3821_v63  ;;  %739 = vst [vmem:[%s7063_s4 + $0xe0] sm:$0xff] %v683_v34  ;;  %v685_v33 = vadd.f32 %v629_v11, %v497_v23  ;;  %v443_v2 = vmul.f32 %v3892_v40, %v3831_v6  ;;  %v7099_v48 = vmax.f32 %v3847_v13, 0.0  ;;  %v829_v53 = vld [vmem:[#allocation2 + $0x8] sm:$0x80]  ;;  %v1015_v58 = vld [vmem:[#allocation2 + $0x38] sm:$0x80] }
  0x53   :  { %v500_v41 = vadd.f32 %v444_v24, %v313_v28  ;;  %vm826_vm4 = vcmp.ge.s32.totalorder %v3858_v20, 1  ;;  %v686_v16 = vadd.f32 %v630_v19, %v498_v17  ;;  %194 = vst [vmem:[#allocation2 + $0x280] sm:$0xff] %v136_v31  ;;  %v930_v63 = vmul.f32 %v3898_v43, %v828_v30  ;;  %v1285_v3 = vld [vmem:[#allocation2 + $0x68] sm:$0x80]  ;;  %v832_v11 = vld [vmem:[#allocation2 + $0x20] sm:$0x1f] }
  0x54   :  { %v631_v52 = vmul.f32 %v3895_v42, %v7099_v48  ;;  %v932_v60 = vmul.f32 0.0, %v3898_v43  ;;  %v1116_v0 = vmul.f32 %v3904_v45, %v1014_v27  ;;  %741 = vst [vmem:[%s7063_s4 + $0xf0] sm:$0x3f] %v685_v33  ;;  %v499_v13 = vadd.f32 %v443_v2, %v312_v32  ;;  %v1018_v19 = vld [vmem:[#allocation2 + $0x50] sm:$0x1f]  ;;  %v836_v2 = vld [vmem:[#allocation2 + $0x40] sm:$0xff] }
  0x55   :  { %v688_v6 = vadd.f32 %v632_v51, %v500_v41  ;;  %v1118_v1 = vmul.f32 %v3904_v45, %v3700_v4  ;;  %v1386_v49 = vmul.f32 %v3915_v55, %v1284_v37  ;;  %742 = vst.msk [vmem:[%s7063_s4 + $0xf8] sm:$0x3f] %vm148_vm2, %v686_v16  ;;  %v1388_v54 = vmul.f32 %v3915_v55, %v3708_v10  ;;  %v1288_v28 = vld [vmem:[#allocation2 + $0x80] sm:$0x1f]  ;;  %v833_v10 = vld [vmem:[#allocation2 + $0x28] sm:$0x1f] }
  0x56   :  { %v1200_v12 = vadd.f32 %v1116_v0, %v930_v63  ;;  %v931_v9 = vmul.f32 %v3901_v44, %v829_v53  ;;  %v933_v18 = vmul.f32 %v3901_v44, %v3920_v61  ;;  %v687_v4 = vadd.f32 %v631_v52, %v499_v13  ;;  %v1019_v24 = vld [vmem:[#allocation2 + $0x58] sm:$0x1f]  ;;  %v1289_v33 = vld [vmem:[#allocation2 + $0x88] sm:$0x1f]  ;;  %v834_v41 = vld [vmem:[#allocation2 + $0x30] sm:$0x80] }
  0x57   :  { %744 = vst.msk [vmem:[%s7063_s4 + $0x108] sm:$0xff] %vm18_vm0, %v688_v6  ;;  %v1202_v21 = vadd.f32 %v1118_v1, %v932_v60  ;;  %v1117_v34 = vmul.f32 %v3907_v46, %v1015_v58  ;;  %v1119_v23 = vmul.f32 %v3907_v46, %v3922_v62  ;;  %v1387_v27 = vmul.f32 %v3918_v56, %v1285_v3  ;;  %v1020_v6 = vld [vmem:[#allocation2 + $0x60] sm:$0x80]  ;;  %v4266_v13 = vld [vmem:[#allocation2 + $0x70] sm:$0xff] }
  0x58   :  { %v1470_v30 = vadd.f32 %v1386_v49, %v1200_v12  ;;  %v1389_v61 = vmul.f32 %v3918_v56, %v3940_v15  ;;  %v934_v17 = vmul.f32 %v3898_v43, %v832_v11  ;;  %743 = vst [vmem:[%s7063_s4 + $0x100] sm:$0xff] %v687_v4  ;;  %v1120_v37 = vmul.f32 %v3904_v45, %v1018_v19  ;;  %v1290_v12 = vld [vmem:[#allocation2 + $0x90] sm:$0x80] }
  0x59   :  { %v1472_v51 = vadd.f32 %v1388_v54, %v1202_v21  ;;  %v1201_v31 = vadd.f32 %v1117_v34, %v931_v9  ;;  %v1203_v32 = vadd.f32 %v1119_v23, %v933_v18  ;;  %v1390_v52 = vmul.f32 %v3915_v55, %v1288_v28  ;;  %v771_v21 = vld [vmem:[%s7063_s4 + $0x8] sm:$0xff] }
  0x5a   :  { %v1643_v48 = vrot.slane %v1470_v30, 7  ;;  %v935_v53 = vmul.f32 %v3901_v44, %v833_v10  ;;  %v1121_v16 = vmul.f32 %v3907_v46, %v1019_v24  ;;  %v1204_v58 = vadd.f32 %v1120_v37, %v934_v17  ;;  %v835_v10 = vld [vmem:[#allocation2 + $0x38] sm:$0x80]  ;;  %v773_v17 = vld [vmem:[%s7063_s4 + $0x18] sm:$0x3f] }
  0x5b   :  { %v1644_v63 = vrot.slane %v1472_v51, 7  ;;  %v1471_v60 = vadd.f32 %v1387_v27, %v1201_v31  ;;  %v1473_v0 = vadd.f32 %v1389_v61, %v1203_v32  ;;  %v1391_v49 = vmul.f32 %v3918_v56, %v1289_v33  ;;  %v772_v27 = vld [vmem:[%s7063_s4 + $0x10] sm:$0x3f] }
  0x5c   :  { %v1205_v1 = vadd.f32 %v1121_v16, %v935_v53  ;;  %v936_v3 = vmul.f32 %v3898_v43, %v834_v41  ;;  %v938_v11 = vmul.f32 %v3898_v43, %v836_v2  ;;  %v1474_v19 = vadd.f32 %v1390_v52, %v1204_v58  ;;  %v1021_v41 = vld [vmem:[#allocation2 + $0x68] sm:$0x80]  ;;  %v1291_v16 = vld [vmem:[#allocation2 + $0x98] sm:$0x80] }
  0x5d   :  { %v1645_v54 = vsel %vm1642_vm3, %v1643_v48, %v1644_v63  ;;  %v1646_v9 = vrot.slane %v1471_v60, 7  ;;  %v1647_v18 = vrot.slane %v1473_v0, 7  ;;  %v1122_v23 = vmul.f32 %v3904_v45, %v1020_v6  ;;  %v838_v60 = vld [vmem:[#allocation2 + $0x50] sm:$0x1f] }
  0x5e   :  { %v1839_v4 = vsel %vm826_vm4, %v1645_v54, 0.0  ;;  %v1475_v34 = vadd.f32 %v1391_v49, %v1205_v1  ;;  %v1124_v28 = vmul.f32 %v3904_v45, %v4266_v13  ;;  %v1649_v61 = vrot.slane %v1474_v19, 7  ;;  %v1024_v49 = vld [vmem:[#allocation2 + $0x80] sm:$0x1f]  ;;  %v1295_v19 = vld [vmem:[#allocation2 + $0xb8] sm:$0x1f] }
  0x5f   :  { %v1895_v24 = vadd.f32 %v1839_v4, %v3938_v14  ;;  %v1648_v30 = vsel %vm1642_vm3, %v1646_v9, %v1647_v18  ;;  %v1392_v51 = vmul.f32 %v3915_v55, %v1290_v12  ;;  %v1206_v37 = vadd.f32 %v1122_v23, %v936_v3  ;;  %v4291_v14 = vld [vmem:[#allocation2 + $0xa0] sm:$0xff]  ;;  %v1294_v3 = vld [vmem:[#allocation2 + $0xb0] sm:$0x1f]  ;;  %v839_v9 = vld [vmem:[#allocation2 + $0x58] sm:$0x1f] }
  0x60   :  { %v1840_v31 = vsel %vm826_vm4, %v1648_v30, 0.0  ;;  %v1651_v32 = vrot.slane %v1475_v34, 7  ;;  %v1208_v33 = vadd.f32 %v1124_v28, %v938_v11  ;;  %v1650_v48 = vsel %vm1642_vm3, %v1644_v63, %v1649_v61  ;;  %v840_v30 = vld [vmem:[#allocation2 + $0x60] sm:$0x80] }
  0x61   :  { %1951 = vst [vmem:[%s7063_s4] sm:$0xff] %v1895_v24  ;;  %v1896_v2 = vadd.f32 %v1840_v31, %v771_v21  ;;  %v1394_v52 = vmul.f32 %v3915_v55, %v4291_v14  ;;  %v937_v53 = vmul.f32 %v3901_v44, %v835_v10  ;;  %v1897_v0 = vadd.f32 %v1650_v48, %v772_v27 }
  0x62   :  { %v1652_v58 = vsel %vm1642_vm3, %v1647_v18, %v1651_v32  ;;  %v1476_v6 = vadd.f32 %v1392_v51, %v1206_v37  ;;  %v939_v1 = vmul.f32 %v3901_v44, %v3922_v62  ;;  %v1123_v12 = vmul.f32 %v3907_v46, %v1021_v41  ;;  %v1025_v18 = vld [vmem:[#allocation2 + $0x88] sm:$0x1f]  ;;  %v1026_v41 = vld [vmem:[#allocation2 + $0x90] sm:$0x80] }
  0x63   :  { %1952 = vst.msk [vmem:[%s7063_s4 + $0x8] sm:$0xff] %vm18_vm0, %v1896_v2  ;;  %v1898_v63 = vadd.f32 %v1652_v58, %v773_v17  ;;  %v1478_v11 = vadd.f32 %v1394_v52, %v1208_v33  ;;  %v1125_v54 = vmul.f32 %v3907_v46, %v3940_v15  ;;  %1953 = vst [vmem:[%s7063_s4 + $0x10] sm:$0x3f] %v1897_v0  ;;  %v1296_v2 = vld [vmem:[#allocation2 + $0xc0] sm:$0x80] }
  0x64   :  { %v1653_v62 = vrot.slane %v1476_v6, 7  ;;  %v1393_v4 = vmul.f32 %v3918_v56, %v1291_v16  ;;  %v1395_v21 = vmul.f32 %v3918_v56, %v3955_v36  ;;  %v940_v34 = vmul.f32 %v3898_v43, %v838_v60  ;;  %v841_v60 = vld [vmem:[#allocation2 + $0x68] sm:$0x80] }
  0x65   :  { %1954 = vst.msk [vmem:[%s7063_s4 + $0x18] sm:$0x3f] %vm148_vm2, %v1898_v63  ;;  %v1654_v23 = vrot.slane %v1478_v11, 7  ;;  %v1207_v28 = vadd.f32 %v1123_v12, %v937_v53  ;;  %v1209_v10 = vadd.f32 %v1125_v54, %v939_v1  ;;  %v1126_v24 = vmul.f32 %v3904_v45, %v1024_v49  ;;  %v775_v49 = vld [vmem:[%s7063_s4 + $0x28] sm:$0xff]  ;;  %v4339_v12 = vld [vmem:[#allocation2 + $0xd0] sm:$0xff] }
  0x66   :  { %v1396_v27 = vmul.f32 %v3915_v55, %v1294_v3  ;;  %v941_v61 = vmul.f32 %v3901_v44, %v839_v9  ;;  %v1127_v17 = vmul.f32 %v3907_v46, %v1025_v18  ;;  %v1397_v51 = vmul.f32 %v3918_v56, %v1295_v19  ;;  %v1027_v54 = vld [vmem:[#allocation2 + $0x98] sm:$0x80]  ;;  %v776_v9 = vld [vmem:[%s7063_s4 + $0x30] sm:$0x3f] }
  0x67   :  { %v1655_v31 = vsel %vm1642_vm3, %v1653_v62, %v1654_v23  ;;  %v1477_v32 = vadd.f32 %v1393_v4, %v1207_v28  ;;  %v1479_v37 = vadd.f32 %v1395_v21, %v1209_v10  ;;  %v1210_v33 = vadd.f32 %v1126_v24, %v940_v34  ;;  %v777_v21 = vld [vmem:[%s7063_s4 + $0x38] sm:$0x3f]  ;;  %v1297_v24 = vld [vmem:[#allocation2 + $0xc8] sm:$0x80] }
  0x68   :  { %v1843_v48 = vsel %vm826_vm4, %v1655_v31, 0.0  ;;  %v1211_v52 = vadd.f32 %v1127_v17, %v941_v61  ;;  %v942_v53 = vmul.f32 %v3898_v43, %v840_v30  ;;  %v944_v16 = vmul.f32 %v4266_v13, %v3898_v43 }
  0x69   :  { %v1899_v0 = vadd.f32 %v1843_v48, %v3966_v57  ;;  %v1656_v58 = vrot.slane %v1477_v32, 7  ;;  %v1657_v6 = vrot.slane %v1479_v37, 7  ;;  %v1480_v1 = vadd.f32 %v1396_v27, %v1210_v33 }
  0x6a   :  { %v1481_v3 = vadd.f32 %v1397_v51, %v1211_v52  ;;  %v1128_v63 = vmul.f32 %v3904_v45, %v1026_v41  ;;  %v1130_v11 = vmul.f32 %v4291_v14, %v3904_v45  ;;  %v1398_v13 = vmul.f32 %v3915_v55, %v1296_v2  ;;  %v844_v51 = vld [vmem:[#allocation2 + $0x80] sm:$0x1f]  ;;  %v1030_v41 = vld [vmem:[#allocation2 + $0xb0] sm:$0x1f] }
  0x6b   :  { %1955 = vst [vmem:[%s7063_s4 + $0x20] sm:$0xff] %v1899_v0  ;;  %v1658_v57 = vsel %vm1642_vm3, %v1656_v58, %v1657_v6  ;;  %v1659_v18 = vrot.slane %v1480_v1, 7  ;;  %v1400_v19 = vmul.f32 %v3915_v55, %v4339_v12  ;;  %v943_v62 = vmul.f32 %v3901_v44, %v841_v60  ;;  %v1300_v2 = vld [vmem:[#allocation2 + $0xe0] sm:$0x1f]  ;;  %v1301_v60 = vld [vmem:[#allocation2 + $0xe8] sm:$0x1f] }
  0x6c   :  { %v1844_v4 = vsel %vm826_vm4, %v1658_v57, 0.0  ;;  %v1661_v34 = vrot.slane %v1481_v3, 7  ;;  %v1212_v28 = vadd.f32 %v1128_v63, %v942_v53  ;;  %v1214_v10 = vadd.f32 %v1130_v11, %v944_v16  ;;  %v845_v53 = vld [vmem:[#allocation2 + $0x88] sm:$0x1f]  ;;  %v1031_v16 = vld [vmem:[#allocation2 + $0xb8] sm:$0x1f] }
  0x6d   :  { %v1900_v30 = vadd.f32 %v1844_v4, %v775_v49  ;;  %v1660_v27 = vsel %vm1642_vm3, %v1654_v23, %v1659_v18  ;;  %v945_v61 = vmul.f32 %v3901_v44, %v3940_v15  ;;  %v1129_v17 = vmul.f32 %v3907_v46, %v1027_v54  ;;  %v846_v11 = vld [vmem:[#allocation2 + $0x90] sm:$0x80]  ;;  %v1032_v18 = vld [vmem:[#allocation2 + $0xc0] sm:$0x80] }
  0x6e   :  { %v1901_v31 = vadd.f32 %v1660_v27, %v776_v9  ;;  %v1662_v32 = vsel %vm1642_vm3, %v1657_v6, %v1661_v34  ;;  %v1482_v37 = vadd.f32 %v1398_v13, %v1212_v28  ;;  %v4362_v33 = vadd.f32 %v1400_v19, %v1214_v10  ;;  %v1302_v34 = vld [vmem:[#allocation2 + $0xf0] sm:$0x80]  ;;  %v847_v28 = vld [vmem:[#allocation2 + $0x98] sm:$0x80] }
  0x6f   :  { %1956 = vst.msk [vmem:[%s7063_s4 + $0x28] sm:$0xff] %vm18_vm0, %v1900_v30  ;;  %v1902_v23 = vadd.f32 %v1662_v32, %v777_v21  ;;  %v1131_v15 = vmul.f32 %v3907_v46, %v3955_v36  ;;  %v1213_v48 = vadd.f32 %v1129_v17, %v943_v62  ;;  %v1399_v52 = vmul.f32 %v3918_v56, %v1297_v24  ;;  %v4397_v32 = vld [vmem:[#allocation2 + $0x100] sm:$0xff] }
  0x70   :  { %1957 = vst [vmem:[%s7063_s4 + $0x30] sm:$0x3f] %v1901_v31  ;;  %v1663_v0 = vrot.slane %v1482_v37, 7  ;;  %v1664_v58 = vrot.slane %v4362_v33, 7  ;;  %v1401_v6 = vmul.f32 %v3918_v56, %v3992_v35  ;;  %v946_v1 = vmul.f32 %v3898_v43, %v844_v51  ;;  %v849_v37 = vld [vmem:[#allocation2 + $0xa8] sm:$0xff] }
  0x71   :  { %1958 = vst.msk [vmem:[%s7063_s4 + $0x38] sm:$0x3f] %vm148_vm2, %v1902_v23  ;;  %v1215_v36 = vadd.f32 %v1131_v15, %v945_v61  ;;  %v1483_v49 = vadd.f32 %v1399_v52, %v1213_v48  ;;  %v1132_v3 = vmul.f32 %v3904_v45, %v1030_v41  ;;  %v1402_v63 = vmul.f32 %v3915_v55, %v1300_v2  ;;  %v1033_v33 = vld [vmem:[#allocation2 + $0xc8] sm:$0x80]  ;;  %v780_v48 = vld [vmem:[%s7063_s4 + $0x50] sm:$0x3f] }
  0x72   :  { %v1665_v13 = vsel %vm1642_vm3, %v1663_v0, %v1664_v58  ;;  %v947_v54 = vmul.f32 %v3901_v44, %v845_v53  ;;  %v1133_v57 = vmul.f32 %v3907_v46, %v1031_v16  ;;  %v1403_v9 = vmul.f32 %v3918_v56, %v1301_v60  ;;  %v781_v0 = vld [vmem:[%s7063_s4 + $0x58] sm:$0x3f] }
  0x73   :  { %v1847_v19 = vsel %vm826_vm4, %v1665_v13, 0.0  ;;  %v1485_v62 = vadd.f32 %v1401_v6, %v1215_v36  ;;  %v1666_v4 = vrot.slane %v1483_v49, 7  ;;  %v1216_v21 = vadd.f32 %v1132_v3, %v946_v1  ;;  %v1303_v49 = vld [vmem:[#allocation2 + $0xf8] sm:$0x80] }
  0x74   :  { %v1903_v10 = vadd.f32 %v1847_v19, %v4007_v59  ;;  %v1217_v24 = vadd.f32 %v1133_v57, %v947_v54  ;;  %v948_v30 = vmul.f32 %v3898_v43, %v846_v11  ;;  %v950_v27 = vmul.f32 %v4291_v14, %v3898_v43  ;;  %v779_v59 = vld [vmem:[%s7063_s4 + $0x48] sm:$0xff]  ;;  %v850_v54 = vld [vmem:[#allocation2 + $0xb0] sm:$0x1f]  ;;  %v1036_v57 = vld [vmem:[#allocation2 + $0xe0] sm:$0x1f] }
  0x75   :  { %v1667_v61 = vrot.slane %v1485_v62, 7  ;;  %v1486_v17 = vadd.f32 %v1402_v63, %v1216_v21  ;;  %v1134_v51 = vmul.f32 %v3904_v45, %v1032_v18  ;;  %v1136_v31 = vmul.f32 %v4339_v12, %v3904_v45  ;;  %v851_v21 = vld [vmem:[#allocation2 + $0xb8] sm:$0x1f] }
  0x76   :  { %1959 = vst [vmem:[%s7063_s4 + $0x40] sm:$0xff] %v1903_v10  ;;  %v1487_v14 = vadd.f32 %v1403_v9, %v1217_v24  ;;  %v1404_v41 = vmul.f32 %v3915_v55, %v1302_v34  ;;  %v1406_v2 = vmul.f32 %v3915_v55, %v4397_v32  ;;  %v949_v23 = vmul.f32 %v3901_v44, %v847_v28  ;;  %v1037_v24 = vld [vmem:[#allocation2 + $0xe8] sm:$0x1f] }
  0x77   :  { %v1668_v15 = vsel %vm1642_vm3, %v1666_v4, %v1667_v61  ;;  %v1669_v52 = vrot.slane %v1486_v17, 7  ;;  %v1218_v53 = vadd.f32 %v1134_v51, %v948_v30  ;;  %v1220_v16 = vadd.f32 %v1136_v31, %v950_v27  ;;  %v1306_v4 = vld [vmem:[#allocation2 + $0x110] sm:$0x1f]  ;;  %v1307_v17 = vld [vmem:[#allocation2 + $0x118] sm:$0x1f] }
  0x78   :  { %v1848_v60 = vsel %vm826_vm4, %v1668_v15, 0.0  ;;  %v1671_v6 = vrot.slane %v1487_v14, 7  ;;  %v951_v1 = vmul.f32 %v3901_v44, %v849_v37  ;;  %v1135_v36 = vmul.f32 %v3907_v46, %v1033_v33  ;;  %v852_v51 = vld [vmem:[#allocation2 + $0xc0] sm:$0x80] }
  0x79   :  { %v1904_v3 = vadd.f32 %v1848_v60, %v779_v59  ;;  %v1670_v63 = vsel %vm1642_vm3, %v1664_v58, %v1669_v52  ;;  %v1488_v11 = vadd.f32 %v1404_v41, %v1218_v53  ;;  %v4421_v13 = vadd.f32 %v1406_v2, %v1220_v16  ;;  %v1308_v15 = vld [vmem:[#allocation2 + $0x120] sm:$0x80] }
  0x7a   :  { %v1905_v9 = vadd.f32 %v1670_v63, %v780_v48  ;;  %v1672_v18 = vsel %vm1642_vm3, %v1667_v61, %v1671_v6  ;;  %v1137_v19 = vmul.f32 %v3907_v46, %v3992_v35  ;;  %v1219_v62 = vadd.f32 %v1135_v36, %v949_v23  ;;  %v1038_v23 = vld [vmem:[#allocation2 + $0xf0] sm:$0x80] }
  0x7b   :  { %1960 = vst.msk [vmem:[%s7063_s4 + $0x48] sm:$0xff] %vm18_vm0, %v1904_v3  ;;  %v1906_v58 = vadd.f32 %v1672_v18, %v781_v0  ;;  %v1673_v34 = vrot.slane %v1488_v11, 7  ;;  %v1674_v28 = vrot.slane %v4421_v13, 7  ;;  %v1405_v10 = vmul.f32 %v3918_v56, %v1303_v49  ;;  %v4449_v48 = vld [vmem:[#allocation2 + $0x130] sm:$0xff]  ;;  %v853_v0 = vld [vmem:[#allocation2 + $0xc8] sm:$0x80] }
  0x7c   :  { %1961 = vst [vmem:[%s7063_s4 + $0x50] sm:$0x3f] %v1905_v9  ;;  %v1221_v35 = vadd.f32 %v1137_v19, %v951_v1  ;;  %v1407_v30 = vmul.f32 %v3918_v56, %v4025_v29  ;;  %v952_v27 = vmul.f32 %v3898_v43, %v850_v54  ;;  %v1138_v61 = vmul.f32 %v3904_v45, %v1036_v57  ;;  %v855_v3 = vld [vmem:[#allocation2 + $0xd8] sm:$0xff]  ;;  %v784_v9 = vld [vmem:[%s7063_s4 + $0x70] sm:$0x3f] }
  0x7d   :  { %1962 = vst.msk [vmem:[%s7063_s4 + $0x58] sm:$0x3f] %vm148_vm2, %v1906_v58  ;;  %v1675_v31 = vsel %vm1642_vm3, %v1673_v34, %v1674_v28  ;;  %v1489_v37 = vadd.f32 %v1405_v10, %v1219_v62  ;;  %v1408_v33 = vmul.f32 %v3915_v55, %v1306_v4  ;;  %v953_v59 = vmul.f32 %v3901_v44, %v851_v21  ;;  %v4473_v4 = vld [vmem:[#allocation2 + $0x108] sm:$0xff] }
  0x7e   :  { %v1851_v29 = vsel %vm826_vm4, %v1675_v31, 0.0  ;;  %v1491_v14 = vadd.f32 %v1407_v30, %v1221_v35  ;;  %v1222_v41 = vadd.f32 %v1138_v61, %v952_v27  ;;  %v1139_v2 = vmul.f32 %v3907_v46, %v1037_v24  ;;  %v1309_v24 = vld [vmem:[#allocation2 + $0x128] sm:$0x80]  ;;  %v785_v27 = vld [vmem:[%s7063_s4 + $0x78] sm:$0x3f] }
  0x7f   :  { %v1907_v52 = vadd.f32 %v1851_v29, %v4040_v50  ;;  %v1676_v53 = vrot.slane %v1489_v37, 7  ;;  %v1409_v16 = vmul.f32 %v3918_v56, %v1307_v17  ;;  %v954_v60 = vmul.f32 %v3898_v43, %v852_v51  ;;  %v783_v50 = vld [vmem:[%s7063_s4 + $0x68] sm:$0xff]  ;;  %v1042_v29 = vld [vmem:[#allocation2 + $0x110] sm:$0x1f] }
  0x80   :  { %v1677_v6 = vrot.slane %v1491_v14, 7  ;;  %v1492_v1 = vadd.f32 %v1408_v33, %v1222_v41  ;;  %v1223_v36 = vadd.f32 %v1139_v2, %v953_v59  ;;  %v956_v49 = vmul.f32 %v4339_v12, %v3898_v43  ;;  %v1039_v12 = vld [vmem:[#allocation2 + $0xf8] sm:$0x80]  ;;  %v856_v59 = vld [vmem:[#allocation2 + $0xe0] sm:$0x1f] }
  0x81   :  { %1963 = vst [vmem:[%s7063_s4 + $0x60] sm:$0xff] %v1907_v52  ;;  %v1140_v63 = vmul.f32 %v3904_v45, %v1038_v23  ;;  %v1142_v11 = vmul.f32 %v4397_v32, %v3904_v45  ;;  %v1410_v13 = vmul.f32 %v3915_v55, %v1308_v15  ;;  %v1412_v54 = vmul.f32 %v3915_v55, %v4449_v48  ;;  %v1312_v14 = vld [vmem:[#allocation2 + $0x140] sm:$0x1f]  ;;  %v857_v15 = vld [vmem:[#allocation2 + $0xe8] sm:$0x1f] }
  0x82   :  { %v1678_v57 = vsel %vm1642_vm3, %v1676_v53, %v1677_v6  ;;  %v1679_v18 = vrot.slane %v1492_v1, 7  ;;  %v1493_v19 = vadd.f32 %v1409_v16, %v1223_v36  ;;  %v955_v62 = vmul.f32 %v3901_v44, %v853_v0  ;;  %v1043_v52 = vld [vmem:[#allocation2 + $0x118] sm:$0x1f]  ;;  %v1313_v1 = vld [vmem:[#allocation2 + $0x148] sm:$0x1f] }
  0x83   :  { %v1852_v21 = vsel %vm826_vm4, %v1678_v57, 0.0  ;;  %v1224_v58 = vadd.f32 %v1140_v63, %v954_v60  ;;  %v1226_v34 = vadd.f32 %v1142_v11, %v956_v49  ;;  %v957_v10 = vmul.f32 %v3901_v44, %v855_v3 }
  0x84   :  { %v1908_v35 = vadd.f32 %v1852_v21, %v783_v50  ;;  %v1680_v30 = vsel %vm1642_vm3, %v1674_v28, %v1679_v18  ;;  %v1681_v61 = vrot.slane %v1493_v19, 7  ;;  %v1141_v17 = vmul.f32 %v3907_v46, %v1039_v12  ;;  %v1314_v19 = vld [vmem:[#allocation2 + $0x150] sm:$0x80] }
  0x85   :  { %v1909_v51 = vadd.f32 %v1680_v30, %v784_v9  ;;  %v1494_v31 = vadd.f32 %v1410_v13, %v1224_v58  ;;  %v4483_v37 = vadd.f32 %v1412_v54, %v1226_v34  ;;  %v1143_v33 = vmul.f32 %v3907_v46, %v4473_v4  ;;  %v1044_v54 = vld [vmem:[#allocation2 + $0x120] sm:$0x80] }
  0x86   :  { %1964 = vst.msk [vmem:[%s7063_s4 + $0x68] sm:$0xff] %vm18_vm0, %v1908_v35  ;;  %v1682_v28 = vsel %vm1642_vm3, %v1677_v6, %v1681_v61  ;;  %v1225_v41 = vadd.f32 %v1141_v17, %v955_v62  ;;  %v1411_v2 = vmul.f32 %v3918_v56, %v1309_v24  ;;  %v1413_v23 = vmul.f32 %v3918_v56, %v4058_v22  ;;  %v858_v22 = vld [vmem:[#allocation2 + $0xf0] sm:$0x80]  ;;  %v4512_v62 = vld [vmem:[#allocation2 + $0x160] sm:$0xff]  ;;  %v787_v24 = vld [vmem:[%s7063_s4 + $0x88] sm:$0xff] }
  0x87   :  { %1965 = vst [vmem:[%s7063_s4 + $0x70] sm:$0x3f] %v1909_v51  ;;  %v1910_v53 = vadd.f32 %v1682_v28, %v785_v27  ;;  %v1683_v16 = vrot.slane %v1494_v31, 7  ;;  %v1684_v60 = vrot.slane %v4483_v37, 7  ;;  %v1227_v0 = vadd.f32 %v1143_v33, %v957_v10  ;;  %v859_v17 = vld [vmem:[#allocation2 + $0xf8] sm:$0x80] }
  0x88   :  { %v1495_v36 = vadd.f32 %v1411_v2, %v1225_v41  ;;  %v958_v6 = vmul.f32 %v3898_v43, %v856_v59  ;;  %v1144_v49 = vmul.f32 %v3904_v45, %v1042_v29  ;;  %v1414_v3 = vmul.f32 %v3915_v55, %v1312_v14  ;;  %v788_v51 = vld [vmem:[%s7063_s4 + $0x90] sm:$0x3f]  ;;  %v1045_v33 = vld [vmem:[#allocation2 + $0x128] sm:$0x80]  ;;  %v4536_v41 = vld [vmem:[#allocation2 + $0x138] sm:$0xff] }
  0x89   :  { %1966 = vst.msk [vmem:[%s7063_s4 + $0x78] sm:$0x3f] %vm148_vm2, %v1910_v53  ;;  %v1685_v50 = vsel %vm1642_vm3, %v1683_v16, %v1684_v60  ;;  %v1497_v63 = vadd.f32 %v1413_v23, %v1227_v0  ;;  %v959_v11 = vmul.f32 %v3901_v44, %v857_v15  ;;  %v1145_v13 = vmul.f32 %v3907_v46, %v1043_v52  ;;  %v1315_v2 = vld [vmem:[#allocation2 + $0x158] sm:$0x80]  ;;  %v789_v15 = vld [vmem:[%s7063_s4 + $0x98] sm:$0x3f] }
  0x8a   :  { %v1855_v12 = vsel %vm826_vm4, %v1685_v50, 0.0  ;;  %v1686_v57 = vrot.slane %v1495_v36, 7  ;;  %v1228_v9 = vadd.f32 %v1144_v49, %v958_v6  ;;  %v1415_v18 = vmul.f32 %v3918_v56, %v1313_v1  ;;  %v4548_v49 = vld [vmem:[#allocation2 + $0x168] sm:$0xff] }
  0x8b   :  { %v1911_v21 = vadd.f32 %v1855_v12, %v4073_v38  ;;  %v1687_v58 = vrot.slane %v1497_v63, 7  ;;  %v1229_v34 = vadd.f32 %v1145_v13, %v959_v11  ;;  %v960_v10 = vmul.f32 %v3898_v43, %v858_v22  ;;  %v1048_v22 = vld [vmem:[#allocation2 + $0x140] sm:$0x1f]  ;;  %v1318_v11 = vld [vmem:[#allocation2 + $0x170] sm:$0x1f] }
  0x8c   :  { %v1498_v35 = vadd.f32 %v1414_v3, %v1228_v9  ;;  %v962_v30 = vmul.f32 %v4397_v32, %v3898_v43  ;;  %v1146_v27 = vmul.f32 %v3904_v45, %v1044_v54  ;;  %v1148_v61 = vmul.f32 %v4449_v48, %v3904_v45  ;;  %v862_v3 = vld [vmem:[#allocation2 + $0x110] sm:$0x1f]  ;;  %v863_v13 = vld [vmem:[#allocation2 + $0x118] sm:$0x1f] }
  0x8d   :  { %1967 = vst [vmem:[%s7063_s4 + $0x80] sm:$0xff] %v1911_v21  ;;  %v1688_v38 = vsel %vm1642_vm3, %v1686_v57, %v1687_v58  ;;  %v1499_v31 = vadd.f32 %v1415_v18, %v1229_v34  ;;  %v1416_v37 = vmul.f32 %v3915_v55, %v1314_v19  ;;  %v1418_v32 = vmul.f32 %v3915_v55, %v4512_v62  ;;  %v1049_v18 = vld [vmem:[#allocation2 + $0x148] sm:$0x1f] }
  0x8e   :  { %v1856_v59 = vsel %vm826_vm4, %v1688_v38, 0.0  ;;  %v1689_v29 = vrot.slane %v1498_v35, 7  ;;  %v1230_v14 = vadd.f32 %v1146_v27, %v960_v10  ;;  %v1232_v28 = vadd.f32 %v1148_v61, %v962_v30  ;;  %v1319_v10 = vld [vmem:[#allocation2 + $0x178] sm:$0x1f]  ;;  %v239_v38 = vld [vmem:[#allocation2 + $0x1a0] sm:$0x3f] }
  0x8f   :  { %v1912_v23 = vadd.f32 %v1856_v59, %v787_v24  ;;  %v1691_v52 = vrot.slane %v1499_v31, 7  ;;  %v961_v53 = vmul.f32 %v3901_v44, %v859_v17  ;;  %v963_v16 = vmul.f32 %v4473_v4, %v3901_v44  ;;  %v82_v24 = vld [vmem:[%s7061_s0 + $0x190] sm:$0x3f]  ;;  %v83_v17 = vld [vmem:[%s7061_s0 + $0x198] sm:$0x3f] }
  0x90   :  { %v1690_v0 = vsel %vm1642_vm3, %v1684_v60, %v1689_v29  ;;  %v1500_v1 = vadd.f32 %v1416_v37, %v1230_v14  ;;  %v4545_v36 = vadd.f32 %v1418_v32, %v1232_v28  ;;  %v1147_v6 = vmul.f32 %v3907_v46, %v1045_v33  ;;  %v558_v59 = vld [vmem:[#allocation2 + $0x200] sm:$0x3f]  ;;  %v240_v29 = vld [vmem:[#allocation2 + $0x1a8] sm:$0x3f] }
  0x91   :  { %1968 = vst.msk [vmem:[%s7063_s4 + $0x88] sm:$0xff] %vm18_vm0, %v1912_v23  ;;  %v1913_v50 = vadd.f32 %v1690_v0, %v788_v51  ;;  %v1692_v63 = vsel %vm1642_vm3, %v1687_v58, %v1691_v52  ;;  %v1149_v4 = vmul.f32 %v3907_v46, %v4536_v41  ;;  %v1417_v60 = vmul.f32 %v3918_v56, %v1315_v2  ;;  %v370_v51 = vld [vmem:[#allocation2 + $0x1d0] sm:$0x3f] }
  0x92   :  { %v1914_v54 = vadd.f32 %v1692_v63, %v789_v15  ;;  %v1693_v12 = vrot.slane %v1500_v1, 7  ;;  %v1694_v57 = vrot.slane %v4545_v36, 7  ;;  %v1231_v9 = vadd.f32 %v1147_v6, %v961_v53  ;;  %v371_v15 = vld [vmem:[#allocation2 + $0x1d8] sm:$0x3f]  ;;  %v559_v1 = vld [vmem:[#allocation2 + $0x208] sm:$0x3f] }
  0x93   :  { %1969 = vst [vmem:[%s7063_s4 + $0x90] sm:$0x3f] %v1913_v50  ;;  %v1233_v19 = vadd.f32 %v1149_v4, %v963_v16  ;;  %v1419_v21 = vmul.f32 %v3918_v56, %v4548_v49  ;;  %v964_v58 = vmul.f32 %v3898_v43, %v862_v3  ;;  %v1150_v34 = vmul.f32 %v3904_v45, %v1048_v22  ;;  %v865_v36 = vld [vmem:[#allocation2 + $0x128] sm:$0x80]  ;;  %v792_v4 = vld [vmem:[%s7063_s4 + $0xb0] sm:$0x3f] }
  0x94   :  { %1970 = vst.msk [vmem:[%s7063_s4 + $0x98] sm:$0x3f] %vm148_vm2, %v1914_v54  ;;  %v1695_v35 = vsel %vm1642_vm3, %v1693_v12, %v1694_v57  ;;  %v1501_v30 = vadd.f32 %v1417_v60, %v1231_v9  ;;  %v1420_v27 = vmul.f32 %v3915_v55, %v1318_v11  ;;  %v965_v61 = vmul.f32 %v3901_v44, %v863_v13  ;;  %v791_v6 = vld [vmem:[%s7063_s4 + $0xa8] sm:$0xff]  ;;  %v1051_v54 = vld [vmem:[#allocation2 + $0x158] sm:$0x80] }
  0x95   :  { %v1859_v31 = vsel %vm826_vm4, %v1695_v35, 0.0  ;;  %v1503_v37 = vadd.f32 %v1419_v21, %v1233_v19  ;;  %v1234_v32 = vadd.f32 %v1150_v34, %v964_v58  ;;  %v1151_v33 = vmul.f32 %v3907_v46, %v1049_v18  ;;  %v1321_v21 = vld [vmem:[#allocation2 + $0x188] sm:$0x80] }
  0x96   :  { %v1915_v14 = vadd.f32 %v1859_v31, %v4114_v47  ;;  %v1696_v28 = vrot.slane %v1501_v30, 7  ;;  %v1421_v2 = vmul.f32 %v3918_v56, %v1319_v10  ;;  %v138_v23 = vmax.f32 %v82_v24, 0.0  ;;  %v793_v10 = vld [vmem:[%s7063_s4 + $0xb8] sm:$0x3f]  ;;  %v1050_v31 = vld [vmem:[#allocation2 + $0x150] sm:$0x80] }
  0x97   :  { %v1697_v52 = vrot.slane %v1503_v37, 7  ;;  %v1504_v53 = vadd.f32 %v1420_v27, %v1234_v32  ;;  %v1235_v16 = vadd.f32 %v1151_v33, %v965_v61  ;;  %v139_v0 = vmax.f32 %v83_v17, 0.0  ;;  %v4608_v30 = vld [vmem:[#allocation2 + $0x198] sm:$0xff]  ;;  %v864_v27 = vld [vmem:[#allocation2 + $0x120] sm:$0x80] }
  0x98   :  { %1971 = vst [vmem:[%s7063_s4 + $0xa0] sm:$0xff] %v1915_v14  ;;  %196 = vst [vmem:[#allocation2 + $0x290] sm:$0x3f] %v138_v23  ;;  %v314_v47 = vmul.f32 %v3889_v39, %v239_v38  ;;  %v445_v3 = vmul.f32 %v3892_v40, %v370_v51  ;;  %v633_v22 = vmul.f32 %v3895_v42, %v558_v59  ;;  %v1320_v59 = vld [vmem:[#allocation2 + $0x180] sm:$0x80] }
  0x99   :  { %v315_v50 = vmul.f32 %v3928_v5, %v240_v29  ;;  %v1698_v63 = vsel %vm1642_vm3, %v1696_v28, %v1697_v52  ;;  %v1699_v60 = vrot.slane %v1504_v53, 7  ;;  %v1505_v11 = vadd.f32 %v1421_v2, %v1235_v16  ;;  %197 = vst.msk [vmem:[#allocation2 + $0x298] sm:$0x3f] %vm148_vm2, %v139_v0  ;;  %v4621_v29 = vld [vmem:[#allocation2 + $0x190] sm:$0xff]  ;;  %v4644_v0 = vld [vmem:[#allocation2 + $0x1f8] sm:$0xff] }
  0x9a   :  { %v446_v13 = vmul.f32 %v3931_v7, %v371_v15  ;;  %v1860_v12 = vsel %vm826_vm4, %v1698_v63, 0.0  ;;  %v501_v9 = vadd.f32 %v445_v3, %v314_v47  ;;  %v634_v18 = vmul.f32 %v3934_v8, %v559_v1  ;;  %v4646_v1 = vld [vmem:[#allocation2 + $0x228] sm:$0xff] }
  0x9b   :  { %v967_v19 = vmul.f32 %v3901_v44, %v865_v36  ;;  %v1916_v58 = vadd.f32 %v1860_v12, %v791_v6  ;;  %v1700_v34 = vsel %vm1642_vm3, %v1694_v57, %v1699_v60  ;;  %v1701_v24 = vrot.slane %v1505_v11, 7  ;;  %v868_v36 = vld [vmem:[#allocation2 + $0x140] sm:$0x1f]  ;;  %v1055_v12 = vld [vmem:[#allocation2 + $0x178] sm:$0x1f] }
  0x9c   :  { %v502_v35 = vadd.f32 %v446_v13, %v315_v50  ;;  %v1917_v61 = vadd.f32 %v1700_v34, %v792_v4  ;;  %v689_v17 = vadd.f32 %v633_v22, %v501_v9  ;;  %v969_v38 = vmul.f32 %v4536_v41, %v3901_v44  ;;  %v85_v41 = vld [vmem:[%s7061_s0 + $0x1a8] sm:$0xff]  ;;  %v1054_v50 = vld [vmem:[#allocation2 + $0x170] sm:$0x1f]  ;;  %v1324_v13 = vld [vmem:[#allocation2 + $0x1a0] sm:$0x1f] }
  0x9d   :  { %v1153_v51 = vmul.f32 %v3907_v46, %v1051_v54  ;;  %1972 = vst.msk [vmem:[%s7063_s4 + $0xa8] sm:$0xff] %vm18_vm0, %v1916_v58  ;;  %v1702_v57 = vsel %vm1642_vm3, %v1697_v52, %v1701_v24  ;;  %v1155_v32 = vmul.f32 %v4548_v49, %v3907_v46  ;;  %v1423_v33 = vmul.f32 %v3918_v56, %v1321_v21  ;;  %v4655_v22 = vld [vmem:[#allocation2 + $0x1c8] sm:$0xff] }
  0x9e   :  { %v690_v37 = vadd.f32 %v634_v18, %v502_v35  ;;  %1973 = vst [vmem:[%s7063_s4 + $0xb0] sm:$0x3f] %v1917_v61  ;;  %v1918_v14 = vadd.f32 %v1702_v57, %v793_v10  ;;  %745 = vst [vmem:[%s7063_s4 + $0x110] sm:$0x3f] %v689_v17  ;;  %v1425_v2 = vmul.f32 %v3918_v56, %v4608_v30  ;;  %v141_v3 = vmax.f32 %v85_v41, 0.0  ;;  %v4682_v41 = vld [vmem:[#allocation2 + $0x1c0] sm:$0xff] }
  0x9f   :  { %v1237_v28 = vadd.f32 %v1153_v51, %v967_v19  ;;  %v966_v23 = vmul.f32 %v3898_v43, %v864_v27  ;;  %v1239_v15 = vadd.f32 %v1155_v32, %v969_v38  ;;  %v968_v52 = vmul.f32 %v4449_v48, %v3898_v43  ;;  %v869_v54 = vld [vmem:[#allocation2 + $0x148] sm:$0x1f] }
  0xa0   :  { %746 = vst.msk [vmem:[%s7063_s4 + $0x118] sm:$0x3f] %vm148_vm2, %v690_v37  ;;  %v1152_v53 = vmul.f32 %v3904_v45, %v1050_v31  ;;  %v1154_v16 = vmul.f32 %v4512_v62, %v3904_v45  ;;  %1974 = vst.msk [vmem:[%s7063_s4 + $0xb8] sm:$0x3f] %vm148_vm2, %v1918_v14  ;;  %v1422_v47 = vmul.f32 %v3915_v55, %v1320_v59  ;;  %v1325_v35 = vld [vmem:[#allocation2 + $0x1a8] sm:$0x1f] }
  0xa1   :  { %v1507_v6 = vadd.f32 %v1423_v33, %v1237_v28  ;;  %v1424_v48 = vmul.f32 %v3915_v55, %v4621_v29  ;;  %v4657_v63 = vadd.f32 %v1425_v2, %v1239_v15  ;;  %v317_v11 = vmul.f32 %v3928_v5, %v4655_v22  ;;  %199 = vst.msk [vmem:[#allocation2 + $0x2b8] sm:$0xff] %vm18_vm0, %v141_v3  ;;  %v795_v27 = vld [vmem:[%s7063_s4 + $0xc8] sm:$0xff]  ;;  %v84_v31 = vld [vmem:[%s7061_s0 + $0x1a0] sm:$0xff]  ;;  %v4699_v3 = vld [vmem:[#allocation2 + $0x1f0] sm:$0xff] }
  0xa2   :  { %v1236_v4 = vadd.f32 %v1152_v53, %v966_v23  ;;  %v1238_v60 = vadd.f32 %v1154_v16, %v968_v52  ;;  %v448_v18 = vmul.f32 %v3931_v7, %v4644_v0  ;;  %v636_v19 = vmul.f32 %v3934_v8, %v4646_v1  ;;  %v794_v37 = vld [vmem:[%s7063_s4 + $0xc0] sm:$0xff]  ;;  %v86_v52 = vld [vmem:[%s7061_s0 + $0x1b0] sm:$0x3f]  ;;  %v87_v53 = vld [vmem:[%s7061_s0 + $0x1b8] sm:$0x3f] }
  0xa3   :  { %v1706_v9 = vrot.slane %v1507_v6, 7  ;;  %v970_v21 = vmul.f32 %v3898_v43, %v868_v36  ;;  %v1707_v58 = vrot.slane %v4657_v63, 7  ;;  %v1156_v24 = vmul.f32 %v3904_v45, %v1054_v50  ;;  %v4687_v15 = vld [vmem:[#allocation2 + $0x220] sm:$0xff]  ;;  %v796_v6 = vld [vmem:[%s7063_s4 + $0xd0] sm:$0x3f] }
  0xa4   :  { %v1506_v34 = vadd.f32 %v1422_v47, %v1236_v4  ;;  %v1508_v10 = vadd.f32 %v1424_v48, %v1238_v60  ;;  %v504_v61 = vadd.f32 %v448_v18, %v317_v11  ;;  %v1426_v17 = vmul.f32 %v3915_v55, %v1324_v13  ;;  %v243_v50 = vld [vmem:[#allocation2 + $0x1d0] sm:$0x3f]  ;;  %v374_v63 = vld [vmem:[#allocation2 + $0x200] sm:$0x3f]  ;;  %v387_v25 = vld [vmem:[#allocation2 + $0x298] sm:$0x3f] }
  0xa5   :  { %v971_v38 = vmul.f32 %v3901_v44, %v869_v54  ;;  %v1157_v51 = vmul.f32 %v3907_v46, %v1055_v12  ;;  %v1708_v57 = vsel %vm1642_vm3, %v1706_v9, %v1707_v58  ;;  %v1240_v59 = vadd.f32 %v1156_v24, %v970_v21  ;;  %v562_v54 = vld [vmem:[#allocation2 + $0x230] sm:$0x3f]  ;;  %v244_v12 = vld [vmem:[#allocation2 + $0x1d8] sm:$0x3f] }
  0xa6   :  { %v1703_v32 = vrot.slane %v1506_v34, 7  ;;  %v1704_v33 = vrot.slane %v1508_v10, 7  ;;  %v1864_v14 = vsel %vm826_vm4, %v1708_v57, 0.0  ;;  %v692_v28 = vadd.f32 %v636_v19, %v504_v61  ;;  %v797_v19 = vld [vmem:[%s7063_s4 + $0xd8] sm:$0x3f] }
  0xa7   :  { %v1241_v2 = vadd.f32 %v1157_v51, %v971_v38  ;;  %v1427_v23 = vmul.f32 %v3918_v56, %v1325_v35  ;;  %v1920_v16 = vadd.f32 %v1864_v14, %v795_v27  ;;  %v1510_v47 = vadd.f32 %v1426_v17, %v1240_v59  ;;  %v375_v10 = vld [vmem:[#allocation2 + $0x208] sm:$0x3f]  ;;  %v563_v17 = vld [vmem:[#allocation2 + $0x238] sm:$0x3f]  ;;  %v871_v38 = vld [vmem:[#allocation2 + $0x158] sm:$0x80] }
  0xa8   :  { %v1705_v36 = vsel %vm1642_vm3, %v1703_v32, %v1704_v33  ;;  %v140_v48 = vmax.f32 %v84_v31, 0.0  ;;  %748 = vst.msk [vmem:[%s7063_s4 + $0x128] sm:$0xff] %vm18_vm0, %v692_v28  ;;  %v316_v11 = vmul.f32 %v3889_v39, %v4682_v41  ;;  %v447_v13 = vmul.f32 %v3892_v40, %v4699_v3  ;;  %v1057_v32 = vld [vmem:[#allocation2 + $0x188] sm:$0x80] }
  0xa9   :  { %v1863_v4 = vsel %vm826_vm4, %v1705_v36, 0.0  ;;  %v1511_v60 = vadd.f32 %v1427_v23, %v1241_v2  ;;  %1976 = vst.msk [vmem:[%s7063_s4 + $0xc8] sm:$0xff] %vm18_vm0, %v1920_v16  ;;  %v1709_v18 = vrot.slane %v1510_v47, 7  ;;  %v635_v21 = vmul.f32 %v3895_v42, %v4687_v15  ;;  %v1327_v23 = vld [vmem:[#allocation2 + $0x1b8] sm:$0x80] }
  0xaa   :  { %v1919_v9 = vadd.f32 %v1863_v4, %v794_v37  ;;  %198 = vst [vmem:[#allocation2 + $0x2b0] sm:$0xff] %v140_v48  ;;  %v142_v34 = vmax.f32 %v86_v52, 0.0  ;;  %v503_v35 = vadd.f32 %v447_v13, %v316_v11  ;;  %v143_v27 = vmax.f32 %v87_v53, 0.0  ;;  %v870_v52 = vld [vmem:[#allocation2 + $0x150] sm:$0x80] }
  0xab   :  { %v1711_v24 = vrot.slane %v1511_v60, 7  ;;  %v318_v61 = vmul.f32 %v3889_v39, %v243_v50  ;;  %v1710_v51 = vsel %vm1642_vm3, %v1704_v33, %v1709_v18  ;;  %v449_v31 = vmul.f32 %v3892_v40, %v374_v63  ;;  %v1056_v50 = vld [vmem:[#allocation2 + $0x180] sm:$0x80]  ;;  %v1326_v63 = vld [vmem:[#allocation2 + $0x1b0] sm:$0x80]  ;;  %v4754_v18 = vld [vmem:[#allocation2 + $0x258] sm:$0xff] }
  0xac   :  { %1975 = vst [vmem:[%s7063_s4 + $0xc0] sm:$0xff] %v1919_v9  ;;  %200 = vst [vmem:[#allocation2 + $0x2c0] sm:$0x3f] %v142_v34  ;;  %v637_v57 = vmul.f32 %v3895_v42, %v562_v54  ;;  %v319_v37 = vmul.f32 %v3928_v5, %v244_v12  ;;  %v1921_v59 = vadd.f32 %v1710_v51, %v796_v6  ;;  %v875_v51 = vld [vmem:[#allocation2 + $0x178] sm:$0x1f] }
  0xad   :  { %v1712_v14 = vsel %vm1642_vm3, %v1707_v58, %v1711_v24  ;;  %v691_v28 = vadd.f32 %v635_v21, %v503_v35  ;;  %201 = vst.msk [vmem:[#allocation2 + $0x2c8] sm:$0x3f] %vm148_vm2, %v143_v27  ;;  %v450_v2 = vmul.f32 %v3931_v7, %v375_v10  ;;  %v505_v33 = vadd.f32 %v449_v31, %v318_v61  ;;  %v1060_v35 = vld [vmem:[#allocation2 + $0x1a0] sm:$0x1f] }
  0xae   :  { %v1922_v53 = vadd.f32 %v1712_v14, %v797_v19  ;;  %v638_v16 = vmul.f32 %v3934_v8, %v563_v17  ;;  %v973_v36 = vmul.f32 %v3901_v44, %v871_v38  ;;  %1977 = vst [vmem:[%s7063_s4 + $0xd0] sm:$0x3f] %v1921_v59  ;;  %v975_v6 = vmul.f32 %v4548_v49, %v3901_v44  ;;  %v874_v19 = vld [vmem:[#allocation2 + $0x170] sm:$0x1f]  ;;  %v1061_v59 = vld [vmem:[#allocation2 + $0x1a8] sm:$0x1f] }
  0xaf   :  { %747 = vst [vmem:[%s7063_s4 + $0x120] sm:$0xff] %v691_v28  ;;  %v506_v58 = vadd.f32 %v450_v2, %v319_v37  ;;  %v1159_v47 = vmul.f32 %v3907_v46, %v1057_v32  ;;  %v1161_v48 = vmul.f32 %v4608_v30, %v3907_v46  ;;  %v693_v4 = vadd.f32 %v637_v57, %v505_v33  ;;  %v1330_v38 = vld [vmem:[#allocation2 + $0x1d0] sm:$0x1f] }
  0xb0   :  { %1978 = vst.msk [vmem:[%s7063_s4 + $0xd8] sm:$0x3f] %vm148_vm2, %v1922_v53  ;;  %v1429_v60 = vmul.f32 %v3918_v56, %v1327_v23  ;;  %v1431_v11 = vmul.f32 %v3918_v56, %v4655_v22  ;;  %v972_v49 = vmul.f32 %v3898_v43, %v870_v52  ;;  %v974_v9 = vmul.f32 %v4512_v62, %v3898_v43  ;;  %v1331_v52 = vld [vmem:[#allocation2 + $0x1d8] sm:$0x1f] }
  0xb1   :  { %v694_v13 = vadd.f32 %v638_v16, %v506_v58  ;;  %v1243_v54 = vadd.f32 %v1159_v47, %v973_v36  ;;  %v1245_v12 = vadd.f32 %v1161_v48, %v975_v6  ;;  %749 = vst [vmem:[%s7063_s4 + $0x130] sm:$0x3f] %v693_v4  ;;  %v1158_v21 = vmul.f32 %v3904_v45, %v1056_v50  ;;  %v564_v50 = vld [vmem:[#allocation2 + $0x250] sm:$0xff] }
  0xb2   :  { %v1160_v34 = vmul.f32 %v4621_v29, %v3904_v45  ;;  %v1428_v10 = vmul.f32 %v3915_v55, %v1326_v63  ;;  %v1430_v24 = vmul.f32 %v3915_v55, %v4682_v41  ;;  %v321_v61 = vmul.f32 %v4644_v0, %v3928_v5  ;;  %v247_v63 = vld [vmem:[#allocation2 + $0x200] sm:$0x3f] }
  0xb3   :  { %750 = vst.msk [vmem:[%s7063_s4 + $0x138] sm:$0x3f] %vm148_vm2, %v694_v13  ;;  %v1513_v62 = vadd.f32 %v1429_v60, %v1243_v54  ;;  %v4769_v27 = vadd.f32 %v1431_v11, %v1245_v12  ;;  %v452_v17 = vmul.f32 %v4646_v1, %v3931_v7  ;;  %v1242_v31 = vadd.f32 %v1158_v21, %v972_v49  ;;  %v799_v1 = vld [vmem:[%s7063_s4 + $0xe8] sm:$0xff]  ;;  %v378_v13 = vld [vmem:[#allocation2 + $0x230] sm:$0x3f]  ;;  %v798_v12 = vld [vmem:[%s7063_s4 + $0xe0] sm:$0xff] }
  0xb4   :  { %v1244_v57 = vadd.f32 %v1160_v34, %v974_v9  ;;  %v640_v37 = vmul.f32 %v3934_v8, %v4754_v18  ;;  %v976_v32 = vmul.f32 %v3898_v43, %v874_v19  ;;  %v1162_v23 = vmul.f32 %v3904_v45, %v1060_v35  ;;  %v566_v34 = vld [vmem:[#allocation2 + $0x260] sm:$0x3f]  ;;  %v800_v35 = vld [vmem:[%s7063_s4 + $0xf0] sm:$0x3f] }
  0xb5   :  { %v1716_v14 = vrot.slane %v1513_v62, 7  ;;  %v1717_v28 = vrot.slane %v4769_v27, 7  ;;  %v508_v2 = vadd.f32 %v452_v17, %v321_v61  ;;  %v1512_v53 = vadd.f32 %v1428_v10, %v1242_v31  ;;  %v248_v10 = vld [vmem:[#allocation2 + $0x208] sm:$0x3f]  ;;  %v379_v17 = vld [vmem:[#allocation2 + $0x238] sm:$0x3f] }
  0xb6   :  { %v1514_v33 = vadd.f32 %v1430_v24, %v1244_v57  ;;  %v1432_v16 = vmul.f32 %v3915_v55, %v1330_v38  ;;  %v977_v36 = vmul.f32 %v3901_v44, %v875_v51  ;;  %v1246_v47 = vadd.f32 %v1162_v23, %v976_v32  ;;  %v877_v32 = vld [vmem:[#allocation2 + $0x188] sm:$0x80] }
  0xb7   :  { %v1718_v58 = vsel %vm1642_vm3, %v1716_v14, %v1717_v28  ;;  %v696_v6 = vadd.f32 %v640_v37, %v508_v2  ;;  %v1163_v48 = vmul.f32 %v3907_v46, %v1061_v59  ;;  %v1713_v60 = vrot.slane %v1512_v53, 7  ;;  %v567_v37 = vld [vmem:[#allocation2 + $0x268] sm:$0x3f]  ;;  %v801_v59 = vld [vmem:[%s7063_s4 + $0xf8] sm:$0x3f] }
  0xb8   :  { %v1868_v4 = vsel %vm826_vm4, %v1718_v58, 0.0  ;;  %v1714_v11 = vrot.slane %v1514_v33, 7  ;;  %v1433_v49 = vmul.f32 %v3918_v56, %v1331_v52  ;;  %v1516_v9 = vadd.f32 %v1432_v16, %v1246_v47  ;;  %v1063_v16 = vld [vmem:[#allocation2 + $0x1b8] sm:$0x80] }
  0xb9   :  { %v1924_v54 = vadd.f32 %v1868_v4, %v799_v1  ;;  %752 = vst.msk [vmem:[%s7063_s4 + $0x148] sm:$0xff] %vm18_vm0, %v696_v6  ;;  %v1247_v19 = vadd.f32 %v1163_v48, %v977_v36  ;;  %v320_v21 = vmul.f32 %v4699_v3, %v3889_v39  ;;  %v451_v62 = vmul.f32 %v4687_v15, %v3892_v40  ;;  %v1333_v36 = vld [vmem:[#allocation2 + $0x1e8] sm:$0x80] }
  0xba   :  { %v1715_v24 = vsel %vm1642_vm3, %v1713_v60, %v1714_v11  ;;  %v639_v27 = vmul.f32 %v3895_v42, %v564_v50  ;;  %v322_v61 = vmul.f32 %v3889_v39, %v247_v63  ;;  %v1719_v51 = vrot.slane %v1516_v9, 7  ;;  %v876_v50 = vld [vmem:[#allocation2 + $0x180] sm:$0x80] }
  0xbb   :  { %1980 = vst.msk [vmem:[%s7063_s4 + $0xe8] sm:$0xff] %vm18_vm0, %v1924_v54  ;;  %v1867_v38 = vsel %vm826_vm4, %v1715_v24, 0.0  ;;  %v1517_v31 = vadd.f32 %v1433_v49, %v1247_v19  ;;  %v453_v57 = vmul.f32 %v3892_v40, %v378_v13  ;;  %v507_v14 = vadd.f32 %v451_v62, %v320_v21  ;;  %v1062_v49 = vld [vmem:[#allocation2 + $0x1b0] sm:$0x80]  ;;  %v1332_v9 = vld [vmem:[#allocation2 + $0x1e0] sm:$0x80] }
  0xbc   :  { %v1923_v15 = vadd.f32 %v1867_v38, %v798_v12  ;;  %v641_v2 = vmul.f32 %v3895_v42, %v566_v34  ;;  %v323_v23 = vmul.f32 %v3928_v5, %v248_v10  ;;  %v1720_v52 = vsel %vm1642_vm3, %v1714_v11, %v1719_v51  ;;  %v2065_v51 = vld [vmem:[#allocation2 + $0x10] sm:$0xfe] }
  0xbd   :  { %v1721_v1 = vrot.slane %v1517_v31, 7  ;;  %v509_v53 = vadd.f32 %v453_v57, %v322_v61  ;;  %v454_v33 = vmul.f32 %v3931_v7, %v379_v17  ;;  %v1925_v58 = vadd.f32 %v1720_v52, %v800_v35  ;;  %v3628_v57 = vld [vmem:[%s7062_s1 + $0x8] sm:$0x77]  ;;  %v2067_v52 = vld [vmem:[#allocation2 + $0x20] sm:$0x7f] }
  0xbe   :  { %1979 = vst [vmem:[%s7063_s4 + $0xe0] sm:$0xff] %v1923_v15  ;;  %v695_v6 = vadd.f32 %v639_v27, %v507_v14  ;;  %v642_v47 = vmul.f32 %v3934_v8, %v567_v37  ;;  %v979_v48 = vmul.f32 %v3901_v44, %v877_v32  ;;  %v981_v11 = vmul.f32 %v4608_v30, %v3901_v44  ;;  %v3629_v37 = vld [vmem:[%s7062_s1 + $0x10] sm:$0x77] }
  0xbf   :  { %v1722_v63 = vsel %vm1642_vm3, %v1717_v28, %v1721_v1  ;;  %v697_v4 = vadd.f32 %v641_v2, %v509_v53  ;;  %v510_v60 = vadd.f32 %v454_v33, %v323_v23  ;;  %1981 = vst [vmem:[%s7063_s4 + $0xf0] sm:$0x3f] %v1925_v58  ;;  %v1165_v54 = vmul.f32 %v3907_v46, %v1063_v16  ;;  %v2195_v1 = vld [vmem:[#allocation2 + $0x40] sm:$0xfe]  ;;  %v803_v53 = vld [vmem:[%s7063_s4 + $0x108] sm:$0xff] }
  0xc0   :  { %v1926_v13 = vadd.f32 %v1722_v63, %v801_v59  ;;  %751 = vst [vmem:[%s7063_s4 + $0x140] sm:$0xff] %v695_v6  ;;  %v1167_v28 = vmul.f32 %v3907_v46, %v4655_v22  ;;  %v1435_v12 = vmul.f32 %v3918_v56, %v1333_v36  ;;  %v1437_v19 = vmul.f32 %v3918_v56, %v4644_v0  ;;  %v2197_v16 = vld [vmem:[#allocation2 + $0x50] sm:$0x7f] }
  0xc1   :  { %753 = vst [vmem:[%s7063_s4 + $0x150] sm:$0x3f] %v697_v4  ;;  %v698_v30 = vadd.f32 %v642_v47, %v510_v60  ;;  %v978_v21 = vmul.f32 %v3898_v43, %v876_v50  ;;  %v980_v34 = vmul.f32 %v4621_v29, %v3898_v43  ;;  %v1249_v22 = vadd.f32 %v1165_v54, %v979_v48  ;;  %v2381_v58 = vld [vmem:[#allocation2 + $0x70] sm:$0xfe]  ;;  %v2383_v4 = vld [vmem:[#allocation2 + $0x80] sm:$0x7f] }
  0xc2   :  { %1982 = vst.msk [vmem:[%s7063_s4 + $0xf8] sm:$0x3f] %vm148_vm2, %v1926_v13  ;;  %v1251_v10 = vadd.f32 %v1167_v28, %v981_v11  ;;  %v1164_v24 = vmul.f32 %v3904_v45, %v1062_v49  ;;  %v1166_v35 = vmul.f32 %v3904_v45, %v4682_v41  ;;  %v1434_v0 = vmul.f32 %v3915_v55, %v1332_v9  ;;  %v3627_v41 = vld [vmem:[%s7062_s1] sm:$0x77] }
  0xc3   :  { %754 = vst.msk [vmem:[%s7063_s4 + $0x158] sm:$0x3f] %vm148_vm2, %v698_v30  ;;  %v1436_v29 = vmul.f32 %v3915_v55, %v4699_v3  ;;  %v4862_v62 = vsub.s32 2, %v3858_v20  ;;  %v1519_v27 = vadd.f32 %v1435_v12, %v1249_v22  ;;  %v2127_v15 = vsub.s32 6, %v3858_v20  ;;  %v802_v49 = vld [vmem:[%s7063_s4 + $0x100] sm:$0xff] }
  0xc4   :  { %v4864_v61 = vadd.f32 %v1437_v19, %v1251_v10  ;;  %v1248_v17 = vadd.f32 %v1164_v24, %v978_v21  ;;  %v1250_v38 = vadd.f32 %v1166_v35, %v980_v34  ;;  %v2066_v21 = vld [vmem:[#allocation2 + $0x18] sm:$0xfe]  ;;  %v2068_v34 = vld [vmem:[#allocation2 + $0x28] sm:$0x7f] }
  0xc5   :  { %v2124_v31 = vrot.slane %v3627_v41, %v4862_v62  ;;  %v2254_v3 = vrot.slane %v3628_v57, %v4862_v62  ;;  %v2440_v32 = vrot.slane %v3629_v37, %v4862_v62  ;;  %v1726_v59 = vrot.slane %v1519_v27, 7 }
  0xc6   :  { %v1727_v14 = vrot.slane %v4864_v61, 7  ;;  %v1518_v2 = vadd.f32 %v1434_v0, %v1248_v17  ;;  %v4880_v23 = vadd.f32 %v1436_v29, %v1250_v38  ;;  %v2128_v47 = vrot.slane %v3627_v41, %v2127_v15  ;;  %v2196_v0 = vld [vmem:[#allocation2 + $0x48] sm:$0xfe]  ;;  %v2198_v29 = vld [vmem:[#allocation2 + $0x58] sm:$0x7f] }
  0xc7   :  { %v4886_v33 = vrot.slane %v2124_v31, %v4862_v62  ;;  %v4889_v36 = vrot.slane %v2254_v3, %v4862_v62  ;;  %v4892_v6 = vrot.slane %v2440_v32, %v4862_v62  ;;  %v2258_v60 = vrot.slane %v3628_v57, %v2127_v15  ;;  %v2069_v41 = vld [vmem:[#allocation2 + $0x40] sm:$0xfe]  ;;  %v2071_v31 = vld [vmem:[#allocation2 + $0x50] sm:$0x7f] }
  0xc8   :  { %v1728_v48 = vsel %vm1642_vm3, %v1726_v59, %v1727_v14  ;;  %v1723_v50 = vrot.slane %v1518_v2, 7  ;;  %v1724_v63 = vrot.slane %v4880_v23, 7  ;;  %v4915_v35 = vrot.slane %v2128_v47, %v4862_v62  ;;  %v2382_v59 = vld [vmem:[#allocation2 + $0x78] sm:$0xfe]  ;;  %v2384_v2 = vld [vmem:[#allocation2 + $0x88] sm:$0x7f] }
  0xc9   :  { %v1872_v11 = vsel %vm826_vm4, %v1728_v48, 0.0  ;;  %v2139_v13 = vmul.f32 %v4886_v33, %v2065_v51  ;;  %v2141_v54 = vmul.f32 %v4886_v33, %v2067_v52  ;;  %v2269_v28 = vmul.f32 %v4889_v36, %v2195_v1  ;;  %v2385_v47 = vld [vmem:[#allocation2 + $0xa0] sm:$0xfe] }
  0xca   :  { %v1928_v12 = vadd.f32 %v1872_v11, %v803_v53  ;;  %v1725_v9 = vsel %vm1642_vm3, %v1723_v50, %v1724_v63  ;;  %v2271_v30 = vmul.f32 %v4889_v36, %v2197_v16  ;;  %v2455_v19 = vmul.f32 %v4892_v6, %v2381_v58  ;;  %v2199_v16 = vld [vmem:[#allocation2 + $0x70] sm:$0xfe]  ;;  %v2201_v58 = vld [vmem:[#allocation2 + $0x80] sm:$0x7f] }
  0xcb   :  { %v1871_v22 = vsel %vm826_vm4, %v1725_v9, 0.0  ;;  %v2325_v10 = vadd.f32 %v2269_v28, %v2139_v13  ;;  %v2457_v24 = vmul.f32 %v4892_v6, %v2383_v4  ;;  %v4922_v38 = vrot.slane %v2258_v60, %v4862_v62  ;;  %v2387_v60 = vld [vmem:[#allocation2 + $0xb0] sm:$0x7f]  ;;  %v2007_v11 = vld [vmem:[%s7063_s4] sm:$0xff] }
  0xcc   :  { %1984 = vst.msk [vmem:[%s7063_s4 + $0x108] sm:$0xff] %vm18_vm0, %v1928_v12  ;;  %v1927_v27 = vadd.f32 %v1871_v22, %v802_v49  ;;  %v2327_v17 = vadd.f32 %v2271_v30, %v2141_v54  ;;  %v2444_v51 = vrot.slane %v3629_v37, %v2127_v15  ;;  %v2140_v3 = vmul.f32 %v4915_v35, %v2066_v21  ;;  %v2009_v28 = vld [vmem:[%s7063_s4 + $0x10] sm:$0x3f]  ;;  %v2070_v21 = vld [vmem:[#allocation2 + $0x48] sm:$0xfe] }
  0xcd   :  { %v2511_v57 = vadd.f32 %v2455_v19, %v2325_v10  ;;  %v2142_v32 = vmul.f32 %v4915_v35, %v2068_v34  ;;  %v4927_v52 = vadd.s32 8, %v3858_v20  ;;  %v2270_v53 = vmul.f32 %v4922_v38, %v2196_v0  ;;  %v2072_v34 = vld [vmem:[#allocation2 + $0x58] sm:$0x7f] }
  0xce   :  { %1983 = vst [vmem:[%s7063_s4 + $0x100] sm:$0xff] %v1927_v27  ;;  %v2513_v1 = vadd.f32 %v2457_v24, %v2327_v17  ;;  %v2272_v37 = vmul.f32 %v4922_v38, %v2198_v29  ;;  %v4935_v15 = vrot.slane %v2444_v51, %v4862_v62  ;;  %v2143_v50 = vmul.f32 %v4886_v33, %v2069_v41  ;;  %v2200_v29 = vld [vmem:[#allocation2 + $0x78] sm:$0xfe]  ;;  %v2202_v27 = vld [vmem:[#allocation2 + $0x88] sm:$0x7f] }
  0xcf   :  { %v2628_v48 = vrot.slane %v2511_v57, 1  ;;  %vm2064_vm6 = vcmp.le.s32.totalorder %v4927_v52, 12  ;;  %v2145_v4 = vmul.f32 %v4886_v33, %v2071_v31  ;;  %v2326_v13 = vadd.f32 %v2270_v53, %v2140_v3  ;;  %v2386_v57 = vld [vmem:[#allocation2 + $0xa8] sm:$0xfe]  ;;  %v2388_v3 = vld [vmem:[#allocation2 + $0xb8] sm:$0x7f] }
  0xd0   :  { %v2629_v49 = vrot.slane %v2513_v1, 1  ;;  %v2328_v54 = vadd.f32 %v2272_v37, %v2142_v32  ;;  %v2456_v62 = vmul.f32 %v4935_v15, %v2382_v59  ;;  %v2458_v12 = vmul.f32 %v4935_v15, %v2384_v2  ;;  %v2073_v32 = vld [vmem:[#allocation2 + $0x70] sm:$0xfe]  ;;  %v2008_v37 = vld [vmem:[%s7063_s4 + $0x8] sm:$0xff] }
  0xd1   :  { %v2273_v9 = vmul.f32 %v4889_v36, %v2199_v16  ;;  %v2275_v30 = vmul.f32 %v4889_v36, %v2201_v58  ;;  %v2459_v19 = vmul.f32 %v4892_v6, %v2385_v47  ;;  %v2461_v0 = vmul.f32 %v4892_v6, %v2387_v60  ;;  %v2010_v58 = vld [vmem:[%s7063_s4 + $0x18] sm:$0x3f] }
  0xd2   :  { %v2630_v22 = vsel %vm2627_vm5, %v2628_v48, %v2629_v49  ;;  %v2512_v10 = vadd.f32 %v2456_v62, %v2326_v13  ;;  %v2770_v24 = vsel %vm2064_vm6, %v2629_v49, 0.0  ;;  %v2514_v51 = vadd.f32 %v2458_v12, %v2328_v54  ;;  %v2075_v49 = vld [vmem:[#allocation2 + $0x80] sm:$0x7f]  ;;  %v2205_v62 = vld [vmem:[#allocation2 + $0xb0] sm:$0x7f] }
  0xd3   :  { %v2824_v17 = vadd.f32 %v2630_v22, %v2007_v11  ;;  %v2826_v41 = vadd.f32 %v2770_v24, %v2009_v28  ;;  %v2329_v31 = vadd.f32 %v2273_v9, %v2143_v50  ;;  %v2331_v2 = vadd.f32 %v2275_v30, %v2145_v4  ;;  %v2203_v54 = vld [vmem:[#allocation2 + $0xa0] sm:$0xfe] }
  0xd4   :  { %v2631_v59 = vrot.slane %v2512_v10, 1  ;;  %v2144_v1 = vmul.f32 %v4915_v35, %v2070_v21  ;;  %v2146_v53 = vmul.f32 %v4915_v35, %v2072_v34  ;;  %v2632_v16 = vrot.slane %v2514_v51, 1  ;;  %v2011_v22 = vld [vmem:[%s7063_s4 + $0x20] sm:$0xff] }
  0xd5   :  { %2880 = vst [vmem:[%s7063_s4] sm:$0xff] %v2824_v17  ;;  %2882 = vst [vmem:[%s7063_s4 + $0x10] sm:$0x3f] %v2826_v41  ;;  %v2515_v47 = vadd.f32 %v2459_v19, %v2329_v31  ;;  %v2274_v48 = vmul.f32 %v4922_v38, %v2200_v29  ;;  %v2276_v50 = vmul.f32 %v4922_v38, %v2202_v27  ;;  %v2389_v19 = vld [vmem:[#allocation2 + $0xd0] sm:$0xfe]  ;;  %v2391_v41 = vld [vmem:[#allocation2 + $0xe0] sm:$0x7f] }
  0xd6   :  { %v2517_v4 = vadd.f32 %v2461_v0, %v2331_v2  ;;  %v2460_v60 = vmul.f32 %v4935_v15, %v2386_v57  ;;  %v2462_v11 = vmul.f32 %v4935_v15, %v2388_v3  ;;  %v2147_v13 = vmul.f32 %v4886_v33, %v2073_v32  ;;  %v2013_v0 = vld [vmem:[%s7063_s4 + $0x30] sm:$0x3f]  ;;  %v2074_v31 = vld [vmem:[#allocation2 + $0x78] sm:$0xfe]  ;;  %v2076_v57 = vld [vmem:[#allocation2 + $0x88] sm:$0x7f] }
  0xd7   :  { %v2633_v28 = vsel %vm2627_vm5, %v2631_v59, %v2632_v16  ;;  %v2771_v12 = vsel %vm2064_vm6, %v2632_v16, 0.0  ;;  %v2634_v9 = vrot.slane %v2515_v47, 1  ;;  %v2330_v30 = vadd.f32 %v2274_v48, %v2144_v1  ;;  %v2204_v1 = vld [vmem:[#allocation2 + $0xa8] sm:$0xfe]  ;;  %v2390_v48 = vld [vmem:[#allocation2 + $0xd8] sm:$0xfe] }
  0xd8   :  { %v2825_v21 = vadd.f32 %v2633_v28, %v2008_v37  ;;  %v2827_v34 = vadd.f32 %v2771_v12, %v2010_v58  ;;  %v2635_v10 = vrot.slane %v2517_v4, 1  ;;  %v2332_v24 = vadd.f32 %v2276_v50, %v2146_v53  ;;  %v2206_v53 = vld [vmem:[#allocation2 + $0xb8] sm:$0x7f]  ;;  %v2012_v50 = vld [vmem:[%s7063_s4 + $0x28] sm:$0xff] }
  0xd9   :  { %v2516_v29 = vadd.f32 %v2460_v60, %v2330_v30  ;;  %v2149_v27 = vmul.f32 %v4886_v33, %v2075_v49  ;;  %v2277_v17 = vmul.f32 %v4889_v36, %v2203_v54  ;;  %v2279_v51 = vmul.f32 %v4889_v36, %v2205_v62  ;;  %v2014_v60 = vld [vmem:[%s7063_s4 + $0x38] sm:$0x3f]  ;;  %v2077_v30 = vld [vmem:[#allocation2 + $0xa0] sm:$0xfe] }
  0xda   :  { %2881 = vst.msk [vmem:[%s7063_s4 + $0x8] sm:$0xff] %vm18_vm0, %v2825_v21  ;;  %v2636_v3 = vsel %vm2627_vm5, %v2634_v9, %v2635_v10  ;;  %v2518_v32 = vadd.f32 %v2462_v11, %v2332_v24  ;;  %v2774_v59 = vsel %vm2064_vm6, %v2635_v10, 0.0  ;;  %v2463_v2 = vmul.f32 %v4892_v6, %v2389_v19  ;;  %v2392_v9 = vld [vmem:[#allocation2 + $0xe8] sm:$0x7f]  ;;  %v2079_v19 = vld [vmem:[#allocation2 + $0xb0] sm:$0x7f] }
  0xdb   :  { %2883 = vst.msk [vmem:[%s7063_s4 + $0x18] sm:$0x3f] %vm148_vm2, %v2827_v34  ;;  %v2828_v37 = vadd.f32 %v2636_v3, %v2011_v22  ;;  %v2637_v16 = vrot.slane %v2516_v29, 1  ;;  %v2830_v58 = vadd.f32 %v2774_v59, %v2013_v0  ;;  %v2333_v47 = vadd.f32 %v2277_v17, %v2147_v13  ;;  %v2207_v24 = vld [vmem:[#allocation2 + $0xd0] sm:$0xfe] }
  0xdc   :  { %v2638_v4 = vrot.slane %v2518_v32, 1  ;;  %v2335_v11 = vadd.f32 %v2279_v51, %v2149_v27  ;;  %v2465_v49 = vmul.f32 %v4892_v6, %v2391_v41  ;;  %v2148_v54 = vmul.f32 %v4915_v35, %v2074_v31  ;;  %v2209_v0 = vld [vmem:[#allocation2 + $0xe0] sm:$0x7f] }
  0xdd   :  { %2884 = vst [vmem:[%s7063_s4 + $0x20] sm:$0xff] %v2828_v37  ;;  %2886 = vst [vmem:[%s7063_s4 + $0x30] sm:$0x3f] %v2830_v58  ;;  %v2519_v13 = vadd.f32 %v2463_v2, %v2333_v47  ;;  %v2150_v62 = vmul.f32 %v4915_v35, %v2076_v57  ;;  %v2278_v28 = vmul.f32 %v4922_v38, %v2204_v1  ;;  %v2015_v41 = vld [vmem:[%s7063_s4 + $0x40] sm:$0xff]  ;;  %v2017_v2 = vld [vmem:[%s7063_s4 + $0x50] sm:$0x3f] }
  0xde   :  { %v2280_v12 = vmul.f32 %v4922_v38, %v2206_v53  ;;  %v2639_v21 = vsel %vm2627_vm5, %v2637_v16, %v2638_v4  ;;  %v2775_v34 = vsel %vm2064_vm6, %v2638_v4, 0.0  ;;  %v2521_v22 = vadd.f32 %v2465_v49, %v2335_v11  ;;  %v2393_v16 = vld [vmem:[#allocation2 + $0x100] sm:$0xfe]  ;;  %v2080_v4 = vld [vmem:[#allocation2 + $0xb8] sm:$0x7f] }
  0xdf   :  { %v2464_v10 = vmul.f32 %v4935_v15, %v2390_v48  ;;  %v2829_v29 = vadd.f32 %v2639_v21, %v2012_v50  ;;  %v2831_v27 = vadd.f32 %v2775_v34, %v2014_v60  ;;  %v2640_v17 = vrot.slane %v2519_v13, 1  ;;  %v2395_v48 = vld [vmem:[#allocation2 + $0x110] sm:$0x7f]  ;;  %v2078_v50 = vld [vmem:[#allocation2 + $0xa8] sm:$0xfe] }
  0xe0   :  { %v2334_v51 = vadd.f32 %v2278_v28, %v2148_v54  ;;  %v2641_v31 = vrot.slane %v2521_v22, 1  ;;  %v2336_v57 = vadd.f32 %v2280_v12, %v2150_v62  ;;  %v2466_v3 = vmul.f32 %v4935_v15, %v2392_v9  ;;  %v2208_v54 = vld [vmem:[#allocation2 + $0xd8] sm:$0xfe]  ;;  %v2210_v13 = vld [vmem:[#allocation2 + $0xe8] sm:$0x7f] }
  0xe1   :  { %v2151_v32 = vmul.f32 %v4886_v33, %v2077_v30  ;;  %2885 = vst.msk [vmem:[%s7063_s4 + $0x28] sm:$0xff] %vm18_vm0, %v2829_v29  ;;  %v2153_v1 = vmul.f32 %v4886_v33, %v2079_v19  ;;  %v2281_v53 = vmul.f32 %v4889_v36, %v2207_v24  ;;  %v2283_v37 = vmul.f32 %v4889_v36, %v2209_v0  ;;  %v2016_v62 = vld [vmem:[%s7063_s4 + $0x48] sm:$0xff]  ;;  %v2018_v9 = vld [vmem:[%s7063_s4 + $0x58] sm:$0x3f] }
  0xe2   :  { %2887 = vst.msk [vmem:[%s7063_s4 + $0x38] sm:$0x3f] %vm148_vm2, %v2831_v27  ;;  %v2520_v59 = vadd.f32 %v2464_v10, %v2334_v51  ;;  %v2642_v58 = vsel %vm2627_vm5, %v2640_v17, %v2641_v31  ;;  %v2522_v47 = vadd.f32 %v2466_v3, %v2336_v57  ;;  %v2778_v49 = vsel %vm2064_vm6, %v2641_v31, 0.0  ;;  %v2394_v24 = vld [vmem:[#allocation2 + $0x108] sm:$0xfe] }
  0xe3   :  { %v2832_v60 = vadd.f32 %v2642_v58, %v2015_v41  ;;  %v2834_v12 = vadd.f32 %v2778_v49, %v2017_v2  ;;  %v2337_v30 = vadd.f32 %v2281_v53, %v2151_v32  ;;  %v2339_v19 = vadd.f32 %v2283_v37, %v2153_v1  ;;  %v2396_v0 = vld [vmem:[#allocation2 + $0x118] sm:$0x7f]  ;;  %v2081_v32 = vld [vmem:[#allocation2 + $0xd0] sm:$0xfe]  ;;  %v2083_v37 = vld [vmem:[#allocation2 + $0xe0] sm:$0x7f] }
  0xe4   :  { %v2643_v11 = vrot.slane %v2520_v59, 1  ;;  %v2644_v28 = vrot.slane %v2522_v47, 1  ;;  %v2467_v21 = vmul.f32 %v4892_v6, %v2393_v16  ;;  %v2469_v34 = vmul.f32 %v4892_v6, %v2395_v48  ;;  %v2211_v16 = vld [vmem:[#allocation2 + $0x100] sm:$0xfe]  ;;  %v2213_v49 = vld [vmem:[#allocation2 + $0x110] sm:$0x7f] }
  0xe5   :  { %2888 = vst [vmem:[%s7063_s4 + $0x40] sm:$0xff] %v2832_v60  ;;  %v2152_v22 = vmul.f32 %v4915_v35, %v2078_v50  ;;  %v2154_v10 = vmul.f32 %v4915_v35, %v2080_v4  ;;  %2890 = vst [vmem:[%s7063_s4 + $0x50] sm:$0x3f] %v2834_v12  ;;  %v2282_v17 = vmul.f32 %v4922_v38, %v2208_v54  ;;  %v2019_v58 = vld [vmem:[%s7063_s4 + $0x60] sm:$0xff]  ;;  %v2021_v60 = vld [vmem:[%s7063_s4 + $0x70] sm:$0x3f] }
  0xe6   :  { %v2645_v29 = vsel %vm2627_vm5, %v2643_v11, %v2644_v28  ;;  %v2779_v27 = vsel %vm2064_vm6, %v2644_v28, 0.0  ;;  %v2284_v51 = vmul.f32 %v4922_v38, %v2210_v13  ;;  %v2523_v57 = vadd.f32 %v2467_v21, %v2337_v30  ;;  %v2397_v54 = vld [vmem:[#allocation2 + $0x130] sm:$0xfe]  ;;  %v2399_v12 = vld [vmem:[#allocation2 + $0x140] sm:$0x7f]  ;;  %v2020_v21 = vld [vmem:[%s7063_s4 + $0x68] sm:$0xff] }
  0xe7   :  { %v2833_v41 = vadd.f32 %v2645_v29, %v2016_v62  ;;  %v2835_v31 = vadd.f32 %v2779_v27, %v2018_v9  ;;  %v2525_v3 = vadd.f32 %v2469_v34, %v2339_v19  ;;  %v2338_v59 = vadd.f32 %v2282_v17, %v2152_v22  ;;  %v2082_v9 = vld [vmem:[#allocation2 + $0xd8] sm:$0xfe]  ;;  %v2084_v30 = vld [vmem:[#allocation2 + $0xe8] sm:$0x7f] }
  0xe8   :  { %v2340_v2 = vadd.f32 %v2284_v51, %v2154_v10  ;;  %v2468_v1 = vmul.f32 %v4935_v15, %v2394_v24  ;;  %v2470_v53 = vmul.f32 %v4935_v15, %v2396_v0  ;;  %v2646_v47 = vrot.slane %v2523_v57, 1  ;;  %v2022_v24 = vld [vmem:[%s7063_s4 + $0x78] sm:$0x3f]  ;;  %v2212_v51 = vld [vmem:[#allocation2 + $0x108] sm:$0xfe] }
  0xe9   :  { %2889 = vst.msk [vmem:[%s7063_s4 + $0x48] sm:$0xff] %vm18_vm0, %v2833_v41  ;;  %v2647_v48 = vrot.slane %v2525_v3, 1  ;;  %v2155_v11 = vmul.f32 %v4886_v33, %v2081_v32  ;;  %v2157_v62 = vmul.f32 %v4886_v33, %v2083_v37  ;;  %v2285_v28 = vmul.f32 %v4889_v36, %v2211_v16  ;;  %v2214_v41 = vld [vmem:[#allocation2 + $0x118] sm:$0x7f] }
  0xea   :  { %2891 = vst.msk [vmem:[%s7063_s4 + $0x58] sm:$0x3f] %vm148_vm2, %v2835_v31  ;;  %v2524_v50 = vadd.f32 %v2468_v1, %v2338_v59  ;;  %v2526_v4 = vadd.f32 %v2470_v53, %v2340_v2  ;;  %v2287_v29 = vmul.f32 %v4889_v36, %v2213_v49  ;;  %v2471_v17 = vmul.f32 %v4892_v6, %v2397_v54  ;;  %v2398_v31 = vld [vmem:[#allocation2 + $0x138] sm:$0xfe]  ;;  %v2937_v2 = vld [vmem:[%s7063_s4 + $0x8] sm:$0xff] }
  0xeb   :  { %v2648_v13 = vsel %vm2627_vm5, %v2646_v47, %v2647_v48  ;;  %v2782_v10 = vsel %vm2064_vm6, %v2647_v48, 0.0  ;;  %v2341_v27 = vadd.f32 %v2285_v28, %v2155_v11  ;;  %v2473_v32 = vmul.f32 %v4892_v6, %v2399_v12  ;;  %v2087_v11 = vld [vmem:[#allocation2 + $0x110] sm:$0x7f]  ;;  %v2939_v54 = vld [vmem:[%s7063_s4 + $0x18] sm:$0x3f] }
  0xec   :  { %v2836_v19 = vadd.f32 %v2648_v13, %v2019_v58  ;;  %v2649_v34 = vrot.slane %v2524_v50, 1  ;;  %v2650_v22 = vrot.slane %v2526_v4, 1  ;;  %v2838_v0 = vadd.f32 %v2782_v10, %v2021_v60  ;;  %v2400_v58 = vld [vmem:[#allocation2 + $0x148] sm:$0x7f]  ;;  %v2085_v60 = vld [vmem:[#allocation2 + $0x100] sm:$0xfe] }
  0xed   :  { %v2156_v59 = vmul.f32 %v4915_v35, %v2082_v9  ;;  %v2343_v37 = vadd.f32 %v2287_v29, %v2157_v62  ;;  %v2527_v16 = vadd.f32 %v2471_v17, %v2341_v27  ;;  %v2158_v47 = vmul.f32 %v4915_v35, %v2084_v30  ;;  %v2215_v49 = vld [vmem:[#allocation2 + $0x130] sm:$0xfe]  ;;  %v2217_v28 = vld [vmem:[#allocation2 + $0x140] sm:$0x7f] }
  0xee   :  { %2892 = vst [vmem:[%s7063_s4 + $0x60] sm:$0xff] %v2836_v19  ;;  %v2651_v57 = vsel %vm2627_vm5, %v2649_v34, %v2650_v22  ;;  %v2783_v3 = vsel %vm2064_vm6, %v2650_v22, 0.0  ;;  %2894 = vst [vmem:[%s7063_s4 + $0x70] sm:$0x3f] %v2838_v0  ;;  %v2286_v48 = vmul.f32 %v4922_v38, %v2212_v51  ;;  %v2288_v50 = vmul.f32 %v4922_v38, %v2214_v41  ;;  %v2023_v34 = vld [vmem:[%s7063_s4 + $0x80] sm:$0xff] }
  0xef   :  { %v2837_v1 = vadd.f32 %v2651_v57, %v2020_v21  ;;  %v2839_v53 = vadd.f32 %v2783_v3, %v2022_v24  ;;  %v2472_v4 = vmul.f32 %v4935_v15, %v2398_v31  ;;  %v2529_v13 = vadd.f32 %v2473_v32, %v2343_v37  ;;  %v2401_v21 = vld [vmem:[#allocation2 + $0x160] sm:$0xfe]  ;;  %v2025_v10 = vld [vmem:[%s7063_s4 + $0x90] sm:$0x3f]  ;;  %v2086_v57 = vld [vmem:[#allocation2 + $0x108] sm:$0xfe] }
  0xf0   :  { %v2652_v62 = vrot.slane %v2527_v16, 1  ;;  %v3040_v12 = vsel %vm18_vm0, %v2937_v2, 0.0  ;;  %v2342_v9 = vadd.f32 %v2286_v48, %v2156_v59  ;;  %v2344_v30 = vadd.f32 %v2288_v50, %v2158_v47  ;;  %v2403_v31 = vld [vmem:[#allocation2 + $0x170] sm:$0x7f]  ;;  %v2024_v16 = vld [vmem:[%s7063_s4 + $0x88] sm:$0xff] }
  0xf1   :  { %2893 = vst.msk [vmem:[%s7063_s4 + $0x68] sm:$0xff] %vm18_vm0, %v2837_v1  ;;  %v2474_v19 = vmul.f32 %v4935_v15, %v2400_v58  ;;  %v2653_v22 = vrot.slane %v2529_v13, 1  ;;  %v2159_v24 = vmul.f32 %v4886_v33, %v2085_v60  ;;  %v2161_v0 = vmul.f32 %v4886_v33, %v2087_v11  ;;  %v2088_v1 = vld [vmem:[#allocation2 + $0x118] sm:$0x7f] }
  0xf2   :  { %2895 = vst.msk [vmem:[%s7063_s4 + $0x78] sm:$0x3f] %vm148_vm2, %v2839_v53  ;;  %v2289_v29 = vmul.f32 %v4889_v36, %v2215_v49  ;;  %v3041_v27 = vsel %vm148_vm2, %v2939_v54, 0.0  ;;  %v2528_v17 = vadd.f32 %v2472_v4, %v2342_v9  ;;  %v2291_v41 = vmul.f32 %v4889_v36, %v2217_v28  ;;  %v2216_v53 = vld [vmem:[#allocation2 + $0x138] sm:$0xfe] }
  0xf3   :  { %v2530_v51 = vadd.f32 %v2474_v19, %v2344_v30  ;;  %v2654_v3 = vsel %vm2627_vm5, %v2652_v62, %v2653_v22  ;;  %v2786_v32 = vsel %vm2064_vm6, %v2653_v22, 0.0  ;;  %v2475_v2 = vmul.f32 %v4892_v6, %v2401_v21  ;;  %v2026_v50 = vld [vmem:[%s7063_s4 + $0x98] sm:$0x3f]  ;;  %v2218_v54 = vld [vmem:[#allocation2 + $0x148] sm:$0x7f] }
  0xf4   :  { %v2345_v59 = vadd.f32 %v2289_v29, %v2159_v24  ;;  %v2840_v37 = vadd.f32 %v2654_v3, %v2023_v34  ;;  %v2655_v58 = vrot.slane %v2528_v17, 1  ;;  %v2842_v48 = vadd.f32 %v2786_v32, %v2025_v10  ;;  %v2402_v30 = vld [vmem:[#allocation2 + $0x168] sm:$0xfe]  ;;  %v2404_v19 = vld [vmem:[#allocation2 + $0x178] sm:$0x7f] }
  0xf5   :  { %v2656_v47 = vrot.slane %v2530_v51, 1  ;;  %v2347_v4 = vadd.f32 %v2291_v41, %v2161_v0  ;;  %v2477_v60 = vmul.f32 %v4892_v6, %v2403_v31  ;;  %v2160_v49 = vmul.f32 %v4915_v35, %v2086_v57  ;;  %v2941_v21 = vld [vmem:[%s7063_s4 + $0x28] sm:$0xff]  ;;  %v880_v41 = vld [vmem:[#allocation2 + $0x1a0] sm:$0x1f]  ;;  %v1066_v31 = vld [vmem:[#allocation2 + $0x1d0] sm:$0x1f] }
  0xf6   :  { %v2531_v11 = vadd.f32 %v2475_v2, %v2345_v59  ;;  %2896 = vst [vmem:[%s7063_s4 + $0x80] sm:$0xff] %v2840_v37  ;;  %2898 = vst [vmem:[%s7063_s4 + $0x90] sm:$0x3f] %v2842_v48  ;;  %v2162_v28 = vmul.f32 %v4915_v35, %v2088_v1  ;;  %v2290_v9 = vmul.f32 %v4922_v38, %v2216_v53  ;;  %v5160_v10 = vld [vmem:[#allocation2 + $0x228] sm:$0xff]  ;;  %v1336_v32 = vld [vmem:[#allocation2 + $0x200] sm:$0x1f] }
  0xf7   :  { %v2657_v13 = vsel %vm2627_vm5, %v2655_v58, %v2656_v47  ;;  %v2787_v62 = vsel %vm2064_vm6, %v2656_v47, 0.0  ;;  %v3042_v24 = vadd.f32 %v3041_v27, %v3040_v12  ;;  %v2533_v0 = vadd.f32 %v2477_v60, %v2347_v4  ;;  %v5163_v51 = vld [vmem:[#allocation2 + $0x288] sm:$0xff]  ;;  %v2027_v2 = vld [vmem:[%s7063_s4 + $0xa0] sm:$0xff]  ;;  %v2029_v37 = vld [vmem:[%s7063_s4 + $0xb0] sm:$0x3f] }
  0xf8   :  { %v2841_v34 = vadd.f32 %v2657_v13, %v2024_v16  ;;  %v2843_v22 = vadd.f32 %v2787_v62, %v2026_v50  ;;  %v2658_v29 = vrot.slane %v2531_v11, 1  ;;  %v2292_v17 = vmul.f32 %v4922_v38, %v2218_v54  ;;  %v881_v4 = vld [vmem:[#allocation2 + $0x1a8] sm:$0x1f]  ;;  %v1067_v60 = vld [vmem:[#allocation2 + $0x1d8] sm:$0x1f] }
  0xf9   :  { %v2346_v57 = vadd.f32 %v2290_v9, %v2160_v49  ;;  %v2476_v12 = vmul.f32 %v4935_v15, %v2402_v30  ;;  %v2478_v27 = vmul.f32 %v4935_v15, %v2404_v19  ;;  %v325_v3 = vmul.f32 %v3928_v5, %v5160_v10  ;;  %v1337_v11 = vld [vmem:[#allocation2 + $0x208] sm:$0x1f] }
  0xfa   :  { %2897 = vst.msk [vmem:[%s7063_s4 + $0x88] sm:$0xff] %vm18_vm0, %v2841_v34  ;;  %v3043_v59 = vsel %vm18_vm0, %v2941_v21, 0.0  ;;  %v2659_v1 = vrot.slane %v2533_v0, 1  ;;  %v2348_v53 = vadd.f32 %v2292_v17, %v2162_v28  ;;  %v456_v16 = vmul.f32 %v4754_v18, %v3931_v7  ;;  %v2090_v28 = vld [vmem:[#allocation2 + $0x138] sm:$0xfe] }
  0xfb   :  { %2899 = vst.msk [vmem:[%s7063_s4 + $0x98] sm:$0x3f] %vm148_vm2, %v2843_v22  ;;  %v2532_v58 = vadd.f32 %v2476_v12, %v2346_v57  ;;  %v644_v47 = vmul.f32 %v3934_v8, %v5163_v51  ;;  %v982_v48 = vmul.f32 %v3898_v43, %v880_v41  ;;  %v1168_v50 = vmul.f32 %v3904_v45, %v1066_v31  ;;  %v2092_v18 = vld [vmem:[#allocation2 + $0x148] sm:$0x7f] }
  0xfc   :  { %v2660_v49 = vsel %vm2627_vm5, %v2658_v29, %v2659_v1  ;;  %v2534_v54 = vadd.f32 %v2478_v27, %v2348_v53  ;;  %v2790_v13 = vsel %vm2064_vm6, %v2659_v1, 0.0  ;;  %v512_v62 = vadd.f32 %v456_v16, %v325_v3  ;;  %v2220_v34 = vld [vmem:[#allocation2 + $0x168] sm:$0xfe]  ;;  %v2030_v29 = vld [vmem:[%s7063_s4 + $0xb8] sm:$0x3f] }
  0xfd   :  { %v2844_v9 = vadd.f32 %v2660_v49, %v2027_v2  ;;  %v2661_v30 = vrot.slane %v2532_v58, 1  ;;  %v2846_v19 = vadd.f32 %v2790_v13, %v2029_v37  ;;  %v1252_v21 = vadd.f32 %v1168_v50, %v982_v48  ;;  %v2028_v22 = vld [vmem:[%s7063_s4 + $0xa8] sm:$0xff]  ;;  %v2222_v2 = vld [vmem:[#allocation2 + $0x178] sm:$0x7f] }
  0xfe   :  { %v2662_v0 = vrot.slane %v2534_v54, 1  ;;  %v700_v17 = vadd.f32 %v644_v47, %v512_v62  ;;  %v1438_v41 = vmul.f32 %v3915_v55, %v1336_v32  ;;  %v983_v31 = vmul.f32 %v3901_v44, %v881_v4  ;;  %v2406_v16 = vld [vmem:[#allocation2 + $0x198] sm:$0xfe]  ;;  %v2408_v58 = vld [vmem:[#allocation2 + $0x1a8] sm:$0x7f] }
  0xff   :  { %2900 = vst [vmem:[%s7063_s4 + $0xa0] sm:$0xff] %v2844_v9  ;;  %2902 = vst [vmem:[%s7063_s4 + $0xb0] sm:$0x3f] %v2846_v19  ;;  %v1169_v57 = vmul.f32 %v3907_v46, %v1067_v60  ;;  %v1439_v12 = vmul.f32 %v3918_v56, %v1337_v11  ;;  %v2164_v27 = vmul.f32 %v4915_v35, %v2090_v28  ;;  %v2943_v48 = vld [vmem:[%s7063_s4 + $0x38] sm:$0x3f] }
 0x100   :  { %v2166_v3 = vmul.f32 %v4915_v35, %v2092_v18  ;;  %v2663_v32 = vsel %vm2627_vm5, %v2661_v30, %v2662_v0  ;;  %v2791_v1 = vsel %vm2064_vm6, %v2662_v0, 0.0  ;;  %756 = vst.msk [vmem:[%s7063_s4 + $0x168] sm:$0xff] %vm18_vm0, %v700_v17  ;;  %v1522_v53 = vadd.f32 %v1438_v41, %v1252_v21  ;;  %v804_v60 = vld [vmem:[%s7063_s4 + $0x110] sm:$0x3f]  ;;  %v2091_v62 = vld [vmem:[#allocation2 + $0x140] sm:$0x7f] }
 0x101   :  { %v2294_v37 = vmul.f32 %v4922_v38, %v2220_v34  ;;  %v3044_v47 = vadd.f32 %v3043_v59, %v3042_v24  ;;  %v2845_v50 = vadd.f32 %v2663_v32, %v2028_v22  ;;  %v2847_v4 = vadd.f32 %v2791_v1, %v2030_v29  ;;  %v2221_v19 = vld [vmem:[#allocation2 + $0x170] sm:$0x7f]  ;;  %v2945_v34 = vld [vmem:[%s7063_s4 + $0x48] sm:$0xff]  ;;  %v2407_v29 = vld [vmem:[#allocation2 + $0x1a0] sm:$0x7f] }
 0x102   :  { %v1729_v11 = vrot.slane %v1522_v53, 7  ;;  %v1253_v49 = vadd.f32 %v1169_v57, %v983_v31  ;;  %v2296_v54 = vmul.f32 %v4922_v38, %v2222_v2  ;;  %v2480_v59 = vmul.f32 %v4935_v15, %v2406_v16  ;;  %v805_v17 = vld [vmem:[%s7063_s4 + $0x118] sm:$0x3f]  ;;  %v2032_v1 = vld [vmem:[%s7063_s4 + $0xc8] sm:$0xff] }
 0x103   :  { %2901 = vst.msk [vmem:[%s7063_s4 + $0xa8] sm:$0xff] %vm18_vm0, %v2845_v50  ;;  %v2350_v24 = vadd.f32 %v2294_v37, %v2164_v27  ;;  %v2482_v13 = vmul.f32 %v4935_v15, %v2408_v58  ;;  %v3045_v28 = vsel %vm148_vm2, %v2943_v48, 0.0  ;;  %v2165_v23 = vmul.f32 %v4886_v33, %v2091_v62  ;;  %v382_v27 = vld [vmem:[#allocation2 + $0x260] sm:$0x3f]  ;;  %v2947_v58 = vld [vmem:[%s7063_s4 + $0x58] sm:$0x3f] }
 0x104   :  { %2903 = vst.msk [vmem:[%s7063_s4 + $0xb8] sm:$0x3f] %vm148_vm2, %v2847_v4  ;;  %v1730_v18 = vsel %vm1642_vm3, %v1724_v63, %v1729_v11  ;;  %v1523_v9 = vadd.f32 %v1439_v12, %v1253_v49  ;;  %v2352_v30 = vadd.f32 %v2296_v54, %v2166_v3  ;;  %v3046_v21 = vadd.f32 %v3045_v28, %v3044_v47  ;;  %v251_v63 = vld [vmem:[#allocation2 + $0x230] sm:$0x3f]  ;;  %v252_v50 = vld [vmem:[#allocation2 + $0x238] sm:$0x3f] }
 0x105   :  { %v1929_v22 = vadd.f32 %v1730_v18, %v804_v60  ;;  %v2536_v0 = vadd.f32 %v2480_v59, %v2350_v24  ;;  %v2295_v12 = vmul.f32 %v4889_v36, %v2221_v19  ;;  %v570_v3 = vld [vmem:[#allocation2 + $0x290] sm:$0x3f]  ;;  %v3047_v2 = vsel %vm18_vm0, %v2945_v34, 0.0  ;;  %v383_v11 = vld [vmem:[#allocation2 + $0x268] sm:$0x3f] }
 0x106   :  { %v1731_v41 = vrot.slane %v1523_v9, 7  ;;  %v2538_v31 = vadd.f32 %v2482_v13, %v2352_v30  ;;  %v2481_v37 = vmul.f32 %v4892_v6, %v2407_v29  ;;  %v3048_v16 = vadd.f32 %v3047_v2, %v3046_v21  ;;  %v571_v49 = vld [vmem:[#allocation2 + $0x298] sm:$0x3f]  ;;  %v883_v54 = vld [vmem:[#allocation2 + $0x1b8] sm:$0x80]  ;;  %v885_v59 = vld [vmem:[#allocation2 + $0x1c8] sm:$0xff] }
 0x107   :  { %1985 = vst [vmem:[%s7063_s4 + $0x110] sm:$0x3f] %v1929_v22  ;;  %v2667_v57 = vrot.slane %v2536_v0, 1  ;;  %v2351_v48 = vadd.f32 %v2295_v12, %v2165_v23  ;;  %v326_v61 = vmul.f32 %v3889_v39, %v251_v63  ;;  %v645_v60 = vmul.f32 %v3895_v42, %v570_v3  ;;  %v1069_v9 = vld [vmem:[#allocation2 + $0x1e8] sm:$0x80]  ;;  %v5274_v30 = vld [vmem:[#allocation2 + $0x1f8] sm:$0xff] }
 0x108   :  { %v1732_v32 = vsel %vm1642_vm3, %v1727_v14, %v1731_v41  ;;  %v2668_v53 = vrot.slane %v2538_v31, 1  ;;  %v457_v14 = vmul.f32 %v3892_v40, %v382_v27  ;;  %v3049_v13 = vsel %vm148_vm2, %v2947_v58, 0.0  ;;  %v1339_v19 = vld [vmem:[#allocation2 + $0x218] sm:$0x80]  ;;  %v2949_v34 = vld [vmem:[%s7063_s4 + $0x68] sm:$0xff]  ;;  %v884_v2 = vld [vmem:[#allocation2 + $0x1c0] sm:$0xff] }
 0x109   :  { %v1930_v47 = vadd.f32 %v1732_v32, %v805_v17  ;;  %v5271_v62 = vadd.f32 %v2481_v37, %v2351_v48  ;;  %v327_v18 = vmul.f32 %v3928_v5, %v252_v50  ;;  %v3050_v21 = vadd.f32 %v3049_v13, %v3048_v16  ;;  %v2033_v27 = vld [vmem:[%s7063_s4 + $0xd0] sm:$0x3f]  ;;  %v2034_v3 = vld [vmem:[%s7063_s4 + $0xd8] sm:$0x3f]  ;;  %v5315_v50 = vld [vmem:[#allocation2 + $0x220] sm:$0xff] }
 0x10a   :  { %v2669_v4 = vsel %vm2627_vm5, %v2667_v57, %v2668_v53  ;;  %v513_v28 = vadd.f32 %v457_v14, %v326_v61  ;;  %v458_v22 = vmul.f32 %v3931_v7, %v383_v11  ;;  %v646_v0 = vmul.f32 %v3934_v8, %v571_v49  ;;  %v5310_v58 = vld [vmem:[#allocation2 + $0x1f0] sm:$0xff]  ;;  %v2951_v48 = vld [vmem:[%s7063_s4 + $0x78] sm:$0x3f] }
 0x10b   :  { %1986 = vst.msk [vmem:[%s7063_s4 + $0x118] sm:$0x3f] %vm148_vm2, %v1930_v47  ;;  %v2849_v24 = vadd.f32 %v2669_v4, %v2032_v1  ;;  %7100 = vst [vmem:[#allocation5_spill] sm:$0xff] %v5271_v62  ;;  %v985_v29 = vmul.f32 %v3901_v44, %v883_v54  ;;  %v7067_v17 = vrot.slane %v5271_v62, 1  ;;  %v987_v31 = vmul.f32 %v3901_v44, %v885_v59  ;;  %v5326_v59 = vld [vmem:[#allocation2 + $0x258] sm:$0xff] }
 0x10c   :  { %v701_v41 = vadd.f32 %v645_v60, %v513_v28  ;;  %v514_v23 = vadd.f32 %v458_v22, %v327_v18  ;;  %v1171_v63 = vmul.f32 %v3907_v46, %v1069_v9  ;;  %v1173_v57 = vmul.f32 %v3907_v46, %v5274_v30  ;;  %v5328_v13 = vld [vmem:[#allocation2 + $0x2b8] sm:$0xff]  ;;  %v2953_v18 = vld [vmem:[%s7063_s4 + $0x88] sm:$0xff]  ;;  %v1072_v22 = vld [vmem:[#allocation2 + $0x200] sm:$0x1f] }
 0x10d   :  { %2905 = vst.msk [vmem:[%s7063_s4 + $0xc8] sm:$0xff] %vm18_vm0, %v2849_v24  ;;  %v1441_v12 = vmul.f32 %v3918_v56, %v1339_v19  ;;  %v3051_v32 = vsel %vm18_vm0, %v2949_v34, 0.0  ;;  %v1443_v1 = vmul.f32 %v3918_v56, %v5160_v10  ;;  %v2794_v37 = vsel %vm2064_vm6, %v7067_v17, 0.0  ;;  %7101 = vst [vmem:[#allocation6_spill] sm:$0xff] %v5328_v13  ;;  %v886_v34 = vld [vmem:[#allocation2 + $0x1d0] sm:$0x1f] }
 0x10e   :  { %757 = vst [vmem:[%s7063_s4 + $0x170] sm:$0x3f] %v701_v41  ;;  %v2795_v16 = vsel %vm2064_vm6, %v2668_v53, 0.0  ;;  %v3052_v47 = vadd.f32 %v3051_v32, %v3050_v21  ;;  %v702_v4 = vadd.f32 %v646_v0, %v514_v23  ;;  %v1255_v61 = vadd.f32 %v1171_v63, %v985_v29  ;;  %v887_v23 = vld [vmem:[#allocation2 + $0x1d8] sm:$0x1f]  ;;  %v807_v63 = vld [vmem:[%s7063_s4 + $0x128] sm:$0xff] }
 0x10f   :  { %v1257_v14 = vadd.f32 %v1173_v57, %v987_v31  ;;  %v2850_v60 = vadd.f32 %v2794_v37, %v2033_v27  ;;  %v2851_v11 = vadd.f32 %v2795_v16, %v2034_v3  ;;  %v986_v49 = vmul.f32 %v3898_v43, %v884_v2  ;;  %v1342_v31 = vld [vmem:[#allocation2 + $0x230] sm:$0x1f]  ;;  %v1073_v3 = vld [vmem:[#allocation2 + $0x208] sm:$0x1f]  ;;  %v1343_v2 = vld [vmem:[#allocation2 + $0x238] sm:$0x1f] }
 0x110   :  { %758 = vst.msk [vmem:[%s7063_s4 + $0x178] sm:$0x3f] %vm148_vm2, %v702_v4  ;;  %v1525_v53 = vadd.f32 %v1441_v12, %v1255_v61  ;;  %v1172_v24 = vmul.f32 %v3904_v45, %v5310_v58  ;;  %v3053_v28 = vsel %vm148_vm2, %v2951_v48, 0.0  ;;  %v1442_v9 = vmul.f32 %v3915_v55, %v5315_v50  ;;  %v2096_v48 = vld [vmem:[#allocation2 + $0x178] sm:$0x7f] }
 0x111   :  { %v5322_v54 = vadd.f32 %v1443_v1, %v1257_v14  ;;  %2906 = vst [vmem:[%s7063_s4 + $0xd0] sm:$0x3f] %v2850_v60  ;;  %2907 = vst.msk [vmem:[%s7063_s4 + $0xd8] sm:$0x3f] %vm148_vm2, %v2851_v11  ;;  %v329_v19 = vmul.f32 %v3928_v5, %v5326_v59  ;;  %v460_v21 = vmul.f32 %v5163_v51, %v3931_v7  ;;  %v3055_v32 = vsel %vm18_vm0, %v2953_v18, 0.0 }
 0x112   :  { %v3054_v0 = vadd.f32 %v3053_v28, %v3052_v47  ;;  %v1736_v29 = vrot.slane %v1525_v53, 7  ;;  %v1256_v57 = vadd.f32 %v1172_v24, %v986_v49  ;;  %v648_v27 = vmul.f32 %v3934_v8, %v5328_v13  ;;  %v2094_v47 = vld [vmem:[#allocation2 + $0x168] sm:$0xfe]  ;;  %v2224_v11 = vld [vmem:[#allocation2 + $0x198] sm:$0xfe] }
 0x113   :  { %v1737_v41 = vrot.slane %v5322_v54, 7  ;;  %v516_v12 = vadd.f32 %v460_v21, %v329_v19  ;;  %v988_v37 = vmul.f32 %v3898_v43, %v886_v34  ;;  %v1174_v16 = vmul.f32 %v3904_v45, %v1072_v22  ;;  %v2226_v49 = vld [vmem:[#allocation2 + $0x1a8] sm:$0x7f]  ;;  %v2955_v24 = vld [vmem:[%s7063_s4 + $0x98] sm:$0x3f] }
 0x114   :  { %v5361_v61 = vadd.f32 %v1442_v9, %v1256_v57  ;;  %v1444_v60 = vmul.f32 %v3915_v55, %v1342_v31  ;;  %v3056_v53 = vadd.f32 %v3055_v32, %v3054_v0  ;;  %v989_v19 = vmul.f32 %v3901_v44, %v887_v23  ;;  %v2410_v21 = vld [vmem:[#allocation2 + $0x1c8] sm:$0xfe]  ;;  %v2412_v57 = vld [vmem:[#allocation2 + $0x1d8] sm:$0x7f] }
 0x115   :  { %v1738_v1 = vsel %vm1642_vm3, %v1736_v29, %v1737_v41  ;;  %v704_v14 = vadd.f32 %v648_v27, %v516_v12  ;;  %v1258_v18 = vadd.f32 %v1174_v16, %v988_v37  ;;  %v1175_v9 = vmul.f32 %v3907_v46, %v1073_v3  ;;  %v808_v37 = vld [vmem:[%s7063_s4 + $0x130] sm:$0x3f]  ;;  %v575_v54 = vld [vmem:[#allocation2 + $0x2c8] sm:$0x3f] }
 0x116   :  { %v1876_v4 = vsel %vm826_vm4, %v1738_v1, 0.0  ;;  %v7068_v34 = vrot.slane %v5361_v61, 7  ;;  %v1445_v22 = vmul.f32 %v3918_v56, %v1343_v2  ;;  %v2168_v0 = vmul.f32 %v4915_v35, %v2094_v47  ;;  %v5389_v1 = vld [vmem:[#allocation2 + $0x280] sm:$0xff] }
 0x117   :  { %v1932_v28 = vadd.f32 %v1876_v4, %v807_v63  ;;  %760 = vst.msk [vmem:[%s7063_s4 + $0x188] sm:$0xff] %vm18_vm0, %v704_v14  ;;  %v1528_v29 = vadd.f32 %v1444_v60, %v1258_v18  ;;  %v2170_v31 = vmul.f32 %v4915_v35, %v2096_v48  ;;  %v2298_v23 = vmul.f32 %v4922_v38, %v2224_v11  ;;  %v3630_v48 = vld [vmem:[#allocation2 + $0x250] sm:$0xff] }
 0x118   :  { %v2300_v63 = vmul.f32 %v4922_v38, %v2226_v49  ;;  %v3057_v12 = vsel %vm148_vm2, %v2955_v24, 0.0  ;;  %v1259_v27 = vadd.f32 %v1175_v9, %v989_v19  ;;  %v2484_v3 = vmul.f32 %v4935_v15, %v2410_v21  ;;  %v5398_v49 = vld [vmem:[#allocation2 + $0x250] sm:$0xff]  ;;  %v2225_v24 = vld [vmem:[#allocation2 + $0x1a0] sm:$0x7f] }
 0x119   :  { %1988 = vst.msk [vmem:[%s7063_s4 + $0x128] sm:$0xff] %vm18_vm0, %v1932_v28  ;;  %v3058_v2 = vadd.f32 %v3057_v12, %v3056_v53  ;;  %v5387_v32 = vmul.f32 %v3889_v39, %v5315_v50  ;;  %v1739_v16 = vrot.slane %v1528_v29, 7  ;;  %v2354_v47 = vadd.f32 %v2298_v23, %v2168_v0  ;;  %7102 = vst [vmem:[#allocation7_spill] sm:$0xff] %v5398_v49  ;;  %v2095_v53 = vld [vmem:[#allocation2 + $0x170] sm:$0x7f]  ;;  %v2957_v28 = vld [vmem:[%s7063_s4 + $0xa8] sm:$0xff] }
 0x11a   :  { %v5395_v4 = vmul.f32 %v3630_v48, %v3892_v40  ;;  %v1529_v14 = vadd.f32 %v1445_v22, %v1259_v27  ;;  %v2356_v60 = vadd.f32 %v2300_v63, %v2170_v31  ;;  %v2486_v11 = vmul.f32 %v4935_v15, %v2412_v57  ;;  %v882_v18 = vld [vmem:[#allocation2 + $0x1b0] sm:$0x80]  ;;  %v2411_v29 = vld [vmem:[#allocation2 + $0x1d0] sm:$0x7f]  ;;  %v809_v23 = vld [vmem:[%s7063_s4 + $0x138] sm:$0x3f] }
 0x11b   :  { %v1740_v19 = vsel %vm1642_vm3, %v7068_v34, %v1739_v16  ;;  %v2540_v21 = vadd.f32 %v2484_v3, %v2354_v47  ;;  %v328_v9 = vmul.f32 %v3889_v39, %v5398_v49  ;;  %v459_v22 = vmul.f32 %v5389_v1, %v3892_v40  ;;  %v5410_v0 = vld [vmem:[#allocation2 + $0x2b0] sm:$0xff]  ;;  %v255_v27 = vld [vmem:[#allocation2 + $0x260] sm:$0x3f] }
 0x11c   :  { %7103 = vst [vmem:[#allocation8_spill] sm:$0xff] %v5410_v0  ;;  %v1933_v31 = vadd.f32 %v1740_v19, %v808_v37  ;;  %v1741_v63 = vrot.slane %v1529_v14, 7  ;;  %v5415_v57 = vadd.f32 %v2486_v11, %v2356_v60  ;;  %v647_v12 = vmul.f32 %v3895_v42, %v5410_v0  ;;  %v386_v37 = vld [vmem:[#allocation2 + $0x290] sm:$0x3f]  ;;  %v256_v19 = vld [vmem:[#allocation2 + $0x268] sm:$0x3f] }
 0x11d   :  { %v5421_v3 = vmul.f32 %v3895_v42, %v5389_v1  ;;  %v2673_v16 = vrot.slane %v2540_v21, 1  ;;  %v515_v47 = vadd.f32 %v459_v22, %v328_v9  ;;  %v2169_v48 = vmul.f32 %v4886_v33, %v2095_v53  ;;  %v2036_v60 = vld [vmem:[%s7063_s4 + $0xe8] sm:$0xff]  ;;  %v574_v21 = vld [vmem:[#allocation2 + $0x2c0] sm:$0x3f]  ;;  %v1068_v22 = vld [vmem:[#allocation2 + $0x1e0] sm:$0x80] }
 0x11e   :  { %v3059_v17 = vsel %vm18_vm0, %v2957_v28, 0.0  ;;  %1989 = vst [vmem:[%s7063_s4 + $0x130] sm:$0x3f] %v1933_v31  ;;  %v1742_v14 = vsel %vm1642_vm3, %v1737_v41, %v1741_v63  ;;  %v2674_v11 = vrot.slane %v5415_v57, 1  ;;  %v2299_v53 = vmul.f32 %v4889_v36, %v2225_v24  ;;  %v889_v57 = vld [vmem:[#allocation2 + $0x1e8] sm:$0x80] }
 0x11f   :  { %v3060_v9 = vadd.f32 %v3059_v17, %v3058_v2  ;;  %v1934_v28 = vadd.f32 %v1742_v14, %v809_v23  ;;  %v5436_v34 = vadd.f32 %v647_v12, %v515_v47  ;;  %v2485_v31 = vmul.f32 %v4892_v6, %v2411_v29  ;;  %v1075_v0 = vld [vmem:[#allocation2 + $0x218] sm:$0x80]  ;;  %v2959_v17 = vld [vmem:[%s7063_s4 + $0xb8] sm:$0x3f]  ;;  %v1345_v47 = vld [vmem:[#allocation2 + $0x248] sm:$0x80] }
 0x120   :  { %v984_v41 = vmul.f32 %v3898_v43, %v882_v18  ;;  %v2675_v63 = vsel %vm2627_vm5, %v2673_v16, %v2674_v11  ;;  %v2355_v26 = vadd.f32 %v2299_v53, %v2169_v48  ;;  %v330_v62 = vmul.f32 %v3889_v39, %v255_v27 }
 0x121   :  { %7104 = vst [vmem:[#allocation9_spill] sm:$0xff] %v5436_v34  ;;  %1990 = vst.msk [vmem:[%s7063_s4 + $0x138] sm:$0x3f] %vm148_vm2, %v1934_v28  ;;  %v2853_v2 = vadd.f32 %v2675_v63, %v2036_v60  ;;  %v461_v24 = vmul.f32 %v3892_v40, %v386_v37  ;;  %v649_v18 = vmul.f32 %v3895_v42, %v574_v21  ;;  %v1338_v60 = vld [vmem:[#allocation2 + $0x210] sm:$0x80] }
 0x122   :  { %v331_v29 = vmul.f32 %v3928_v5, %v256_v19  ;;  %v1170_v23 = vmul.f32 %v3904_v45, %v1068_v22  ;;  %v5453_v12 = vadd.f32 %v2485_v31, %v2355_v26  ;;  %v462_v27 = vmul.f32 %v3931_v7, %v387_v25 }
 0x123   :  { %v650_v16 = vmul.f32 %v3934_v8, %v575_v54  ;;  %2909 = vst.msk [vmem:[%s7063_s4 + $0xe8] sm:$0xff] %vm18_vm0, %v2853_v2  ;;  %v517_v48 = vadd.f32 %v461_v24, %v330_v62  ;;  %v991_v37 = vmul.f32 %v3901_v44, %v889_v57  ;;  %v993_v19 = vmul.f32 %v5274_v30, %v3901_v44  ;;  %v2037_v62 = vld [vmem:[%s7063_s4 + $0xf0] sm:$0x3f]  ;;  %v2038_v2 = vld [vmem:[%s7063_s4 + $0xf8] sm:$0x3f] }
 0x124   :  { %7105 = vst [vmem:[#allocation10_spill] sm:$0xff] %v5453_v12  ;;  %v1177_v14 = vmul.f32 %v3907_v46, %v1075_v0  ;;  %v3061_v26 = vsel %vm148_vm2, %v2959_v17, 0.0  ;;  %v7076_v25 = vrot.slane %v5453_v12, 1  ;;  %v518_v53 = vadd.f32 %v462_v27, %v331_v29  ;;  %v888_v0 = vld [vmem:[#allocation2 + $0x1e0] sm:$0x80] }
 0x125   :  { %v1179_v21 = vmul.f32 %v3907_v46, %v5160_v10  ;;  %v705_v22 = vadd.f32 %v649_v18, %v517_v48  ;;  %v1447_v31 = vmul.f32 %v3918_v56, %v1345_v47  ;;  %v1449_v30 = vmul.f32 %v3918_v56, %v5326_v59  ;;  %v1074_v24 = vld [vmem:[#allocation2 + $0x210] sm:$0x80]  ;;  %v2228_v12 = vld [vmem:[#allocation2 + $0x1c8] sm:$0xfe] }
 0x126   :  { %v1261_v28 = vadd.f32 %v1177_v14, %v991_v37  ;;  %v3062_v54 = vadd.f32 %v3061_v26, %v3060_v9  ;;  %v706_v63 = vadd.f32 %v650_v16, %v518_v53  ;;  %v2798_v17 = vsel %vm2064_vm6, %v7076_v25, 0.0  ;;  %v1344_v16 = vld [vmem:[#allocation2 + $0x240] sm:$0x80]  ;;  %v2961_v37 = vld [vmem:[%s7063_s4 + $0xc8] sm:$0xff]  ;;  %v892_v53 = vld [vmem:[#allocation2 + $0x200] sm:$0x1f] }
 0x127   :  { %v1263_v57 = vadd.f32 %v1179_v21, %v993_v19  ;;  %v1254_v18 = vadd.f32 %v1170_v23, %v984_v41  ;;  %v1440_v29 = vmul.f32 %v3915_v55, %v1338_v60  ;;  %761 = vst [vmem:[%s7063_s4 + $0x190] sm:$0x3f] %v705_v22  ;;  %v2854_v27 = vadd.f32 %v2798_v17, %v2037_v62  ;;  %v5506_v60 = vld [vmem:[#allocation2 + $0x2e8] sm:$0xff]  ;;  %v1348_v17 = vld [vmem:[#allocation2 + $0x260] sm:$0x1f] }
 0x128   :  { %v1531_v9 = vadd.f32 %v1447_v31, %v1261_v28  ;;  %762 = vst.msk [vmem:[%s7063_s4 + $0x198] sm:$0x3f] %vm148_vm2, %v706_v63  ;;  %v2799_v48 = vsel %vm2064_vm6, %v2674_v11, 0.0  ;;  %v990_v41 = vmul.f32 %v3898_v43, %v888_v0  ;;  %v992_v23 = vmul.f32 %v5310_v58, %v3898_v43  ;;  %7106 = vst [vmem:[#allocation11_spill] sm:$0xff] %v5506_v60  ;;  %v1078_v28 = vld [vmem:[#allocation2 + $0x230] sm:$0x1f] }
 0x129   :  { %v5490_v47 = vadd.f32 %v1449_v30, %v1263_v57  ;;  %2910 = vst [vmem:[%s7063_s4 + $0xf0] sm:$0x3f] %v2854_v27  ;;  %v2855_v14 = vadd.f32 %v2799_v48, %v2038_v2  ;;  %v1176_v26 = vmul.f32 %v3904_v45, %v1074_v24  ;;  %v1178_v11 = vmul.f32 %v3904_v45, %v5315_v50  ;;  %v811_v30 = vld [vmem:[%s7063_s4 + $0x148] sm:$0xff]  ;;  %v1079_v27 = vld [vmem:[#allocation2 + $0x238] sm:$0x1f] }
 0x12a   :  { %v1746_v19 = vrot.slane %v1531_v9, 7  ;;  %v1446_v21 = vmul.f32 %v3915_v55, %v1344_v16  ;;  %v1448_v62 = vmul.f32 %v3915_v55, %v5398_v49  ;;  %v333_v22 = vmul.f32 %v5163_v51, %v3928_v5  ;;  %v893_v2 = vld [vmem:[#allocation2 + $0x208] sm:$0x1f]  ;;  %v2230_v49 = vld [vmem:[#allocation2 + $0x1d8] sm:$0x7f] }
 0x12b   :  { %v7077_v58 = vrot.slane %v5490_v47, 7  ;;  %v1524_v31 = vadd.f32 %v1440_v29, %v1254_v18  ;;  %2911 = vst.msk [vmem:[%s7063_s4 + $0xf8] sm:$0x3f] %vm148_vm2, %v2855_v14  ;;  %v1260_v0 = vadd.f32 %v1176_v26, %v990_v41  ;;  %v1262_v63 = vadd.f32 %v1178_v11, %v992_v23  ;;  %v1349_v16 = vld [vmem:[#allocation2 + $0x268] sm:$0x1f] }
 0x12c   :  { %v464_v57 = vmul.f32 %v5328_v13, %v3931_v7  ;;  %v3063_v24 = vsel %vm18_vm0, %v2961_v37, 0.0  ;;  %v652_v29 = vmul.f32 %v3934_v8, %v5506_v60  ;;  %v994_v9 = vmul.f32 %v3898_v43, %v892_v53  ;;  %v2098_v26 = vld [vmem:[#allocation2 + $0x198] sm:$0xfe]  ;;  %v2100_v11 = vld [vmem:[#allocation2 + $0x1a8] sm:$0x7f] }
 0x12d   :  { %v1748_v18 = vsel %vm1642_vm3, %v1746_v19, %v7077_v58  ;;  %v1530_v41 = vadd.f32 %v1446_v21, %v1260_v0  ;;  %v1532_v23 = vadd.f32 %v1448_v62, %v1262_v63  ;;  %v1180_v25 = vmul.f32 %v3904_v45, %v1078_v28  ;;  %v2963_v21 = vld [vmem:[%s7063_s4 + $0xd8] sm:$0x3f] }
 0x12e   :  { %v1880_v48 = vsel %vm826_vm4, %v1748_v18, 0.0  ;;  %v520_v14 = vadd.f32 %v464_v57, %v333_v22  ;;  %v1450_v19 = vmul.f32 %v3915_v55, %v1348_v17  ;;  %v995_v58 = vmul.f32 %v3901_v44, %v893_v2  ;;  %v2414_v18 = vld [vmem:[#allocation2 + $0x1f8] sm:$0xfe]  ;;  %v2416_v57 = vld [vmem:[#allocation2 + $0x208] sm:$0x7f] }
 0x12f   :  { %v1936_v37 = vadd.f32 %v1880_v48, %v811_v30  ;;  %v3064_v60 = vadd.f32 %v3063_v24, %v3062_v54  ;;  %v1733_v53 = vrot.slane %v1524_v31, 7  ;;  %v1181_v13 = vmul.f32 %v3907_v46, %v1079_v27  ;;  %v2099_v48 = vld [vmem:[#allocation2 + $0x1a0] sm:$0x7f] }
 0x130   :  { %v708_v34 = vadd.f32 %v652_v29, %v520_v14  ;;  %v1264_v62 = vadd.f32 %v1180_v25, %v994_v9  ;;  %v1451_v22 = vmul.f32 %v3918_v56, %v1349_v16  ;;  %v2172_v54 = vmul.f32 %v4915_v35, %v2098_v26  ;;  %v2229_v14 = vld [vmem:[#allocation2 + $0x1d0] sm:$0x7f]  ;;  %v806_v26 = vld [vmem:[%s7063_s4 + $0x120] sm:$0xff] }
 0x131   :  { %1992 = vst.msk [vmem:[%s7063_s4 + $0x148] sm:$0xff] %vm18_vm0, %v1936_v37  ;;  %v2174_v28 = vmul.f32 %v4915_v35, %v2100_v11  ;;  %v511_v31 = vadd.f32 %v5395_v4, %v5387_v32  ;;  %v1743_v30 = vrot.slane %v1530_v41, 7  ;;  %v1265_v0 = vadd.f32 %v1181_v13, %v995_v58  ;;  %v2965_v13 = vld [vmem:[%s7063_s4 + $0xe8] sm:$0xff] }
 0x132   :  { %764 = vst.msk [vmem:[%s7063_s4 + $0x1a8] sm:$0xff] %vm18_vm0, %v708_v34  ;;  %v2302_v63 = vmul.f32 %v4922_v38, %v2228_v12  ;;  %v1744_v25 = vrot.slane %v1532_v23, 7  ;;  %v1534_v17 = vadd.f32 %v1450_v19, %v1264_v62  ;;  %v2304_v2 = vmul.f32 %v4922_v38, %v2230_v49  ;;  %v812_v34 = vld [vmem:[%s7063_s4 + $0x150] sm:$0x3f]  ;;  %v2967_v62 = vld [vmem:[%s7063_s4 + $0xf8] sm:$0x3f] }
 0x133   :  { %v2488_v24 = vmul.f32 %v4935_v15, %v2414_v18  ;;  %v3065_v29 = vsel %vm148_vm2, %v2963_v21, 0.0  ;;  %v7107_v32 = vrot.slane %v5361_v61, 7  ;;  %v1535_v9 = vadd.f32 %v1451_v22, %v1265_v0  ;;  %v259_v18 = vld [vmem:[#allocation2 + $0x290] sm:$0x3f]  ;;  %v390_v0 = vld [vmem:[#allocation2 + $0x2c0] sm:$0x3f] }
 0x134   :  { %v2358_v27 = vadd.f32 %v2302_v63, %v2172_v54  ;;  %v3066_v16 = vadd.f32 %v3065_v29, %v3064_v60  ;;  %v1749_v49 = vrot.slane %v1534_v17, 7  ;;  %v2360_v12 = vadd.f32 %v2304_v2, %v2174_v28  ;;  %v813_v60 = vld [vmem:[%s7063_s4 + $0x158] sm:$0x3f]  ;;  %v578_v2 = vld [vmem:[#allocation2 + $0x2f0] sm:$0x3f] }
 0x135   :  { %v1735_v4 = vsel %vm1642_vm3, %v1733_v53, %v7107_v32  ;;  %v2490_v58 = vmul.f32 %v4935_v15, %v2416_v57  ;;  %v5567_v61 = vadd.f32 %v5421_v3, %v511_v31  ;;  %v1751_v41 = vrot.slane %v1535_v9, 7  ;;  %v2415_v53 = vld [vmem:[#allocation2 + $0x200] sm:$0x7f]  ;;  %v2040_v57 = vld [vmem:[%s7063_s4 + $0x108] sm:$0xff] }
 0x136   :  { %v2544_v23 = vadd.f32 %v2488_v24, %v2358_v27  ;;  %v1875_v11 = vsel %vm826_vm4, %v1735_v4, 0.0  ;;  %v1745_v37 = vsel %vm1642_vm3, %v1743_v30, %v1744_v25  ;;  %v1750_v19 = vsel %vm1642_vm3, %v1744_v25, %v1749_v49  ;;  %v260_v24 = vld [vmem:[#allocation2 + $0x298] sm:$0x3f]  ;;  %v391_v9 = vld [vmem:[#allocation2 + $0x2c8] sm:$0x3f] }
 0x137   :  { %v2546_v3 = vadd.f32 %v2490_v58, %v2360_v12  ;;  %v3067_v21 = vsel %vm18_vm0, %v2965_v13, 0.0  ;;  %v1937_v22 = vadd.f32 %v1750_v19, %v812_v34  ;;  %v7108_v54 = vrot.slane %v5490_v47, 7  ;;  %v579_v27 = vld [vmem:[#allocation2 + $0x2f8] sm:$0x3f]  ;;  %v895_v12 = vld [vmem:[#allocation2 + $0x218] sm:$0x80] }
 0x138   :  { %v2679_v31 = vrot.slane %v2544_v23, 1  ;;  %v3068_v63 = vadd.f32 %v3067_v21, %v3066_v16  ;;  %v2173_v17 = vmul.f32 %v4886_v33, %v2099_v48  ;;  %v5590_v29 = vadd.f32 %v1875_v11, %v806_v26  ;;  %v1081_v58 = vld [vmem:[#allocation2 + $0x248] sm:$0x80]  ;;  %v1351_v19 = vld [vmem:[#allocation2 + $0x278] sm:$0x80] }
 0x139   :  { %v1752_v28 = vsel %vm1642_vm3, %v7108_v54, %v1751_v41  ;;  %v2680_v25 = vrot.slane %v2546_v3, 1  ;;  %v5594_v47 = vsel %vm826_vm4, %v1745_v37, 0.0  ;;  %1993 = vst [vmem:[%s7063_s4 + $0x150] sm:$0x3f] %v1937_v22  ;;  %v2303_v32 = vmul.f32 %v4889_v36, %v2229_v14  ;;  %v2042_v22 = vld [vmem:[%s7063_s4 + $0x118] sm:$0x3f] }
 0x13a   :  { %v1938_v30 = vadd.f32 %v1752_v28, %v813_v60  ;;  %v2489_v4 = vmul.f32 %v4892_v6, %v2415_v53  ;;  %v3069_v16 = vsel %vm148_vm2, %v2967_v62, 0.0  ;;  %v334_v34 = vmul.f32 %v3889_v39, %v259_v18  ;;  %v894_v54 = vld [vmem:[#allocation2 + $0x210] sm:$0x80] }
 0x13b   :  { %v2681_v13 = vsel %vm2627_vm5, %v2679_v31, %v2680_v25  ;;  %v465_v49 = vmul.f32 %v3892_v40, %v390_v0  ;;  %v2359_v60 = vadd.f32 %v2303_v32, %v2173_v17  ;;  %v653_v41 = vmul.f32 %v3895_v42, %v578_v2  ;;  %v1350_v32 = vld [vmem:[#allocation2 + $0x270] sm:$0x80] }
 0x13c   :  { %1994 = vst.msk [vmem:[%s7063_s4 + $0x158] sm:$0x3f] %vm148_vm2, %v1938_v30  ;;  %v2857_v48 = vadd.f32 %v2681_v13, %v2040_v57  ;;  %v335_v23 = vmul.f32 %v3928_v5, %v260_v24  ;;  %v5611_v14 = vadd.f32 %v3069_v16, %v3068_v63  ;;  %v466_v11 = vmul.f32 %v3931_v7, %v391_v9  ;;  %v7109_v63 = vld [vmem:[#allocation8_spill] sm:$0xff]  ;;  %v1080_v24 = vld [vmem:[#allocation2 + $0x240] sm:$0x80] }
 0x13d   :  { %v521_v26 = vadd.f32 %v465_v49, %v334_v34  ;;  %v654_v37 = vmul.f32 %v3934_v8, %v579_v27  ;;  %v5619_v3 = vadd.f32 %v2489_v4, %v2359_v60  ;;  %v997_v53 = vmul.f32 %v3901_v44, %v895_v12  ;;  %v898_v27 = vld [vmem:[#allocation2 + $0x230] sm:$0x1f]  ;;  %v1084_v16 = vld [vmem:[#allocation2 + $0x260] sm:$0x1f] }
 0x13e   :  { %2913 = vst.msk [vmem:[%s7063_s4 + $0x108] sm:$0xff] %vm18_vm0, %v2857_v48  ;;  %v999_v5 = vmul.f32 %v3901_v44, %v5160_v10  ;;  %v1183_v18 = vmul.f32 %v3907_v46, %v1081_v58  ;;  %v332_v7 = vmul.f32 %v5389_v1, %v3889_v39  ;;  %v522_v8 = vadd.f32 %v466_v11, %v335_v23  ;;  %v2041_v39 = vld [vmem:[%s7063_s4 + $0x110] sm:$0x3f]  ;;  %v5651_v13 = vld [vmem:[#allocation2] sm:$0xff] }
 0x13f   :  { %v709_v21 = vadd.f32 %v653_v41, %v521_v26  ;;  %v1185_v62 = vmul.f32 %v3907_v46, %v5326_v59  ;;  %v2677_v28 = vrot.slane %v5619_v3, 1  ;;  %v1453_v10 = vmul.f32 %v3918_v56, %v1351_v19  ;;  %v1354_v58 = vld [vmem:[#allocation2 + $0x290] sm:$0x1f]  ;;  %v7110_v60 = vld [vmem:[#allocation7_spill] sm:$0xff]  ;;  %v899_v26 = vld [vmem:[#allocation2 + $0x238] sm:$0x1f] }
 0x140   :  { %v1267_v31 = vadd.f32 %v1183_v18, %v997_v53  ;;  %v1455_v0 = vmul.f32 %v3918_v56, %v5163_v51  ;;  %v463_v30 = vmul.f32 %v7109_v63, %v3892_v40  ;;  %v710_v57 = vadd.f32 %v654_v37, %v522_v8 }
 0x141   :  { %765 = vst [vmem:[%s7063_s4 + $0x1b0] sm:$0x3f] %v709_v21  ;;  %v1269_v17 = vadd.f32 %v1185_v62, %v999_v5  ;;  %v2803_v2 = vsel %vm2064_vm6, %v2680_v25, 0.0  ;;  %v2802_v51 = vsel %vm2064_vm6, %v2677_v28, 0.0  ;;  %v996_v40 = vmul.f32 %v3898_v43, %v894_v54  ;;  %v1085_v5 = vld [vmem:[#allocation2 + $0x268] sm:$0x1f] }
 0x142   :  { %v1537_v4 = vadd.f32 %v1453_v10, %v1267_v31  ;;  %v2859_v9 = vadd.f32 %v2803_v2, %v2042_v22  ;;  %v651_v34 = vmul.f32 %v5651_v13, %v3895_v42  ;;  %766 = vst.msk [vmem:[%s7063_s4 + $0x1b8] sm:$0x3f] %vm148_vm2, %v710_v57  ;;  %v2858_v49 = vadd.f32 %v2802_v51, %v2041_v39  ;;  %v815_v21 = vld [vmem:[%s7063_s4 + $0x168] sm:$0xff]  ;;  %v1355_v54 = vld [vmem:[#allocation2 + $0x298] sm:$0x1f] }
 0x143   :  { %v5659_v25 = vadd.f32 %v1455_v0, %v1269_v17  ;;  %v998_v12 = vmul.f32 %v3898_v43, %v5315_v50  ;;  %v1182_v42 = vmul.f32 %v3904_v45, %v1080_v24  ;;  %v1184_v41 = vmul.f32 %v3904_v45, %v7110_v60  ;;  %v2102_v39 = vld [vmem:[#allocation2 + $0x1c8] sm:$0xfe]  ;;  %v2232_v24 = vld [vmem:[#allocation2 + $0x1f8] sm:$0xfe] }
 0x144   :  { %v1756_v48 = vrot.slane %v1537_v4, 7  ;;  %2915 = vst.msk [vmem:[%s7063_s4 + $0x118] sm:$0x3f] %vm148_vm2, %v2859_v9  ;;  %v1452_v23 = vmul.f32 %v3915_v55, %v1350_v32  ;;  %2914 = vst [vmem:[%s7063_s4 + $0x110] sm:$0x3f] %v2858_v49  ;;  %v1454_v37 = vmul.f32 %v3915_v55, %v5389_v1  ;;  %v1000_v19 = vmul.f32 %v3898_v43, %v898_v27  ;;  %v810_v4 = vld [vmem:[%s7063_s4 + $0x140] sm:$0xff] }
 0x145   :  { %v2969_v11 = vld [vmem:[%s7063_s4 + $0x108] sm:$0xff]  ;;  %v1757_v50 = vrot.slane %v5659_v25, 7  ;;  %v1186_v53 = vmul.f32 %v3904_v45, %v1084_v16  ;;  %v519_v18 = vadd.f32 %v463_v30, %v332_v7  ;;  %v1266_v8 = vadd.f32 %v1182_v42, %v996_v40  ;;  %v2104_v7 = vld [vmem:[#allocation2 + $0x1d8] sm:$0x7f] }
 0x146   :  { %v1268_v62 = vadd.f32 %v1184_v41, %v998_v12  ;;  %v1456_v22 = vmul.f32 %v3915_v55, %v1354_v58  ;;  %v3071_v31 = vsel %vm18_vm0, %v2969_v11, 0.0  ;;  %v1001_v0 = vmul.f32 %v3901_v44, %v899_v26  ;;  %v2234_v32 = vld [vmem:[#allocation2 + $0x208] sm:$0x7f]  ;;  %v2420_v42 = vld [vmem:[#allocation2 + $0x238] sm:$0x7f] }
 0x147   :  { %v1758_v1 = vsel %vm1642_vm3, %v1756_v48, %v1757_v50  ;;  %v1270_v10 = vadd.f32 %v1186_v53, %v1000_v19  ;;  %v1536_v57 = vadd.f32 %v1452_v23, %v1266_v8  ;;  %v1187_v2 = vmul.f32 %v3907_v46, %v1085_v5  ;;  %v2418_v16 = vld [vmem:[#allocation2 + $0x228] sm:$0xfe]  ;;  %v816_v41 = vld [vmem:[%s7063_s4 + $0x170] sm:$0x3f]  ;;  %v2101_v8 = vld [vmem:[#allocation2 + $0x1c0] sm:$0xfe] }
 0x148   :  { %v1884_v30 = vsel %vm826_vm4, %v1758_v1, 0.0  ;;  %v1538_v17 = vadd.f32 %v1454_v37, %v1268_v62  ;;  %v3072_v51 = vadd.f32 %v3071_v31, %v5611_v14  ;;  %v1457_v27 = vmul.f32 %v3918_v56, %v1355_v54  ;;  %v2103_v62 = vld [vmem:[#allocation2 + $0x1d0] sm:$0x7f] }
 0x149   :  { %v1940_v9 = vadd.f32 %v1884_v30, %v815_v21  ;;  %v1540_v40 = vadd.f32 %v1456_v22, %v1270_v10  ;;  %v1753_v49 = vrot.slane %v1536_v57, 7  ;;  %v1271_v58 = vadd.f32 %v1187_v2, %v1001_v0  ;;  %v2231_v22 = vld [vmem:[#allocation2 + $0x1f0] sm:$0xfe]  ;;  %v2233_v0 = vld [vmem:[#allocation2 + $0x200] sm:$0x7f] }
 0x14a   :  { %v1754_v12 = vrot.slane %v1538_v17, 7  ;;  %v2176_v48 = vmul.f32 %v4915_v35, %v2102_v39  ;;  %v2178_v26 = vmul.f32 %v4915_v35, %v2104_v7  ;;  %v2306_v11 = vmul.f32 %v4922_v38, %v2232_v24  ;;  %v2419_v57 = vld [vmem:[#allocation2 + $0x230] sm:$0x7f] }
 0x14b   :  { %1996 = vst.msk [vmem:[%s7063_s4 + $0x168] sm:$0xff] %vm18_vm0, %v1940_v9  ;;  %v2971_v14 = vld [vmem:[%s7063_s4 + $0x118] sm:$0x3f]  ;;  %v1759_v23 = vrot.slane %v1540_v40, 7  ;;  %v2308_v37 = vmul.f32 %v4922_v38, %v2234_v32  ;;  %v5714_v19 = vadd.f32 %v5594_v47, %v810_v4  ;;  %v5716_v53 = vadd.f32 %v651_v34, %v519_v18  ;;  %v2417_v47 = vld [vmem:[#allocation2 + $0x220] sm:$0xfe] }
 0x14c   :  { %v1541_v5 = vadd.f32 %v1457_v27, %v1271_v58  ;;  %v2492_v21 = vmul.f32 %v4935_v15, %v2418_v16  ;;  %v3073_v54 = vsel %vm148_vm2, %v2971_v14, 0.0  ;;  %v5721_v31 = vsel %vm1642_vm3, %v1753_v49, %v1754_v12  ;;  %v817_v18 = vld [vmem:[%s7063_s4 + $0x178] sm:$0x3f]  ;;  %v901_v4 = vld [vmem:[#allocation2 + $0x248] sm:$0x80] }
 0x14d   :  { %v1760_v1 = vsel %vm1642_vm3, %v1754_v12, %v1759_v23  ;;  %v2494_v10 = vmul.f32 %v4935_v15, %v2420_v42  ;;  %v5725_v39 = vadd.f32 %v3073_v54, %v3072_v51  ;;  %v2362_v30 = vadd.f32 %v2306_v11, %v2176_v48  ;;  %v1087_v16 = vld [vmem:[#allocation2 + $0x278] sm:$0x80]  ;;  %v5741_v49 = vld [vmem:[#allocation2 + $0x288] sm:$0xff] }
 0x14e   :  { %v1941_v34 = vadd.f32 %v1760_v1, %v816_v41  ;;  %v1761_v7 = vrot.slane %v1541_v5, 7  ;;  %v2364_v17 = vadd.f32 %v2308_v37, %v2178_v26  ;;  %v2175_v2 = vmul.f32 %v4886_v33, %v2101_v8  ;;  %v1357_v14 = vld [vmem:[#allocation2 + $0x2a8] sm:$0x80]  ;;  %v900_v41 = vld [vmem:[#allocation2 + $0x240] sm:$0x80] }
 0x14f   :  { %v2177_v24 = vmul.f32 %v4886_v33, %v2103_v62  ;;  %v2305_v32 = vmul.f32 %v4889_v36, %v2231_v22  ;;  %v2548_v9 = vadd.f32 %v2492_v21, %v2362_v30  ;;  %v2307_v40 = vmul.f32 %v4889_v36, %v2233_v0  ;;  %v2044_v11 = vld [vmem:[%s7063_s4 + $0x128] sm:$0xff]  ;;  %v2046_v1 = vld [vmem:[%s7063_s4 + $0x138] sm:$0x3f]  ;;  %v1086_v0 = vld [vmem:[#allocation2 + $0x270] sm:$0x80] }
 0x150   :  { %1997 = vst [vmem:[%s7063_s4 + $0x170] sm:$0x3f] %v1941_v34  ;;  %v1762_v51 = vsel %vm1642_vm3, %v1757_v50, %v1761_v7  ;;  %v2491_v27 = vmul.f32 %v4892_v6, %v2417_v47  ;;  %v2550_v58 = vadd.f32 %v2494_v10, %v2364_v17  ;;  %v2493_v42 = vmul.f32 %v4892_v6, %v2419_v57  ;;  %v5765_v30 = vld [vmem:[#allocation2 + $0x280] sm:$0xff] }
 0x151   :  { %v1942_v12 = vadd.f32 %v1762_v51, %v817_v18  ;;  %v2361_v48 = vadd.f32 %v2305_v32, %v2175_v2  ;;  %v2685_v23 = vrot.slane %v2548_v9, 1  ;;  %v2363_v26 = vadd.f32 %v2307_v40, %v2177_v24  ;;  %v1356_v57 = vld [vmem:[#allocation2 + $0x2a0] sm:$0x80]  ;;  %v2045_v24 = vld [vmem:[%s7063_s4 + $0x130] sm:$0x3f] }
 0x152   :  { %v1003_v25 = vmul.f32 %v3901_v44, %v901_v4  ;;  %v1005_v50 = vmul.f32 %v3901_v44, %v5326_v59  ;;  %v2686_v37 = vrot.slane %v2550_v58, 1  ;;  %v1189_v21 = vmul.f32 %v3907_v46, %v1087_v16  ;;  %v7111_v59 = vld [vmem:[#allocation6_spill] sm:$0xff]  ;;  %v904_v16 = vld [vmem:[#allocation2 + $0x260] sm:$0x1f] }
 0x153   :  { %1998 = vst.msk [vmem:[%s7063_s4 + $0x178] sm:$0x3f] %vm148_vm2, %v1942_v12  ;;  %v2547_v5 = vadd.f32 %v2491_v27, %v2361_v48  ;;  %v1191_v8 = vmul.f32 %v3907_v46, %v5741_v49  ;;  %v2549_v62 = vadd.f32 %v2493_v42, %v2363_v26  ;;  %v1459_v22 = vmul.f32 %v3918_v56, %v1357_v14  ;;  %v1090_v12 = vld [vmem:[#allocation2 + $0x290] sm:$0x1f]  ;;  %v1360_v14 = vld [vmem:[#allocation2 + $0x2c0] sm:$0x1f] }
 0x154   :  { %v1461_v54 = vmul.f32 %v3918_v56, %v7111_v59  ;;  %v1002_v10 = vmul.f32 %v3898_v43, %v900_v41  ;;  %v2687_v47 = vsel %vm2627_vm5, %v2685_v23, %v2686_v37  ;;  %v1273_v18 = vadd.f32 %v1189_v21, %v1003_v25  ;;  %v905_v41 = vld [vmem:[#allocation2 + $0x268] sm:$0x1f] }
 0x155   :  { %v2682_v34 = vrot.slane %v2547_v5, 1  ;;  %v1275_v7 = vadd.f32 %v1191_v8, %v1005_v50  ;;  %v2861_v17 = vadd.f32 %v2687_v47, %v2044_v11  ;;  %v2683_v2 = vrot.slane %v2549_v62, 1  ;;  %v1091_v11 = vld [vmem:[#allocation2 + $0x298] sm:$0x1f]  ;;  %v1361_v62 = vld [vmem:[#allocation2 + $0x2c8] sm:$0x1f] }
 0x156   :  { %v2807_v32 = vsel %vm2064_vm6, %v2686_v37, 0.0  ;;  %v1004_v4 = vmul.f32 %v3898_v43, %v7110_v60  ;;  %v1543_v51 = vadd.f32 %v1459_v22, %v1273_v18  ;;  %v1188_v27 = vmul.f32 %v3904_v45, %v1086_v0  ;;  %v819_v37 = vld [vmem:[%s7063_s4 + $0x188] sm:$0xff]  ;;  %v2106_v22 = vld [vmem:[#allocation2 + $0x1f8] sm:$0xfe] }
 0x157   :  { %v5774_v9 = vadd.f32 %v1461_v54, %v1275_v7  ;;  %v2863_v40 = vadd.f32 %v2807_v32, %v2046_v1  ;;  %2917 = vst.msk [vmem:[%s7063_s4 + $0x128] sm:$0xff] %vm18_vm0, %v2861_v17  ;;  %v2684_v58 = vsel %vm2627_vm5, %v2682_v34, %v2683_v2  ;;  %v2806_v48 = vsel %vm2064_vm6, %v2683_v2, 0.0  ;;  %v2108_v0 = vld [vmem:[#allocation2 + $0x208] sm:$0x7f]  ;;  %v2422_v17 = vld [vmem:[#allocation2 + $0x258] sm:$0xfe] }
 0x158   :  { %v1190_v60 = vmul.f32 %v3904_v45, %v5765_v30  ;;  %v1458_v42 = vmul.f32 %v3915_v55, %v1356_v57  ;;  %v5788_v23 = vadd.f32 %v2684_v58, %v5590_v29  ;;  %v1766_v26 = vrot.slane %v1543_v51, 7  ;;  %v2238_v57 = vld [vmem:[#allocation2 + $0x238] sm:$0x7f]  ;;  %v2424_v51 = vld [vmem:[#allocation2 + $0x268] sm:$0x7f] }
 0x159   :  { %v1767_v25 = vrot.slane %v5774_v9, 7  ;;  %v2862_v50 = vadd.f32 %v2806_v48, %v2045_v24  ;;  %2919 = vst.msk [vmem:[%s7063_s4 + $0x138] sm:$0x3f] %vm148_vm2, %v2863_v40  ;;  %v1272_v5 = vadd.f32 %v1188_v27, %v1002_v10  ;;  %v1460_v29 = vmul.f32 %v3915_v55, %v7109_v63  ;;  %v2236_v63 = vld [vmem:[#allocation2 + $0x228] sm:$0xfe] }
 0x15a   :  { %v1274_v21 = vadd.f32 %v1190_v60, %v1004_v4  ;;  %v1006_v8 = vmul.f32 %v3898_v43, %v904_v16  ;;  %v1192_v54 = vmul.f32 %v3904_v45, %v1090_v12  ;;  %v1462_v1 = vmul.f32 %v3915_v55, %v1360_v14  ;;  %v2048_v9 = vld [vmem:[%s7063_s4 + $0x148] sm:$0xff] }
 0x15b   :  { %v1768_v59 = vsel %vm1642_vm3, %v1766_v26, %v1767_v25  ;;  %2918 = vst [vmem:[%s7063_s4 + $0x130] sm:$0x3f] %v2862_v50  ;;  %v1007_v10 = vmul.f32 %v3901_v44, %v905_v41  ;;  %v1542_v34 = vadd.f32 %v1458_v42, %v1272_v5  ;;  %v1193_v7 = vmul.f32 %v3907_v46, %v1091_v11  ;;  %v2105_v41 = vld [vmem:[#allocation2 + $0x1f0] sm:$0xfe] }
 0x15c   :  { %v1888_v47 = vsel %vm826_vm4, %v1768_v59, 0.0  ;;  %v1544_v18 = vadd.f32 %v1460_v29, %v1274_v21  ;;  %v1276_v24 = vadd.f32 %v1192_v54, %v1006_v8  ;;  %v1463_v32 = vmul.f32 %v3918_v56, %v1361_v62  ;;  %v2107_v21 = vld [vmem:[#allocation2 + $0x200] sm:$0x7f]  ;;  %v820_v59 = vld [vmem:[%s7063_s4 + $0x190] sm:$0x3f] }
 0x15d   :  { %v1944_v2 = vadd.f32 %v1888_v47, %v819_v37  ;;  %v2180_v4 = vmul.f32 %v4915_v35, %v2106_v22  ;;  %v1763_v40 = vrot.slane %v1542_v34, 7  ;;  %v1277_v16 = vadd.f32 %v1193_v7, %v1007_v10  ;;  %v2235_v29 = vld [vmem:[#allocation2 + $0x220] sm:$0xfe]  ;;  %v2237_v34 = vld [vmem:[#allocation2 + $0x230] sm:$0x7f] }
 0x15e   :  { %v1764_v27 = vrot.slane %v1544_v18, 7  ;;  %v2182_v12 = vmul.f32 %v4915_v35, %v2108_v0  ;;  %v5819_v58 = vld [vmem:[%s7063_s4 + $0x128] sm:$0xff]  ;;  %v1546_v48 = vadd.f32 %v1462_v1, %v1276_v24  ;;  %v2310_v60 = vmul.f32 %v4922_v38, %v2236_v63  ;;  %v7112_v1 = vld [vmem:[#allocation9_spill] sm:$0xff]  ;;  %v821_v0 = vld [vmem:[%s7063_s4 + $0x198] sm:$0x3f] }
 0x15f   :  { %2000 = vst.msk [vmem:[%s7063_s4 + $0x188] sm:$0xff] %vm18_vm0, %v1944_v2  ;;  %v2312_v42 = vmul.f32 %v4922_v38, %v2238_v57  ;;  %v2496_v14 = vmul.f32 %v4935_v15, %v2422_v17  ;;  %v3075_v26 = vsel %vm18_vm0, %v5819_v58, 0.0  ;;  %v1547_v37 = vadd.f32 %v1463_v32, %v1277_v16  ;;  %v2421_v2 = vld [vmem:[#allocation2 + $0x250] sm:$0xfe]  ;;  %v2423_v24 = vld [vmem:[#allocation2 + $0x260] sm:$0x7f] }
 0x160   :  { %v5833_v50 = vld [vmem:[%s7063_s4 + $0x138] sm:$0x3f]  ;;  %v1765_v11 = vsel %vm1642_vm3, %v1763_v40, %v1764_v27  ;;  %v2498_v5 = vmul.f32 %v4935_v15, %v2424_v51  ;;  %v3076_v8 = vadd.f32 %v3075_v26, %v5725_v39  ;;  %v1769_v54 = vrot.slane %v1546_v48, 7  ;;  %v907_v16 = vld [vmem:[#allocation2 + $0x278] sm:$0x80] }
 0x161   :  { %v3077_v62 = vsel %vm148_vm2, %v5833_v50, 0.0  ;;  %v1887_v22 = vsel %vm826_vm4, %v1765_v11, 0.0  ;;  %v1771_v63 = vrot.slane %v1547_v37, 7  ;;  %v2366_v39 = vadd.f32 %v2310_v60, %v2180_v4 }
 0x162   :  { %v5846_v10 = vadd.f32 %v1887_v22, %v7112_v1  ;;  %v2368_v47 = vadd.f32 %v2312_v42, %v2182_v12  ;;  %v5854_v18 = vsel %vm826_vm4, %v5721_v31, 0.0  ;;  %v5856_v7 = vadd.f32 %v3077_v62, %v3076_v8  ;;  %v1095_v42 = vld [vmem:[#allocation2 + $0x2b8] sm:$0xff]  ;;  %v906_v8 = vld [vmem:[#allocation2 + $0x270] sm:$0x80] }
 0x163   :  { %v1770_v57 = vsel %vm1642_vm3, %v1764_v27, %v1769_v54  ;;  %v2179_v17 = vmul.f32 %v4886_v33, %v2105_v41  ;;  %v1772_v4 = vsel %vm1642_vm3, %v1767_v25, %v1771_v63  ;;  %v2552_v51 = vadd.f32 %v2496_v14, %v2366_v39  ;;  %v1093_v27 = vld [vmem:[#allocation2 + $0x2a8] sm:$0x80]  ;;  %v1363_v41 = vld [vmem:[#allocation2 + $0x2d8] sm:$0x80]  ;;  %v2050_v1 = vld [vmem:[%s7063_s4 + $0x158] sm:$0x3f] }
 0x164   :  { %v1945_v32 = vadd.f32 %v1770_v57, %v820_v59  ;;  %v2554_v40 = vadd.f32 %v2498_v5, %v2368_v47  ;;  %v1946_v12 = vadd.f32 %v1772_v4, %v821_v0  ;;  %v2181_v31 = vmul.f32 %v4886_v33, %v2107_v21  ;;  %v7113_v47 = vld [vmem:[#allocation11_spill] sm:$0xff]  ;;  %v1094_v57 = vld [vmem:[#allocation2 + $0x2b0] sm:$0xff] }
 0x165   :  { %v2309_v48 = vmul.f32 %v4889_v36, %v2235_v29  ;;  %v2311_v60 = vmul.f32 %v4889_v36, %v2237_v34  ;;  %v2691_v25 = vrot.slane %v2552_v51, 1  ;;  %v2495_v26 = vmul.f32 %v4892_v6, %v2421_v2  ;;  %v1362_v4 = vld [vmem:[#allocation2 + $0x2d0] sm:$0x80] }
 0x166   :  { %2001 = vst [vmem:[%s7063_s4 + $0x190] sm:$0x3f] %v1945_v32  ;;  %v2692_v14 = vrot.slane %v2554_v40, 1  ;;  %v2497_v11 = vmul.f32 %v4892_v6, %v2423_v24  ;;  %2002 = vst.msk [vmem:[%s7063_s4 + $0x198] sm:$0x3f] %vm148_vm2, %v1946_v12  ;;  %v1009_v21 = vmul.f32 %v3901_v44, %v907_v16  ;;  %v1011_v29 = vmul.f32 %v5741_v49, %v3901_v44 }
 0x167   :  { %v2365_v37 = vadd.f32 %v2309_v48, %v2179_v17  ;;  %v2367_v5 = vadd.f32 %v2311_v60, %v2181_v31  ;;  %v1195_v22 = vmul.f32 %v3907_v46, %v1093_v27  ;;  %v1197_v59 = vmul.f32 %v3907_v46, %v1095_v42  ;;  %v1092_v49 = vld [vmem:[#allocation2 + $0x2a0] sm:$0x80]  ;;  %v2049_v16 = vld [vmem:[%s7063_s4 + $0x150] sm:$0x3f] }
 0x168   :  { %v2693_v62 = vsel %vm2627_vm5, %v2691_v25, %v2692_v14  ;;  %v1465_v54 = vmul.f32 %v3918_v56, %v1363_v41  ;;  %v1467_v34 = vmul.f32 %v3918_v56, %v7113_v47  ;;  %v2811_v24 = vsel %vm2064_vm6, %v2692_v14, 0.0  ;;  %v910_v41 = vld [vmem:[#allocation2 + $0x290] sm:$0x1f]  ;;  %v911_v25 = vld [vmem:[#allocation2 + $0x298] sm:$0x1f] }
 0x169   :  { %v2865_v0 = vadd.f32 %v2693_v62, %v2048_v9  ;;  %v2551_v63 = vadd.f32 %v2495_v26, %v2365_v37  ;;  %v2553_v39 = vadd.f32 %v2497_v11, %v2367_v5  ;;  %v1279_v17 = vadd.f32 %v1195_v22, %v1009_v21  ;;  %v1096_v9 = vld [vmem:[#allocation2 + $0x2c0] sm:$0x1f]  ;;  %v1366_v37 = vld [vmem:[#allocation2 + $0x2f0] sm:$0x1f]  ;;  %v1097_v5 = vld [vmem:[#allocation2 + $0x2c8] sm:$0x1f] }
 0x16a   :  { %v1281_v2 = vadd.f32 %v1197_v59, %v1011_v29  ;;  %v1008_v32 = vmul.f32 %v3898_v43, %v906_v8  ;;  %v2867_v12 = vadd.f32 %v2811_v24, %v2050_v1  ;;  %v1010_v31 = vmul.f32 %v5765_v30, %v3898_v43  ;;  %v823_v22 = vld [vmem:[%s7063_s4 + $0x1a8] sm:$0xff] }
 0x16b   :  { %2921 = vst.msk [vmem:[%s7063_s4 + $0x148] sm:$0xff] %vm18_vm0, %v2865_v0  ;;  %v2688_v51 = vrot.slane %v2551_v63, 1  ;;  %v2689_v40 = vrot.slane %v2553_v39, 1  ;;  %v1549_v48 = vadd.f32 %v1465_v54, %v1279_v17  ;;  %v1194_v27 = vmul.f32 %v3904_v45, %v1092_v49  ;;  %v2110_v63 = vld [vmem:[#allocation2 + $0x228] sm:$0xfe] }
 0x16c   :  { %v5902_v60 = vadd.f32 %v1467_v34, %v1281_v2  ;;  %v1196_v42 = vmul.f32 %v3904_v45, %v1094_v57  ;;  %2923 = vst.msk [vmem:[%s7063_s4 + $0x158] sm:$0x3f] %vm148_vm2, %v2867_v12  ;;  %v1464_v30 = vmul.f32 %v3915_v55, %v1362_v4  ;;  %v1466_v11 = vmul.f32 %v5651_v13, %v3915_v55  ;;  %v1367_v13 = vld [vmem:[#allocation2 + $0x2f8] sm:$0x1f] }
 0x16d   :  { %v2690_v14 = vsel %vm2627_vm5, %v2688_v51, %v2689_v40  ;;  %v2810_v26 = vsel %vm2064_vm6, %v2689_v40, 0.0  ;;  %v1776_v29 = vrot.slane %v1549_v48, 7  ;;  %v1278_v59 = vadd.f32 %v1194_v27, %v1008_v32  ;;  %v2112_v17 = vld [vmem:[#allocation2 + $0x238] sm:$0x7f] }
 0x16e   :  { %v5917_v21 = vadd.f32 %v2690_v14, %v5714_v19  ;;  %v1777_v8 = vrot.slane %v5902_v60, 7  ;;  %v2866_v62 = vadd.f32 %v2810_v26, %v2049_v16  ;;  %v1280_v54 = vadd.f32 %v1196_v42, %v1010_v31  ;;  %v2240_v2 = vld [vmem:[#allocation2 + $0x258] sm:$0xfe]  ;;  %v2426_v31 = vld [vmem:[#allocation2 + $0x288] sm:$0xfe] }
 0x16f   :  { %v1012_v1 = vmul.f32 %v3898_v43, %v910_v41  ;;  %v1198_v0 = vmul.f32 %v3904_v45, %v1096_v9  ;;  %v1468_v19 = vmul.f32 %v3915_v55, %v1366_v37  ;;  %v1013_v47 = vmul.f32 %v3901_v44, %v911_v25  ;;  %v2428_v41 = vld [vmem:[#allocation2 + $0x298] sm:$0x7f]  ;;  %v2109_v9 = vld [vmem:[#allocation2 + $0x220] sm:$0xfe]  ;;  %v824_v14 = vld [vmem:[%s7063_s4 + $0x1b0] sm:$0x3f] }
 0x170   :  { %v1778_v39 = vsel %vm1642_vm3, %v1776_v29, %v1777_v8  ;;  %2922 = vst [vmem:[%s7063_s4 + $0x150] sm:$0x3f] %v2866_v62  ;;  %v1199_v34 = vmul.f32 %v3907_v46, %v1097_v5  ;;  %v1548_v43 = vadd.f32 %v1464_v30, %v1278_v59  ;;  %v1550_v57 = vadd.f32 %v1466_v11, %v1280_v54  ;;  %v2242_v46 = vld [vmem:[#allocation2 + $0x268] sm:$0x7f]  ;;  %v2111_v11 = vld [vmem:[#allocation2 + $0x230] sm:$0x7f] }
 0x171   :  { %v1892_v49 = vsel %vm826_vm4, %v1778_v39, 0.0  ;;  %v1282_v45 = vadd.f32 %v1198_v0, %v1012_v1  ;;  %v1469_v55 = vmul.f32 %v3918_v56, %v1367_v13  ;;  %v2184_v44 = vmul.f32 %v4915_v35, %v2110_v63  ;;  %v2239_v1 = vld [vmem:[#allocation2 + $0x250] sm:$0xfe]  ;;  %v2241_v0 = vld [vmem:[#allocation2 + $0x260] sm:$0x7f] }
 0x172   :  { %v5937_v24 = vld [vmem:[%s7063_s4 + $0x148] sm:$0xff]  ;;  %v1948_v32 = vadd.f32 %v1892_v49, %v823_v22  ;;  %v1283_v4 = vadd.f32 %v1199_v34, %v1013_v47  ;;  %v1773_v40 = vrot.slane %v1548_v43, 7  ;;  %v1774_v16 = vrot.slane %v1550_v57, 7  ;;  %v2425_v13 = vld [vmem:[#allocation2 + $0x280] sm:$0xfe] }
 0x173   :  { %v3079_v51 = vsel %vm18_vm0, %v5937_v24, 0.0  ;;  %v1552_v12 = vadd.f32 %v1468_v19, %v1282_v45  ;;  %v5951_v56 = vld [vmem:[%s7063_s4 + $0x158] sm:$0x3f]  ;;  %v2186_v27 = vmul.f32 %v4915_v35, %v2112_v17  ;;  %v2314_v42 = vmul.f32 %v4922_v38, %v2240_v2  ;;  %v2427_v34 = vld [vmem:[#allocation2 + $0x290] sm:$0x7f] }
 0x174   :  { %v3080_v48 = vadd.f32 %v3079_v51, %v5856_v7  ;;  %2004 = vst.msk [vmem:[%s7063_s4 + $0x1a8] sm:$0xff] %vm18_vm0, %v1948_v32  ;;  %v1553_v60 = vadd.f32 %v1469_v55, %v1283_v4  ;;  %v5957_v7 = vadd.f32 %v5854_v18, %v5567_v61  ;;  %v1775_v25 = vsel %vm1642_vm3, %v1773_v40, %v1774_v16  ;;  %v825_v61 = vld [vmem:[%s7063_s4 + $0x1b8] sm:$0x3f]  ;;  %v2116_v43 = vld [vmem:[#allocation2 + $0x268] sm:$0x7f] }
 0x175   :  { %v1779_v26 = vrot.slane %v1552_v12, 7  ;;  %v2316_v30 = vmul.f32 %v4922_v38, %v2242_v46  ;;  %v3081_v37 = vsel %vm148_vm2, %v5951_v56, 0.0  ;;  %v1891_v5 = vsel %vm826_vm4, %v1775_v25, 0.0  ;;  %v2114_v49 = vld [vmem:[#allocation2 + $0x258] sm:$0xfe] }
 0x176   :  { %v1781_v18 = vrot.slane %v1553_v60, 7  ;;  %v2370_v29 = vadd.f32 %v2314_v42, %v2184_v44  ;;  %v5972_v62 = vadd.f32 %v1891_v5, %v5716_v53  ;;  %v2500_v54 = vmul.f32 %v4935_v15, %v2426_v31  ;;  %v2244_v2 = vld [vmem:[#allocation2 + $0x288] sm:$0xfe]  ;;  %v2246_v32 = vld [vmem:[#allocation2 + $0x298] sm:$0x7f] }
 0x177   :  { %v1780_v22 = vsel %vm1642_vm3, %v1774_v16, %v1779_v26  ;;  %v2372_v59 = vadd.f32 %v2316_v30, %v2186_v27  ;;  %v5976_v63 = vadd.f32 %v3081_v37, %v3080_v48  ;;  %v2502_v47 = vmul.f32 %v4935_v15, %v2428_v41  ;;  %v2430_v46 = vld [vmem:[#allocation2 + $0x2b8] sm:$0xfe]  ;;  %v2432_v51 = vld [vmem:[#allocation2 + $0x2c8] sm:$0x7f]  ;;  %v2113_v40 = vld [vmem:[#allocation2 + $0x250] sm:$0xfe] }
 0x178   :  { %v1949_v39 = vadd.f32 %v1780_v22, %v824_v14  ;;  %v1782_v19 = vsel %vm1642_vm3, %v1777_v8, %v1781_v18  ;;  %v2556_v57 = vadd.f32 %v2500_v54, %v2370_v29  ;;  %v2183_v45 = vmul.f32 %v4886_v33, %v2109_v9  ;;  %v2052_v60 = vld [vmem:[%s7063_s4 + $0x168] sm:$0xff]  ;;  %v2054_v9 = vld [vmem:[%s7063_s4 + $0x178] sm:$0x3f]  ;;  %v2243_v5 = vld [vmem:[#allocation2 + $0x280] sm:$0xfe] }
 0x179   :  { %v1950_v53 = vadd.f32 %v1782_v19, %v825_v61  ;;  %v2185_v17 = vmul.f32 %v4886_v33, %v2111_v11  ;;  %v2558_v4 = vadd.f32 %v2502_v47, %v2372_v59  ;;  %v2313_v8 = vmul.f32 %v4889_v36, %v2239_v1  ;;  %v2115_v11 = vld [vmem:[#allocation2 + $0x260] sm:$0x7f]  ;;  %v2245_v59 = vld [vmem:[#allocation2 + $0x290] sm:$0x7f] }
 0x17a   :  { %2005 = vst [vmem:[%s7063_s4 + $0x1b0] sm:$0x3f] %v1949_v39  ;;  %v2315_v55 = vmul.f32 %v4889_v36, %v2241_v0  ;;  %v2499_v44 = vmul.f32 %v4892_v6, %v2425_v13  ;;  %v2697_v16 = vrot.slane %v2556_v57, 1  ;;  %v2501_v12 = vmul.f32 %v4892_v6, %v2427_v34  ;;  %v2429_v54 = vld [vmem:[#allocation2 + $0x2b0] sm:$0xfe] }
 0x17b   :  { %2006 = vst.msk [vmem:[%s7063_s4 + $0x1b8] sm:$0x3f] %vm148_vm2, %v1950_v53  ;;  %v2188_v31 = vmul.f32 %v4915_v35, %v2114_v49  ;;  %v2190_v48 = vmul.f32 %v4915_v35, %v2116_v43  ;;  %v2698_v27 = vrot.slane %v2558_v4, 1  ;;  %v2369_v42 = vadd.f32 %v2313_v8, %v2183_v45  ;;  %v2431_v19 = vld [vmem:[#allocation2 + $0x2c0] sm:$0x7f] }
 0x17c   :  { %v2371_v41 = vadd.f32 %v2315_v55, %v2185_v17  ;;  %v2318_v25 = vmul.f32 %v4922_v38, %v2244_v2  ;;  %v2320_v14 = vmul.f32 %v4922_v38, %v2246_v32  ;;  %v2504_v26 = vmul.f32 %v4935_v15, %v2430_v46  ;;  %v2053_v49 = vld [vmem:[%s7063_s4 + $0x170] sm:$0x3f]  ;;  %v2118_v32 = vld [vmem:[#allocation2 + $0x288] sm:$0xfe]  ;;  %v2120_v4 = vld [vmem:[#allocation2 + $0x298] sm:$0x7f] }
 0x17d   :  { %v2506_v30 = vmul.f32 %v4935_v15, %v2432_v51  ;;  %v2187_v37 = vmul.f32 %v4886_v33, %v2113_v40  ;;  %v2699_v61 = vsel %vm2627_vm5, %v2697_v16, %v2698_v27  ;;  %v2555_v18 = vadd.f32 %v2499_v44, %v2369_v42  ;;  %v2248_v51 = vld [vmem:[#allocation2 + $0x2b8] sm:$0xfe]  ;;  %v2250_v40 = vld [vmem:[#allocation2 + $0x2c8] sm:$0x7f] }
 0x17e   :  { %v2557_v29 = vadd.f32 %v2501_v12, %v2371_v41  ;;  %v2815_v22 = vsel %vm2064_vm6, %v2698_v27, 0.0  ;;  %v2869_v1 = vadd.f32 %v2699_v61, %v2052_v60  ;;  %v2374_v13 = vadd.f32 %v2318_v25, %v2188_v31  ;;  %v2056_v31 = vld [vmem:[%s7063_s4 + $0x188] sm:$0xff]  ;;  %v2058_v27 = vld [vmem:[%s7063_s4 + $0x198] sm:$0x3f]  ;;  %v2119_v61 = vld [vmem:[#allocation2 + $0x290] sm:$0x7f] }
 0x17f   :  { %v2871_v0 = vadd.f32 %v2815_v22, %v2054_v9  ;;  %v2376_v39 = vadd.f32 %v2320_v14, %v2190_v48  ;;  %v2694_v47 = vrot.slane %v2555_v18, 1  ;;  %v2189_v43 = vmul.f32 %v4886_v33, %v2115_v11  ;;  %v2434_v14 = vld [vmem:[#allocation2 + $0x2e8] sm:$0xfe]  ;;  %v2247_v18 = vld [vmem:[#allocation2 + $0x2b0] sm:$0xfe] }
 0x180   :  { %v2695_v34 = vrot.slane %v2557_v29, 1  ;;  %v2317_v53 = vmul.f32 %v4889_v36, %v2243_v5  ;;  %2925 = vst.msk [vmem:[%s7063_s4 + $0x168] sm:$0xff] %vm18_vm0, %v2869_v1  ;;  %v2560_v57 = vadd.f32 %v2504_v26, %v2374_v13  ;;  %v2319_v17 = vmul.f32 %v4889_v36, %v2245_v59  ;;  %v2117_v26 = vld [vmem:[#allocation2 + $0x280] sm:$0xfe] }
 0x181   :  { %2927 = vst.msk [vmem:[%s7063_s4 + $0x178] sm:$0x3f] %vm148_vm2, %v2871_v0  ;;  %v2562_v45 = vadd.f32 %v2506_v30, %v2376_v39  ;;  %v2503_v2 = vmul.f32 %v4892_v6, %v2429_v54  ;;  %v2505_v46 = vmul.f32 %v4892_v6, %v2431_v19  ;;  %v2192_v9 = vmul.f32 %v4915_v35, %v2118_v32  ;;  %v2249_v39 = vld [vmem:[#allocation2 + $0x2c0] sm:$0x7f] }
 0x182   :  { %v2696_v8 = vsel %vm2627_vm5, %v2694_v47, %v2695_v34  ;;  %v2814_v55 = vsel %vm2064_vm6, %v2695_v34, 0.0  ;;  %v2373_v44 = vadd.f32 %v2317_v53, %v2187_v37  ;;  %v2703_v48 = vrot.slane %v2560_v57, 1  ;;  %v2057_v47 = vld [vmem:[%s7063_s4 + $0x190] sm:$0x3f] }
 0x183   :  { %v6029_v16 = vadd.f32 %v2696_v8, %v5957_v7  ;;  %v2870_v12 = vadd.f32 %v2814_v55, %v2053_v49  ;;  %v2704_v60 = vrot.slane %v2562_v45, 1  ;;  %v2375_v42 = vadd.f32 %v2319_v17, %v2189_v43  ;;  %v2436_v7 = vld [vmem:[#allocation2 + $0x2f8] sm:$0x7f]  ;;  %v2433_v17 = vld [vmem:[#allocation2 + $0x2e0] sm:$0xfe] }
 0x184   :  { %v2559_v41 = vadd.f32 %v2503_v2, %v2373_v44  ;;  %v2194_v25 = vmul.f32 %v4915_v35, %v2120_v4  ;;  %v2322_v37 = vmul.f32 %v4922_v38, %v2248_v51  ;;  %v2324_v5 = vmul.f32 %v4922_v38, %v2250_v40  ;;  %v2435_v55 = vld [vmem:[#allocation2 + $0x2f0] sm:$0x7f] }
 0x185   :  { %2926 = vst [vmem:[%s7063_s4 + $0x170] sm:$0x3f] %v2870_v12  ;;  %v2705_v30 = vsel %vm2627_vm5, %v2703_v48, %v2704_v60  ;;  %v2819_v11 = vsel %vm2064_vm6, %v2704_v60, 0.0  ;;  %v2561_v35 = vadd.f32 %v2505_v46, %v2375_v42  ;;  %v2508_v0 = vmul.f32 %v4935_v15, %v2434_v14  ;;  %v6083_v44 = vld [vmem:[%s7063_s4 + $0x10] sm:$0x3f] }
 0x186   :  { %v2873_v29 = vadd.f32 %v2705_v30, %v2056_v31  ;;  %v2700_v22 = vrot.slane %v2559_v41, 1  ;;  %v2875_v59 = vadd.f32 %v2819_v11, %v2058_v27  ;;  %v2378_v54 = vadd.f32 %v2322_v37, %v2192_v9  ;;  %v2062_v31 = vld [vmem:[%s7063_s4 + $0x1b8] sm:$0x3f]  ;;  %v6107_v30 = vld [vmem:[%s7063_s4] sm:$0xff] }
 0x187   :  { %v2380_v1 = vadd.f32 %v2324_v5, %v2194_v25  ;;  %v2510_v13 = vmul.f32 %v4935_v15, %v2436_v7  ;;  %v6052_v19 = vld [vmem:[%s7063_s4 + $0x168] sm:$0xff]  ;;  %v2701_v38 = vrot.slane %v2561_v35, 1  ;;  %v2191_v15 = vmul.f32 %v4886_v33, %v2117_v26 }
 0x188   :  { %2929 = vst.msk [vmem:[%s7063_s4 + $0x188] sm:$0xff] %vm18_vm0, %v2873_v29  ;;  %v2193_v34 = vmul.f32 %v4886_v33, %v2119_v61  ;;  %v2321_v49 = vmul.f32 %v4889_v36, %v2247_v18  ;;  %v3083_v43 = vsel %vm18_vm0, %v6052_v19, 0.0  ;;  %v6073_v53 = vld [vmem:[%s7063_s4 + $0x178] sm:$0x3f]  ;;  %v2564_v57 = vadd.f32 %v2508_v0, %v2378_v54  ;;  %v6119_v61 = vld [vmem:[%s7063_s4 + $0x30] sm:$0x3f] }
 0x189   :  { %2931 = vst.msk [vmem:[%s7063_s4 + $0x198] sm:$0x3f] %vm148_vm2, %v2875_v59  ;;  %v2566_v45 = vadd.f32 %v2510_v13, %v2380_v1  ;;  %v3084_v2 = vadd.f32 %v3083_v43, %v5976_v63  ;;  %v2702_v32 = vsel %vm2627_vm5, %v2700_v22, %v2701_v38  ;;  %v2818_v4 = vsel %vm2064_vm6, %v2701_v38, 0.0  ;;  %v2060_v63 = vld [vmem:[%s7063_s4 + $0x1a8] sm:$0xff]  ;;  %v6135_v22 = vld [vmem:[%s7063_s4 + $0x20] sm:$0xff] }
 0x18a   :  { %v2323_v8 = vmul.f32 %v4889_v36, %v2249_v39  ;;  %v6086_v46 = vadd.f32 %v2702_v32, %v5846_v10  ;;  %v2874_v51 = vadd.f32 %v2818_v4, %v2057_v47  ;;  %v2709_v40 = vrot.slane %v2564_v57, 1  ;;  %v2061_v0 = vld [vmem:[%s7063_s4 + $0x1b0] sm:$0x3f]  ;;  %v6159_v57 = vld [vmem:[%s7063_s4 + $0x40] sm:$0xff] }
 0x18b   :  { %v2710_v12 = vrot.slane %v2566_v45, 1  ;;  %v3085_v48 = vsel %vm148_vm2, %v6073_v53, 0.0  ;;  %v2377_v60 = vadd.f32 %v2321_v49, %v2191_v15  ;;  %v2507_v42 = vmul.f32 %v4892_v6, %v2433_v17  ;;  %v6164_v45 = vld [vmem:[%s7063_s4 + $0x50] sm:$0x3f] }
 0x18c   :  { %v2379_v27 = vadd.f32 %v2323_v8, %v2193_v34  ;;  %v3086_v10 = vadd.f32 %v3085_v48, %v3084_v2  ;;  %2930 = vst [vmem:[%s7063_s4 + $0x190] sm:$0x3f] %v2874_v51  ;;  %v2509_v9 = vmul.f32 %v4892_v6, %v2435_v55  ;;  %v2993_v11 = vsel %vm2992_vm7, %v6083_v44, 0.0  ;;  %v6194_v48 = vld [vmem:[%s7063_s4 + $0x70] sm:$0x3f] }
 0x18d   :  { %v2711_v41 = vsel %vm2627_vm5, %v2709_v40, %v2710_v12  ;;  %v2823_v25 = vsel %vm2064_vm6, %v2710_v12, 0.0  ;;  %v2563_v7 = vadd.f32 %v2507_v42, %v2377_v60  ;;  %v2994_v18 = vadd.f32 %v2993_v11, %v6107_v30  ;;  %v6189_v40 = vld [vmem:[%s7063_s4 + $0x60] sm:$0xff]  ;;  %v2089_v12 = vld [vmem:[#allocation2 + $0x130] sm:$0xfe] }
 0x18e   :  { %v2877_v14 = vadd.f32 %v2711_v41, %v2060_v63  ;;  %v2879_v26 = vadd.f32 %v2823_v25, %v2062_v31  ;;  %v2565_v5 = vadd.f32 %v2509_v9, %v2379_v27  ;;  %v2996_v39 = vsel %vm2992_vm7, %v6119_v61, 0.0  ;;  %v2219_v31 = vld [vmem:[#allocation2 + $0x160] sm:$0xfe]  ;;  %v2405_v25 = vld [vmem:[#allocation2 + $0x190] sm:$0xfe] }
 0x18f   :  { %v6114_v37 = vld [vmem:[%s7063_s4 + $0x188] sm:$0xff]  ;;  %v2706_v35 = vrot.slane %v2563_v7, 1  ;;  %v2995_v13 = vadd.f32 %v2994_v18, %v6135_v22  ;;  %v2999_v32 = vsel %vm2992_vm7, %v6164_v45, 0.0  ;;  %v2163_v42 = vmul.f32 %v4886_v33, %v2089_v12  ;;  %v6205_v18 = vld [vmem:[%s7063_s4 + $0x80] sm:$0xff] }
 0x190   :  { %v3087_v29 = vsel %vm18_vm0, %v6114_v37, 0.0  ;;  %2933 = vst.msk [vmem:[%s7063_s4 + $0x1a8] sm:$0xff] %vm18_vm0, %v2877_v14  ;;  %v6140_v54 = vld [vmem:[%s7063_s4 + $0x198] sm:$0x3f]  ;;  %v2707_v1 = vrot.slane %v2565_v5, 1  ;;  %v3002_v9 = vsel %vm2992_vm7, %v6194_v48, 0.0  ;;  %v2479_v11 = vmul.f32 %v4892_v6, %v2405_v25 }
 0x191   :  { %2935 = vst.msk [vmem:[%s7063_s4 + $0x1b8] sm:$0x3f] %vm148_vm2, %v2879_v26  ;;  %v3088_v59 = vadd.f32 %v3087_v29, %v3086_v10  ;;  %v2997_v15 = vadd.f32 %v2996_v39, %v2995_v13  ;;  %v3089_v34 = vsel %vm148_vm2, %v6140_v54, 0.0  ;;  %v2293_v10 = vmul.f32 %v4889_v36, %v2219_v31  ;;  %v6210_v29 = vld [vmem:[%s7063_s4 + $0x90] sm:$0x3f] }
 0x192   :  { %v2708_v38 = vsel %vm2627_vm5, %v2706_v35, %v2707_v1  ;;  %v2822_v47 = vsel %vm2064_vm6, %v2707_v1, 0.0  ;;  %v2223_v1 = vld [vmem:[#allocation2 + $0x190] sm:$0xfe]  ;;  %v3005_v39 = vsel %vm2992_vm7, %v6210_v29, 0.0 }
 0x193   :  { %v6154_v49 = vadd.f32 %v2708_v38, %v5972_v62  ;;  %v2878_v43 = vadd.f32 %v2822_v47, %v2061_v0  ;;  %v3090_v52 = vadd.f32 %v3089_v34, %v3088_v59  ;;  %v2998_v17 = vadd.f32 %v2997_v15, %v6159_v57  ;;  %v2093_v59 = vld [vmem:[#allocation2 + $0x160] sm:$0xfe] }
 0x194   :  { %v2349_v26 = vadd.f32 %v2293_v10, %v2163_v42  ;;  %v2167_v38 = vmul.f32 %v4886_v33, %v2093_v59  ;;  %v2297_v47 = vmul.f32 %v4889_v36, %v2223_v1  ;;  %v2409_v15 = vld [vmem:[#allocation2 + $0x1c0] sm:$0xfe]  ;;  %v7115_v10 = vld [vmem:[#allocation5_spill] sm:$0xff] }
 0x195   :  { %7114 = vst [vmem:[#allocation8_spill] sm:$0xff] %v6154_v49  ;;  %2934 = vst [vmem:[%s7063_s4 + $0x1b0] sm:$0x3f] %v2878_v43  ;;  %v3000_v8 = vadd.f32 %v2999_v32, %v2998_v17  ;;  %v2097_v43 = vld [vmem:[#allocation2 + $0x190] sm:$0xfe]  ;;  %v2031_v42 = vld [vmem:[%s7063_s4 + $0xc0] sm:$0xff] }
 0x196   :  { %v2535_v13 = vadd.f32 %v2479_v11, %v2349_v26  ;;  %v6245_v26 = vld [vmem:[%s7063_s4 + $0x8] sm:$0xff] }
 0x197   :  { %v6173_v62 = vld [vmem:[%s7063_s4 + $0x1a8] sm:$0xff]  ;;  %v3001_v60 = vadd.f32 %v3000_v8, %v6189_v40  ;;  %v6221_v8 = vld [vmem:[%s7063_s4 + $0xa0] sm:$0xff] }
 0x198   :  { %v6178_v2 = vld [vmem:[%s7063_s4 + $0x1b8] sm:$0x3f]  ;;  %v3091_v4 = vsel %vm18_vm0, %v6173_v62, 0.0  ;;  %v2664_v32 = vrot.slane %v2535_v13, 1 }
 0x199   :  { %v3092_v55 = vadd.f32 %v3091_v4, %v3090_v52  ;;  %v3093_v51 = vsel %vm148_vm2, %v6178_v2, 0.0  ;;  %v3003_v14 = vadd.f32 %v3002_v9, %v3001_v60  ;;  %v2227_v52 = vld [vmem:[#allocation2 + $0x1c0] sm:$0xfe]  ;;  %v2483_v4 = vmul.f32 %v4892_v6, %v2409_v15  ;;  %v2413_v60 = vld [vmem:[#allocation2 + $0x1f0] sm:$0xfe] }
 0x19a   :  { %v2301_v12 = vmul.f32 %v4889_v36, %v2227_v52  ;;  %v2487_v36 = vmul.f32 %v4892_v6, %v2413_v60  ;;  %v6261_v6 = vld [vmem:[%s7063_s4 + $0x28] sm:$0xff] }
 0x19b   :  { %v3094_v63 = vadd.f32 %v3093_v51, %v3092_v55  ;;  %v3004_v35 = vadd.f32 %v3003_v14, %v6205_v18  ;;  %v6226_v55 = vld [vmem:[%s7063_s4 + $0xb0] sm:$0x3f]  ;;  %v2353_v51 = vadd.f32 %v2297_v47, %v2167_v38  ;;  %v6274_v47 = vld [vmem:[%s7063_s4 + $0x38] sm:$0x3f]  ;;  %v6281_v52 = vld [vmem:[%s7063_s4 + $0x48] sm:$0xff] }
 0x19c   :  { %v3008_v25 = vsel %vm2992_vm7, %v6226_v55, 0.0 }
 0x19d   :  { %v3095_v27 = vrot.slane %v3094_v63, 4  ;;  %v3006_v34 = vadd.f32 %v3005_v39, %v3004_v35  ;;  %v2539_v14 = vadd.f32 %v2483_v4, %v2353_v51  ;;  %v2035_v51 = vld [vmem:[%s7063_s4 + $0xe0] sm:$0xff] }
 0x19f   :  { %v3096_v41 = vadd.f32 %v3095_v27, %v3094_v63  ;;  %v2171_v63 = vmul.f32 %v4886_v33, %v2097_v43  ;;  %v3007_v31 = vadd.f32 %v3006_v34, %v6221_v8  ;;  %v2670_v13 = vrot.slane %v2539_v14, 1 }
 0x1a1   :  { %v3097_v7 = vrot.slane %v3096_v41, 2  ;;  %v2357_v33 = vadd.f32 %v2301_v12, %v2171_v63  ;;  %v7117_v63 = vld [vmem:[#allocation10_spill] sm:$0xff] }
 0x1a2   :  { %v7118_v12 = vrot.slane %v7117_v63, 1  ;;  %v6333_v63 = vld [vmem:[%s7063_s4 + $0x110] sm:$0x3f] }
 0x1a3   :  { %v3098_v5 = vadd.f32 %v3097_v7, %v3096_v41  ;;  %v7116_v41 = vrot.slane %v7115_v10, 1  ;;  %v3009_v7 = vadd.f32 %v3008_v25, %v3007_v31  ;;  %v2543_v39 = vadd.f32 %v2487_v36, %v2357_v33  ;;  %v6296_v10 = vld [vmem:[%s7063_s4 + $0x58] sm:$0x3f] }
 0x1a4   :  { %v2672_v31 = vsel %vm2627_vm5, %v2670_v13, %v7118_v12  ;;  %v6311_v13 = vld [vmem:[%s7063_s4 + $0xf0] sm:$0x3f]  ;;  %v6338_v12 = vld [vmem:[%s7063_s4 + $0x78] sm:$0x3f] }
 0x1a5   :  { %v3099_v0 = vrot.slane %v3098_v5, 1  ;;  %v2666_v9 = vsel %vm2627_vm5, %v2664_v32, %v7116_v41  ;;  %v2676_v60 = vrot.slane %v2543_v39, 1  ;;  %v6302_v36 = vadd.f32 %v2672_v31, %v2035_v51  ;;  %v2039_v39 = vld [vmem:[%s7063_s4 + $0x100] sm:$0xff]  ;;  %7120 = vst [vmem:[#allocation6_spill] sm:$0xff] %v6338_v12 }
 0x1a6   :  { %v6256_v59 = vadd.f32 %v2666_v9, %v2031_v42 }
 0x1a7   :  { %v3100_v17 = vadd.f32 %v3099_v0, %v3098_v5  ;;  %v6252_v5 = vld [vmem:[%s7063_s4 + $0x18] sm:$0x3f]  ;;  %v6268_v0 = vld [vmem:[%s7063_s4 + $0xd0] sm:$0x3f] }
 0x1a8   :  { %v3010_v38 = vadd.f32 %v3009_v7, %v6256_v59  ;;  %v3011_v4 = vsel %vm2992_vm7, %v6268_v0, 0.0 }
 0x1a9   :  { %v6231_v27 = vmul.f32 0.0051020407, %v3100_v17 }
 0x1aa   :  { %v3012_v42 = vadd.f32 %v3011_v4, %v3010_v38  ;;  %v6319_v38 = vld [vmem:[%s7063_s4 + $0x68] sm:$0xff] }
 0x1ab   :  { %v3104_v11 = vsub.f32 %v6245_v26, %v6231_v27  ;;  %v3106_v35 = vsub.f32 %v6252_v5, %v6231_v27  ;;  %v3108_v1 = vsub.f32 %v6261_v6, %v6231_v27  ;;  %v3110_v15 = vsub.f32 %v6274_v47, %v6231_v27  ;;  %7119 = vst [vmem:[#allocation7_spill] sm:$0xff] %v6319_v38 }
 0x1ac   :  { %v3112_v17 = vsub.f32 %v6281_v52, %v6231_v27  ;;  %v3114_v41 = vsub.f32 %v6296_v10, %v6231_v27  ;;  %v3116_v3 = vsub.f32 %v6319_v38, %v6231_v27  ;;  %v3118_v31 = vsub.f32 %v6338_v12, %v6231_v27 }
 0x1ad   :  { %v3160_v34 = vmul.f32 %v3104_v11, %v3104_v11  ;;  %v3162_v43 = vmul.f32 %v3106_v35, %v3106_v35  ;;  %v3164_v32 = vmul.f32 %v3108_v1, %v3108_v1  ;;  %v3166_v9 = vmul.f32 %v3110_v15, %v3110_v15 }
 0x1ae   :  { %v3168_v7 = vmul.f32 %v3112_v17, %v3112_v17  ;;  %v2678_v35 = vsel %vm2627_vm5, %v2676_v60, %v2677_v28  ;;  %v3170_v15 = vmul.f32 %v3114_v41, %v3114_v41  ;;  %v3172_v60 = vmul.f32 %v3116_v3, %v3116_v3 }
 0x1af   :  { %v3262_v25 = vsel %vm18_vm0, %v3160_v34, 0.0  ;;  %v3263_v14 = vsel %vm148_vm2, %v3162_v43, 0.0  ;;  %v3265_v11 = vsel %vm18_vm0, %v3164_v32, 0.0  ;;  %v3267_v28 = vsel %vm148_vm2, %v3166_v9, 0.0 }
 0x1b0   :  { %v3264_v33 = vadd.f32 %v3263_v14, %v3262_v25  ;;  %v3013_v34 = vadd.f32 %v3012_v42, %v6302_v36  ;;  %v3269_v17 = vsel %vm18_vm0, %v3168_v7, 0.0  ;;  %v3014_v32 = vsel %vm2992_vm7, %v6311_v13, 0.0  ;;  %v6354_v7 = vld [vmem:[%s7063_s4 + $0x88] sm:$0xff] }
 0x1b1   :  { %v6328_v4 = vadd.f32 %v2678_v35, %v2039_v39  ;;  %v3271_v42 = vsel %vm148_vm2, %v3170_v15, 0.0  ;;  %v3017_v14 = vsel %vm2992_vm7, %v6333_v63, 0.0  ;;  %7121 = vst [vmem:[#allocation9_spill] sm:$0xff] %v6354_v7  ;;  %v3174_v35 = vmul.f32 %v3118_v31, %v3118_v31 }
 0x1b2   :  { %v3266_v1 = vadd.f32 %v3265_v11, %v3264_v33  ;;  %v3015_v41 = vadd.f32 %v3014_v32, %v3013_v34  ;;  %v6349_v33 = vld [vmem:[%s7063_s4 + $0x130] sm:$0x3f]  ;;  %v3120_v11 = vsub.f32 %v6354_v7, %v6231_v27 }
 0x1b3   :  { %v6365_v34 = vld [vmem:[%s7063_s4 + $0x150] sm:$0x3f] }
 0x1b4   :  { %v3268_v43 = vadd.f32 %v3267_v28, %v3266_v1  ;;  %v3016_v25 = vadd.f32 %v3015_v41, %v6328_v4  ;;  %v3273_v1 = vsel %vm18_vm0, %v3172_v60, 0.0  ;;  %v3020_v28 = vsel %vm2992_vm7, %v6349_v33, 0.0 }
 0x1b5   :  { %v3176_v32 = vmul.f32 %v3120_v11, %v3120_v11  ;;  %v3023_v41 = vsel %vm2992_vm7, %v6365_v34, 0.0 }
 0x1b6   :  { %v3270_v51 = vadd.f32 %v3269_v17, %v3268_v43  ;;  %v3018_v39 = vadd.f32 %v3017_v14, %v3016_v25  ;;  %v6370_v43 = vld [vmem:[%s7063_s4 + $0x98] sm:$0x3f]  ;;  %v6386_v25 = vld [vmem:[%s7063_s4 + $0xa8] sm:$0xff] }
 0x1b7   :  { %7122 = vst [vmem:[#allocation11_spill] sm:$0xff] %v6370_v43  ;;  %v3122_v17 = vsub.f32 %v6370_v43, %v6231_v27  ;;  %7123 = vst [vmem:[#allocation5_spill] sm:$0xff] %v6386_v25  ;;  %v3124_v14 = vsub.f32 %v6386_v25, %v6231_v27  ;;  %v6418_v25 = vld [vmem:[%s7063_s4 + $0xc8] sm:$0xff] }
 0x1b8   :  { %v3272_v9 = vadd.f32 %v3271_v42, %v3270_v51  ;;  %v3019_v15 = vadd.f32 %v3018_v39, %v5788_v23  ;;  %v3275_v51 = vsel %vm148_vm2, %v3174_v35, 0.0  ;;  %v3277_v35 = vsel %vm18_vm0, %v3176_v32, 0.0  ;;  %7126 = vst [vmem:[#allocation13_spill] sm:$0xff] %v6418_v25 }
 0x1b9   :  { %v3178_v11 = vmul.f32 %v3122_v17, %v3122_v17  ;;  %v3180_v32 = vmul.f32 %v3124_v14, %v3124_v14  ;;  %v3128_v14 = vsub.f32 %v6418_v25, %v6231_v27 }
 0x1ba   :  { %v3274_v3 = vadd.f32 %v3273_v1, %v3272_v9  ;;  %v3021_v31 = vadd.f32 %v3020_v28, %v3019_v15  ;;  %v6381_v9 = vld [vmem:[%s7063_s4 + $0x170] sm:$0x3f] }
 0x1bb   :  { %v3026_v15 = vsel %vm2992_vm7, %v6381_v9, 0.0  ;;  %v6397_v28 = vld [vmem:[%s7063_s4 + $0x190] sm:$0x3f]  ;;  %v3184_v7 = vmul.f32 %v3128_v14, %v3128_v14  ;;  %v6445_v14 = vld [vmem:[%s7063_s4 + $0xf8] sm:$0x3f] }
 0x1bc   :  { %v3276_v60 = vadd.f32 %v3275_v51, %v3274_v3  ;;  %v3022_v42 = vadd.f32 %v3021_v31, %v5917_v21  ;;  %v6402_v51 = vld [vmem:[%s7063_s4 + $0xb8] sm:$0x3f]  ;;  %v3279_v31 = vsel %vm148_vm2, %v3178_v11, 0.0  ;;  %7129 = vst [vmem:[#allocation16_spill] sm:$0xff] %v6445_v14 }
 0x1bd   :  { %7124 = vst [vmem:[#allocation10_spill] sm:$0xff] %v6402_v51  ;;  %v3126_v17 = vsub.f32 %v6402_v51, %v6231_v27  ;;  %v6429_v51 = vld [vmem:[%s7063_s4 + $0xd8] sm:$0x3f] }
 0x1be   :  { %v3024_v1 = vadd.f32 %v3023_v41, %v3022_v42  ;;  %v3278_v39 = vadd.f32 %v3277_v35, %v3276_v60  ;;  %v3029_v35 = vsel %vm2992_vm7, %v6397_v28, 0.0  ;;  %7127 = vst [vmem:[#allocation14_spill] sm:$0xff] %v6429_v51  ;;  %v3130_v43 = vsub.f32 %v6429_v51, %v6231_v27 }
 0x1bf   :  { %v3182_v11 = vmul.f32 %v3126_v17, %v3126_v17 }
 0x1c0   :  { %v3025_v3 = vadd.f32 %v3024_v1, %v6029_v16  ;;  %v3280_v42 = vadd.f32 %v3279_v31, %v3278_v39  ;;  %v6413_v1 = vld [vmem:[%s7063_s4 + $0x1b0] sm:$0x3f]  ;;  %v3281_v39 = vsel %vm18_vm0, %v3180_v32, 0.0 }
 0x1c1   :  { %7125 = vst [vmem:[#allocation12_spill] sm:$0xff] %v6413_v1  ;;  %v3283_v17 = vsel %vm148_vm2, %v3182_v11, 0.0  ;;  %v3134_v11 = vsub.f32 %v6445_v14, %v6231_v27  ;;  %v3142_v14 = vsub.f32 %v5833_v50, %v6231_v27 }
 0x1c2   :  { %v3027_v60 = vadd.f32 %v3026_v15, %v3025_v3  ;;  %v3282_v15 = vadd.f32 %v3281_v39, %v3280_v42  ;;  %v6437_v42 = vld [vmem:[%s7063_s4 + $0xe8] sm:$0xff]  ;;  %v3186_v39 = vmul.f32 %v3130_v43, %v3130_v43 }
 0x1c3   :  { %7128 = vst [vmem:[#allocation15_spill] sm:$0xff] %v6437_v42 }
 0x1c4   :  { %v3028_v41 = vadd.f32 %v3027_v60, %v6086_v46  ;;  %v3032_v60 = vsel %vm2992_vm7, %v6413_v1, 0.0  ;;  %v3284_v32 = vadd.f32 %v3283_v17, %v3282_v15 }
 0x1c6   :  { %v3030_v3 = vadd.f32 %v3029_v35, %v3028_v41  ;;  %v3132_v35 = vsub.f32 %v6437_v42, %v6231_v27 }
 0x1c8   :  { %v3031_v31 = vadd.f32 %v3030_v3, %v6154_v49  ;;  %v3285_v3 = vsel %vm18_vm0, %v3184_v7, 0.0  ;;  %v3188_v15 = vmul.f32 %v3132_v35, %v3132_v35  ;;  %v6453_v7 = vld [vmem:[%s7063_s4 + $0x108] sm:$0xff]  ;;  %v6461_v35 = vld [vmem:[%s7063_s4 + $0x118] sm:$0x3f] }
 0x1c9   :  { %v3286_v38 = vadd.f32 %v3285_v3, %v3284_v32  ;;  %7130 = vst [vmem:[#allocation17_spill] sm:$0xff] %v6453_v7  ;;  %v3136_v43 = vsub.f32 %v6453_v7, %v6231_v27  ;;  %7131 = vst [vmem:[#allocation18_spill] sm:$0xff] %v6461_v35 }
 0x1ca   :  { %v3033_v25 = vadd.f32 %v3032_v60, %v3031_v31  ;;  %v3287_v31 = vsel %vm148_vm2, %v3186_v39, 0.0  ;;  %v3289_v32 = vsel %vm18_vm0, %v3188_v15, 0.0 }
 0x1cb   :  { %v3288_v17 = vadd.f32 %v3287_v31, %v3286_v38  ;;  %v3138_v38 = vsub.f32 %v6461_v35, %v6231_v27 }
 0x1cc   :  { %v3034_v41 = vrot.slane %v3033_v25, 4 }
 0x1cd   :  { %v3290_v3 = vadd.f32 %v3289_v32, %v3288_v17  ;;  %v3194_v7 = vmul.f32 %v3138_v38, %v3138_v38 }
 0x1ce   :  { %v3035_v12 = vadd.f32 %v3034_v41, %v3033_v25  ;;  %v3190_v25 = vmul.f32 %v3134_v11, %v3134_v11  ;;  %v3140_v11 = vsub.f32 %v5819_v58, %v6231_v27  ;;  %v3144_v58 = vsub.f32 %v5937_v24, %v6231_v27 }
 0x1cf   :  { %v3295_v35 = vsel %vm148_vm2, %v3194_v7, 0.0 }
 0x1d0   :  { %v3036_v51 = vrot.slane %v3035_v12, 2  ;;  %v3196_v42 = vmul.f32 %v3140_v11, %v3140_v11 }
 0x1d2   :  { %v3037_v60 = vadd.f32 %v3036_v51, %v3035_v12  ;;  %v3192_v12 = vmul.f32 %v3136_v43, %v3136_v43  ;;  %v3291_v51 = vsel %vm148_vm2, %v3190_v25, 0.0 }
 0x1d3   :  { %v3292_v31 = vadd.f32 %v3291_v51, %v3290_v3  ;;  %v3297_v3 = vsel %vm18_vm0, %v3196_v42, 0.0 }
 0x1d4   :  { %v3038_v41 = vrot.slane %v3037_v60, 1  ;;  %v3293_v15 = vsel %vm18_vm0, %v3192_v12, 0.0 }
 0x1d5   :  { %v3294_v32 = vadd.f32 %v3293_v15, %v3292_v31 }
 0x1d6   :  { %v3039_v39 = vadd.f32 %v3038_v41, %v3037_v60  ;;  %v3198_v41 = vmul.f32 %v3142_v14, %v3142_v14 }
 0x1d7   :  { %v3296_v60 = vadd.f32 %v3295_v35, %v3294_v32  ;;  %v3146_v35 = vsub.f32 %v5951_v56, %v6231_v27 }
 0x1d8   :  { %v6469_v17 = vmul.f32 0.0051020407, %v3039_v39  ;;  %v3200_v39 = vmul.f32 %v3144_v58, %v3144_v58  ;;  %v3299_v31 = vsel %vm148_vm2, %v3198_v41, 0.0 }
 0x1d9   :  { %v3298_v12 = vadd.f32 %v3297_v3, %v3296_v60  ;;  %v3148_v60 = vsub.f32 %v6052_v19, %v6231_v27 }
 0x1da   :  { %v3105_v43 = vsub.f32 %v6083_v44, %v6469_v17  ;;  %v3103_v25 = vsub.f32 %v6107_v30, %v6469_v17  ;;  %v3109_v38 = vsub.f32 %v6119_v61, %v6469_v17  ;;  %v3107_v7 = vsub.f32 %v6135_v22, %v6469_v17 }
 0x1db   :  { %v3113_v24 = vsub.f32 %v6164_v45, %v6469_v17  ;;  %v3300_v11 = vadd.f32 %v3299_v31, %v3298_v12  ;;  %v3111_v15 = vsub.f32 %v6159_v57, %v6469_v17  ;;  %v3301_v58 = vsel %vm18_vm0, %v3200_v39, 0.0 }
 0x1dc   :  { %v3161_v50 = vmul.f32 %v3105_v43, %v3105_v43  ;;  %v3159_v51 = vmul.f32 %v3103_v25, %v3103_v25  ;;  %v3165_v14 = vmul.f32 %v3109_v38, %v3109_v38  ;;  %v3163_v32 = vmul.f32 %v3107_v7, %v3107_v7 }
 0x1dd   :  { %v3202_v25 = vmul.f32 %v3146_v35, %v3146_v35  ;;  %v3117_v41 = vsub.f32 %v6194_v48, %v6469_v17  ;;  %v3169_v3 = vmul.f32 %v3113_v24, %v3113_v24  ;;  %v3115_v12 = vsub.f32 %v6189_v40, %v6469_v17 }
 0x1de   :  { %v3215_v42 = vsel %vm2992_vm7, %v3161_v50, 0.0  ;;  %v3218_v38 = vsel %vm2992_vm7, %v3165_v14, 0.0  ;;  %v3302_v50 = vadd.f32 %v3301_v58, %v3300_v11  ;;  %v3167_v31 = vmul.f32 %v3111_v15, %v3111_v15 }
 0x1df   :  { %v3216_v43 = vadd.f32 %v3215_v42, %v3159_v51  ;;  %v3150_v51 = vsub.f32 %v6073_v53, %v6231_v27  ;;  %v3204_v19 = vmul.f32 %v3148_v60, %v3148_v60  ;;  %v3303_v42 = vsel %vm148_vm2, %v3202_v25, 0.0 }
 0x1e0   :  { %v3121_v39 = vsub.f32 %v6210_v29, %v6469_v17  ;;  %v3221_v24 = vsel %vm2992_vm7, %v3169_v3, 0.0  ;;  %v3304_v14 = vadd.f32 %v3303_v42, %v3302_v50  ;;  %v3119_v11 = vsub.f32 %v6205_v18, %v6469_v17 }
 0x1e1   :  { %v3217_v56 = vadd.f32 %v3216_v43, %v3163_v32  ;;  %v3173_v32 = vmul.f32 %v3117_v41, %v3117_v41  ;;  %v3171_v43 = vmul.f32 %v3115_v12, %v3115_v12  ;;  %v3206_v53 = vmul.f32 %v3150_v51, %v3150_v51 }
 0x1e2   :  { %v3305_v58 = vsel %vm18_vm0, %v3204_v19, 0.0  ;;  %v3125_v25 = vsub.f32 %v6226_v55, %v6469_v17  ;;  %v3123_v50 = vsub.f32 %v6221_v8, %v6469_v17  ;;  %v3129_v19 = vsub.f32 %v6268_v0, %v6469_v17 }
 0x1e3   :  { %v3219_v7 = vadd.f32 %v3218_v38, %v3217_v56  ;;  %v3152_v56 = vsub.f32 %v6114_v37, %v6231_v27  ;;  %v3177_v38 = vmul.f32 %v3121_v39, %v3121_v39  ;;  %v3224_v41 = vsel %vm2992_vm7, %v3173_v32, 0.0 }
 0x1e4   :  { %v3306_v3 = vadd.f32 %v3305_v58, %v3304_v14  ;;  %v3181_v42 = vmul.f32 %v3125_v25, %v3125_v25  ;;  %v3179_v14 = vmul.f32 %v3123_v50, %v3123_v50  ;;  %v3158_v50 = vsub.f32 %v6178_v2, %v6231_v27 }
 0x1e5   :  { %v3220_v35 = vadd.f32 %v3219_v7, %v3167_v31  ;;  %v3175_v31 = vmul.f32 %v3119_v11, %v3119_v11  ;;  %v3154_v7 = vsub.f32 %v6140_v54, %v6231_v27  ;;  %v3208_v37 = vmul.f32 %v3152_v56, %v3152_v56 }
 0x1e6   :  { %v3227_v39 = vsel %vm2992_vm7, %v3177_v38, 0.0  ;;  %v3230_v58 = vsel %vm2992_vm7, %v3181_v42, 0.0  ;;  %v3131_v38 = vsub.f32 %v6302_v36, %v6469_v17 }
 0x1e7   :  { %v3222_v15 = vadd.f32 %v3221_v24, %v3220_v35  ;;  %v3307_v35 = vsel %vm148_vm2, %v3206_v53, 0.0  ;;  %v3127_v24 = vsub.f32 %v6256_v59, %v6469_v17  ;;  %v3210_v54 = vmul.f32 %v3154_v7, %v3154_v7 }
 0x1e8   :  { %v3308_v32 = vadd.f32 %v3307_v35, %v3306_v3  ;;  %v3309_v56 = vsel %vm18_vm0, %v3208_v37, 0.0  ;;  %v3133_v53 = vsub.f32 %v6311_v13, %v6469_v17  ;;  %v3137_v7 = vsub.f32 %v6333_v63, %v6469_v17 }
 0x1e9   :  { %v3223_v60 = vadd.f32 %v3222_v15, %v3171_v43  ;;  %v3156_v43 = vsub.f32 %v6173_v62, %v6231_v27  ;;  %v3187_v42 = vmul.f32 %v3131_v38, %v3131_v38 }
 0x1ea   :  { %v3310_v25 = vadd.f32 %v3309_v56, %v3308_v32  ;;  %v3189_v37 = vmul.f32 %v3133_v53, %v3133_v53  ;;  %v3214_v32 = vmul.f32 %v3158_v50, %v3158_v50  ;;  %v3143_v50 = vsub.f32 %v5917_v21, %v6469_v17 }
 0x1eb   :  { %v3225_v12 = vadd.f32 %v3224_v41, %v3223_v60  ;;  %v3185_v60 = vmul.f32 %v3129_v19, %v3129_v19  ;;  %v3183_v41 = vmul.f32 %v3127_v24, %v3127_v24  ;;  %v3212_v62 = vmul.f32 %v3156_v43, %v3156_v43 }
 0x1ec   :  { %v3135_v19 = vsub.f32 %v6328_v4, %v6469_v17  ;;  %v3236_v43 = vsel %vm2992_vm7, %v3189_v37, 0.0 }
 0x1ed   :  { %v3226_v51 = vadd.f32 %v3225_v12, %v3175_v31  ;;  %v3311_v12 = vsel %vm148_vm2, %v3210_v54, 0.0  ;;  %v3313_v2 = vsel %vm18_vm0, %v3212_v62, 0.0 }
 0x1ee   :  { %v3312_v35 = vadd.f32 %v3311_v12, %v3310_v25  ;;  %v3191_v56 = vmul.f32 %v3135_v19, %v3135_v19  ;;  %v3145_v25 = vsub.f32 %v6365_v34, %v6469_v17  ;;  %v3147_v19 = vsub.f32 %v6029_v16, %v6469_v17 }
 0x1ef   :  { %v3228_v11 = vadd.f32 %v3227_v39, %v3226_v51  ;;  %v3233_v51 = vsel %vm2992_vm7, %v3185_v60, 0.0 }
 0x1f0   :  { %v3314_v54 = vadd.f32 %v3313_v2, %v3312_v35  ;;  %v3201_v37 = vmul.f32 %v3145_v25, %v3145_v25 }
 0x1f1   :  { %v3229_v15 = vadd.f32 %v3228_v11, %v3179_v14  ;;  %v3141_v14 = vsub.f32 %v6349_v33, %v6469_v17  ;;  %v3193_v11 = vmul.f32 %v3137_v7, %v3137_v7  ;;  %v3149_v7 = vsub.f32 %v6381_v9, %v6469_v17 }
 0x1f3   :  { %v3231_v3 = vadd.f32 %v3230_v58, %v3229_v15  ;;  %v3139_v15 = vsub.f32 %v5788_v23, %v6469_v17  ;;  %v3315_v58 = vsel %vm148_vm2, %v3214_v32, 0.0  ;;  %v3197_v38 = vmul.f32 %v3141_v14, %v3141_v14 }
 0x1f4   :  { %v3205_v2 = vmul.f32 %v3149_v7, %v3149_v7  ;;  %v3245_v14 = vsel %vm2992_vm7, %v3201_v37, 0.0 }
 0x1f5   :  { %v3232_v31 = vadd.f32 %v3231_v3, %v3183_v41  ;;  %v3239_v41 = vsel %vm2992_vm7, %v3193_v11, 0.0  ;;  %v3316_v3 = vadd.f32 %v3315_v58, %v3314_v54  ;;  %v3195_v62 = vmul.f32 %v3139_v15, %v3139_v15 }
 0x1f6   :  { %v3203_v54 = vmul.f32 %v3147_v19, %v3147_v19  ;;  %v3248_v58 = vsel %vm2992_vm7, %v3205_v2, 0.0 }
 0x1f7   :  { %v3234_v39 = vadd.f32 %v3233_v51, %v3232_v31  ;;  %v3242_v51 = vsel %vm2992_vm7, %v3197_v38, 0.0  ;;  %v3317_v35 = vrot.slane %v3316_v3, 4  ;;  %v3155_v38 = vsub.f32 %v6154_v49, %v6469_v17 }
 0x1f9   :  { %v3235_v24 = vadd.f32 %v3234_v39, %v3187_v42  ;;  %v3199_v42 = vmul.f32 %v3143_v50, %v3143_v50  ;;  %v3318_v11 = vadd.f32 %v3317_v35, %v3316_v3  ;;  %v3211_v7 = vmul.f32 %v3155_v38, %v3155_v38 }
 0x1fb   :  { %v3237_v53 = vadd.f32 %v3236_v43, %v3235_v24  ;;  %v3153_v24 = vsub.f32 %v6397_v28, %v6469_v17  ;;  %v3151_v43 = vsub.f32 %v6086_v46, %v6469_v17  ;;  %v3319_v25 = vrot.slane %v3318_v11, 2 }
 0x1fd   :  { %v3238_v60 = vadd.f32 %v3237_v53, %v3191_v56  ;;  %v3157_v53 = vsub.f32 %v6413_v1, %v6469_v17 }
 0x1ff   :  { %v3240_v31 = vadd.f32 %v3239_v41, %v3238_v60  ;;  %v3209_v60 = vmul.f32 %v3153_v24, %v3153_v24  ;;  %v3207_v41 = vmul.f32 %v3151_v43, %v3151_v43  ;;  %v3213_v3 = vmul.f32 %v3157_v53, %v3157_v53 }
 0x201   :  { %v3241_v12 = vadd.f32 %v3240_v31, %v3195_v62  ;;  %v3251_v31 = vsel %vm2992_vm7, %v3209_v60, 0.0  ;;  %v3254_v35 = vsel %vm2992_vm7, %v3213_v3, 0.0 }
 0x203   :  { %v3243_v39 = vadd.f32 %v3242_v51, %v3241_v12  ;;  %v3320_v12 = vadd.f32 %v3319_v25, %v3318_v11  ;;  %v3661_v11 = vmov 1966171168  }
 0x205   :  { %v3244_v32 = vadd.f32 %v3243_v39, %v3199_v42  ;;  %v3321_v19 = vrot.slane %v3320_v12, 1 }
 0x207   :  { %v3246_v15 = vadd.f32 %v3245_v14, %v3244_v32  ;;  %v3322_v32 = vadd.f32 %v3321_v19, %v3320_v12 }
 0x209   :  { %v3247_v56 = vadd.f32 %v3246_v15, %v3203_v54  ;;  %v3324_v14 = vmul.f32 0.0051020407, %v3322_v32 }
 0x20b   :  { %v3249_v50 = vadd.f32 %v3248_v58, %v3247_v56  ;;  %v3326_v15 = vadd.f32 1e-05, %v3324_v14  ;;  %v3334_v58 = vunpack.c.l.s4 %v3661_v11 }
 0x20d   :  { %v3250_v62 = vadd.f32 %v3249_v50, %v3207_v41  ;;  %3623 = vrsqrt.f32 %v3326_v15  ;;  %v3335_v25 = vunpack.c.0.s8 %v3334_v58 }
 0x20f   :  { %v3252_v37 = vadd.f32 %v3251_v31, %v3250_v62  ;;  %v3338_v41 = vsub.s32 %v3335_v25, %v3858_v20  ;;  %v3329_v31 = vld [vmem:[%s7064_s2] sm:$0x3] }
 0x211   :  { %v3253_v51 = vadd.f32 %v3252_v37, %v3211_v7  ;;  %v7132_v37 = vld [vmem:[#allocation4_spill] sm:$0xff] }
 0x213   :  { %v3255_v42 = vadd.f32 %v3254_v35, %v3253_v51  ;;  %v7133_v35 = vld [vmem:[#allocation3_spill] sm:$0xff] }
 0x215   :  { %v3256_v39 = vrot.slane %v3255_v42, 4 }
 0x217   :  { %v3257_v24 = vadd.f32 %v3256_v39, %v3255_v42  ;;  %v3624_v38 = vpop.eup %3623 }
 0x219   :  { %v3258_v2 = vrot.slane %v3257_v24, 2 }
 0x21b   :  { %v3259_v54 = vadd.f32 %v3258_v2, %v3257_v24 }
 0x21d   :  { %v3260_v43 = vrot.slane %v3259_v54, 1 }
 0x21f   :  { %v3261_v56 = vadd.f32 %v3260_v43, %v3259_v54  ;;  %v7134_v43 = vld [vmem:[#allocation7_spill] sm:$0xff] }
 0x221   :  { %v3323_v53 = vmul.f32 0.0051020407, %v3261_v56 }
 0x223   :  { %v3325_v60 = vadd.f32 1e-05, %v3323_v53  ;;  %v7137_v53 = vld [vmem:[#allocation11_spill] sm:$0xff] }
 0x225   :  { %3625 = vrsqrt.f32 %v3325_v60 }
 0x22f   :  { %v3626_v50 = vpop.eup %3625 }
 0x230   :  { %v3332_v62 = vcombine.low %v3626_v50, %v3624_v38 }
 0x232   :  { %v3339_v3 = vrot.slane %v3332_v62, %v3338_v41 }
 0x234   :  { %v3346_v12 = vrot.slane %v3339_v3, %v3338_v41 }
 0x236   :  { %v3348_v7 = vmul.f32 %v3346_v12, %v3329_v31 }
 0x238   :  { %v6575_v51 = vrot.slane %v3348_v7, %v7132_v37  ;;  %v6578_v19 = vrot.slane %v3348_v7, %v7133_v35 }
 0x23a   :  { %v3361_v42 = vmul.f32 %v6575_v51, %v6469_v17  ;;  %v3362_v20 = vmul.f32 %v6578_v19, %v6231_v27  ;;  %v3382_v39 = vmul.f32 %v6575_v51, %v6107_v30  ;;  %v3384_v32 = vmul.f32 %v6575_v51, %v6083_v44 }
 0x23b   :  { %v3383_v24 = vmul.f32 %v6245_v26, %v6578_v19  ;;  %v3385_v2 = vmul.f32 %v6252_v5, %v6578_v19  ;;  %v3386_v14 = vmul.f32 %v6575_v51, %v6135_v22  ;;  %v3387_v17 = vmul.f32 %v6261_v6, %v6578_v19 }
 0x23c   :  { %v3365_v54 = vcombine.low %v3361_v42, %v3362_v20  ;;  %v3388_v27 = vmul.f32 %v6575_v51, %v6119_v61  ;;  %v3389_v30 = vmul.f32 %v6274_v47, %v6578_v19  ;;  %v3390_v44 = vmul.f32 %v6575_v51, %v6159_v57 }
 0x23d   :  { %v3391_v26 = vmul.f32 %v6281_v52, %v6578_v19  ;;  %v3392_v5 = vmul.f32 %v6575_v51, %v6164_v45  ;;  %v3393_v22 = vmul.f32 %v6296_v10, %v6578_v19  ;;  %v6610_v6 = vmul.f32 %v6575_v51, %v6189_v40  ;;  %v7135_v52 = vld [vmem:[#allocation6_spill] sm:$0xff]  ;;  %v3349_v45 = vld [vmem:[%s7065_s3] sm:$0x3]  ;;  %v7136_v10 = vld [vmem:[#allocation9_spill] sm:$0xff] }
 0x23e   :  { %v3372_v61 = vrot.slane %v3365_v54, %v3338_v41  ;;  %v6614_v47 = vmul.f32 %v7134_v43, %v6578_v19  ;;  %v6618_v57 = vmul.f32 %v6575_v51, %v6194_v48  ;;  %v6622_v15 = vmul.f32 %v7135_v52, %v6578_v19  ;;  %v7144_v43 = vld [vmem:[#allocation17_spill] sm:$0xff] }
 0x23f   :  { %v6629_v40 = vmul.f32 %v6575_v51, %v6205_v18  ;;  %v6633_v56 = vmul.f32 %v7136_v10, %v6578_v19  ;;  %v6637_v48 = vmul.f32 %v6575_v51, %v6210_v29  ;;  %v6641_v60 = vmul.f32 %v7137_v53, %v6578_v19  ;;  %v7138_v18 = vld [vmem:[#allocation5_spill] sm:$0xff]  ;;  %v7139_v29 = vld [vmem:[#allocation10_spill] sm:$0xff] }
 0x240   :  { %v3379_v11 = vrot.slane %v3372_v61, %v3338_v41  ;;  %v6645_v58 = vmul.f32 %v6575_v51, %v6221_v8  ;;  %v6649_v25 = vmul.f32 %v7138_v18, %v6578_v19  ;;  %v6653_v38 = vmul.f32 %v6575_v51, %v6226_v55  ;;  %v7140_v41 = vld [vmem:[#allocation13_spill] sm:$0xff]  ;;  %v7141_v55 = vld [vmem:[#allocation14_spill] sm:$0xff] }
 0x241   :  { %v6657_v50 = vmul.f32 %v7139_v29, %v6578_v19  ;;  %v6661_v62 = vmul.f32 %v6575_v51, %v6256_v59  ;;  %v6665_v8 = vmul.f32 %v7140_v41, %v6578_v19  ;;  %v6669_v3 = vmul.f32 %v6575_v51, %v6268_v0  ;;  %v7142_v59 = vld [vmem:[#allocation15_spill] sm:$0xff]  ;;  %v7143_v0 = vld [vmem:[#allocation16_spill] sm:$0xff]  ;;  %v7145_v10 = vld [vmem:[#allocation18_spill] sm:$0xff] }
 0x242   :  { %v3381_v31 = vsub.f32 %v3349_v45, %v3379_v11  ;;  %v6673_v12 = vmul.f32 %v7141_v55, %v6578_v19  ;;  %v6677_v7 = vmul.f32 %v6575_v51, %v6302_v36  ;;  %v6681_v42 = vmul.f32 %v7142_v59, %v6578_v19 }
 0x243   :  { %v6685_v20 = vmul.f32 %v6575_v51, %v6311_v13  ;;  %v6689_v54 = vmul.f32 %v7143_v0, %v6578_v19  ;;  %v6693_v61 = vmul.f32 %v6575_v51, %v6328_v4  ;;  %v6697_v36 = vmul.f32 %v7144_v43, %v6578_v19 }
 0x244   :  { %v6700_v52 = vrot.slane %v3381_v31, %v7132_v37  ;;  %v6703_v45 = vrot.slane %v3381_v31, %v7133_v35  ;;  %v6707_v13 = vmul.f32 %v6575_v51, %v6333_v63  ;;  %v6711_v53 = vmul.f32 %v7145_v10, %v6578_v19  ;;  %v3650_v37 = vld [vmem:[%s7063_s4 + $0x128] sm:$0xff]  ;;  %v3651_v63 = vld [vmem:[%s7063_s4 + $0x138] sm:$0x3f] }
 0x245   :  { %v6715_v4 = vmul.f32 %v6575_v51, %v5788_v23  ;;  %v6721_v11 = vmul.f32 %v3650_v37, %v6578_v19  ;;  %v6725_v35 = vmul.f32 %v6575_v51, %v6349_v33  ;;  %v6731_v18 = vmul.f32 %v3651_v63, %v6578_v19 }
 0x246   :  { %v3449_v23 = vadd.f32 %v6700_v52, %v3382_v39  ;;  %v3450_v29 = vadd.f32 %v6703_v45, %v3383_v24  ;;  %v3451_v41 = vadd.f32 %v6700_v52, %v3384_v32  ;;  %v3452_v31 = vadd.f32 %v6703_v45, %v3385_v2 }
 0x247   :  { %v3453_v55 = vadd.f32 %v6700_v52, %v3386_v14  ;;  %v3454_v33 = vadd.f32 %v6703_v45, %v3387_v17  ;;  %v3455_v59 = vadd.f32 %v6700_v52, %v3388_v27  ;;  %v3456_v0 = vadd.f32 %v6703_v45, %v3389_v30 }
 0x248   :  { %v3505_v43 = vmax.f32 %v3449_v23, 0.0  ;;  %v3506_v10 = vmax.f32 %v3450_v29, 0.0  ;;  %v3507_v37 = vmax.f32 %v3451_v41, 0.0  ;;  %v3508_v63 = vmax.f32 %v3452_v31, 0.0 }
 0x249   :  { %v3509_v1 = vmax.f32 %v3453_v55, 0.0  ;;  %v3510_v39 = vmax.f32 %v3454_v33, 0.0  ;;  %v3511_v49 = vmax.f32 %v3455_v59, 0.0  ;;  %v3512_v24 = vmax.f32 %v3456_v0, 0.0 }
 0x24a   :  { %3561 = vst [vmem:[%s7063_s4] sm:$0xff] %v3505_v43  ;;  %3562 = vst.msk [vmem:[%s7063_s4 + $0x8] sm:$0xff] %vm18_vm0, %v3506_v10  ;;  %v3457_v32 = vadd.f32 %v6700_v52, %v3390_v44  ;;  %v3458_v2 = vadd.f32 %v6703_v45, %v3391_v26  ;;  %v3459_v14 = vadd.f32 %v6700_v52, %v3392_v5 }
 0x24b   :  { %3563 = vst [vmem:[%s7063_s4 + $0x10] sm:$0x3f] %v3507_v37  ;;  %3564 = vst.msk [vmem:[%s7063_s4 + $0x18] sm:$0x3f] %vm148_vm2, %v3508_v63  ;;  %v3460_v17 = vadd.f32 %v6703_v45, %v3393_v22  ;;  %v3461_v27 = vadd.f32 %v6700_v52, %v6610_v6  ;;  %v3463_v30 = vadd.f32 %v6700_v52, %v6618_v57 }
 0x24c   :  { %3565 = vst [vmem:[%s7063_s4 + $0x20] sm:$0xff] %v3509_v1  ;;  %3566 = vst.msk [vmem:[%s7063_s4 + $0x28] sm:$0xff] %vm18_vm0, %v3510_v39  ;;  %v3462_v1 = vadd.f32 %v6703_v45, %v6614_v47  ;;  %v3464_v44 = vadd.f32 %v6703_v45, %v6622_v15  ;;  %v3513_v26 = vmax.f32 %v3457_v32, 0.0  ;;  %v3514_v5 = vmax.f32 %v3458_v2, 0.0 }
 0x24d   :  { %3567 = vst [vmem:[%s7063_s4 + $0x30] sm:$0x3f] %v3511_v49  ;;  %3568 = vst.msk [vmem:[%s7063_s4 + $0x38] sm:$0x3f] %vm148_vm2, %v3512_v24  ;;  %v3515_v49 = vmax.f32 %v3459_v14, 0.0  ;;  %v3516_v22 = vmax.f32 %v3460_v17, 0.0  ;;  %v3465_v6 = vadd.f32 %v6700_v52, %v6629_v40  ;;  %v3466_v47 = vadd.f32 %v6703_v45, %v6633_v56 }
 0x24e   :  { %v3517_v23 = vmax.f32 %v3461_v27, 0.0  ;;  %v3518_v29 = vmax.f32 %v3462_v1, 0.0  ;;  %v3519_v41 = vmax.f32 %v3463_v30, 0.0  ;;  %v3520_v31 = vmax.f32 %v3464_v44, 0.0  ;;  %3569 = vst [vmem:[%s7063_s4 + $0x40] sm:$0xff] %v3513_v26  ;;  %3570 = vst.msk [vmem:[%s7063_s4 + $0x48] sm:$0xff] %vm18_vm0, %v3514_v5 }
 0x24f   :  { %3571 = vst [vmem:[%s7063_s4 + $0x50] sm:$0x3f] %v3515_v49  ;;  %3572 = vst.msk [vmem:[%s7063_s4 + $0x58] sm:$0x3f] %vm148_vm2, %v3516_v22  ;;  %v3467_v57 = vadd.f32 %v6700_v52, %v6637_v48  ;;  %v3468_v15 = vadd.f32 %v6703_v45, %v6641_v60  ;;  %v3469_v40 = vadd.f32 %v6700_v52, %v6645_v58  ;;  %v3521_v55 = vmax.f32 %v3465_v6, 0.0 }
 0x250   :  { %3573 = vst [vmem:[%s7063_s4 + $0x60] sm:$0xff] %v3517_v23  ;;  %3574 = vst.msk [vmem:[%s7063_s4 + $0x68] sm:$0xff] %vm18_vm0, %v3518_v29  ;;  %v3470_v56 = vadd.f32 %v6703_v45, %v6649_v25  ;;  %v3471_v48 = vadd.f32 %v6700_v52, %v6653_v38  ;;  %v3472_v60 = vadd.f32 %v6703_v45, %v6657_v50  ;;  %v3522_v33 = vmax.f32 %v3466_v47, 0.0 }
 0x251   :  { %3575 = vst [vmem:[%s7063_s4 + $0x70] sm:$0x3f] %v3519_v41  ;;  %3576 = vst.msk [vmem:[%s7063_s4 + $0x78] sm:$0x3f] %vm148_vm2, %v3520_v31  ;;  %v3523_v59 = vmax.f32 %v3467_v57, 0.0  ;;  %v3524_v0 = vmax.f32 %v3468_v15, 0.0  ;;  %v3473_v58 = vadd.f32 %v6700_v52, %v6661_v62  ;;  %v3474_v25 = vadd.f32 %v6703_v45, %v6665_v8 }
 0x252   :  { %v3525_v43 = vmax.f32 %v3469_v40, 0.0  ;;  %v3526_v10 = vmax.f32 %v3470_v56, 0.0  ;;  %v3527_v37 = vmax.f32 %v3471_v48, 0.0  ;;  %v3528_v63 = vmax.f32 %v3472_v60, 0.0  ;;  %3577 = vst [vmem:[%s7063_s4 + $0x80] sm:$0xff] %v3521_v55  ;;  %3578 = vst.msk [vmem:[%s7063_s4 + $0x88] sm:$0xff] %vm18_vm0, %v3522_v33 }
 0x253   :  { %3579 = vst [vmem:[%s7063_s4 + $0x90] sm:$0x3f] %v3523_v59  ;;  %3580 = vst.msk [vmem:[%s7063_s4 + $0x98] sm:$0x3f] %vm148_vm2, %v3524_v0  ;;  %v3475_v38 = vadd.f32 %v6700_v52, %v6669_v3  ;;  %v3476_v50 = vadd.f32 %v6703_v45, %v6673_v12  ;;  %v3477_v62 = vadd.f32 %v6700_v52, %v6677_v7  ;;  %v3529_v39 = vmax.f32 %v3473_v58, 0.0 }
 0x254   :  { %3581 = vst [vmem:[%s7063_s4 + $0xa0] sm:$0xff] %v3525_v43  ;;  %3582 = vst.msk [vmem:[%s7063_s4 + $0xa8] sm:$0xff] %vm18_vm0, %v3526_v10  ;;  %v3478_v8 = vadd.f32 %v6703_v45, %v6681_v42  ;;  %v3479_v3 = vadd.f32 %v6700_v52, %v6685_v20  ;;  %v3480_v12 = vadd.f32 %v6703_v45, %v6689_v54  ;;  %v3530_v24 = vmax.f32 %v3474_v25, 0.0  ;;  %v3653_v41 = vld [vmem:[%s7063_s4 + $0x158] sm:$0x3f] }
 0x255   :  { %3583 = vst [vmem:[%s7063_s4 + $0xb0] sm:$0x3f] %v3527_v37  ;;  %3584 = vst.msk [vmem:[%s7063_s4 + $0xb8] sm:$0x3f] %vm148_vm2, %v3528_v63  ;;  %v3531_v32 = vmax.f32 %v3475_v38, 0.0  ;;  %v3532_v2 = vmax.f32 %v3476_v50, 0.0  ;;  %v3481_v7 = vadd.f32 %v6700_v52, %v6693_v61  ;;  %v3482_v42 = vadd.f32 %v6703_v45, %v6697_v36 }
 0x256   :  { %v3533_v14 = vmax.f32 %v3477_v62, 0.0  ;;  %v3534_v17 = vmax.f32 %v3478_v8, 0.0  ;;  %v3535_v27 = vmax.f32 %v3479_v3, 0.0  ;;  %v3536_v1 = vmax.f32 %v3480_v12, 0.0  ;;  %3585 = vst [vmem:[%s7063_s4 + $0xc0] sm:$0xff] %v3529_v39  ;;  %3586 = vst.msk [vmem:[%s7063_s4 + $0xc8] sm:$0xff] %vm18_vm0, %v3530_v24 }
 0x257   :  { %3587 = vst [vmem:[%s7063_s4 + $0xd0] sm:$0x3f] %v3531_v32  ;;  %3588 = vst.msk [vmem:[%s7063_s4 + $0xd8] sm:$0x3f] %vm148_vm2, %v3532_v2  ;;  %v3483_v20 = vadd.f32 %v6700_v52, %v6707_v13  ;;  %v3484_v54 = vadd.f32 %v6703_v45, %v6711_v53  ;;  %v3485_v61 = vadd.f32 %v6700_v52, %v6715_v4  ;;  %v3537_v30 = vmax.f32 %v3481_v7, 0.0  ;;  %v3656_v50 = vld [vmem:[%s7063_s4 + $0x188] sm:$0xff] }
 0x258   :  { %3589 = vst [vmem:[%s7063_s4 + $0xe0] sm:$0xff] %v3533_v14  ;;  %3590 = vst.msk [vmem:[%s7063_s4 + $0xe8] sm:$0xff] %vm18_vm0, %v3534_v17  ;;  %v3486_v36 = vadd.f32 %v6703_v45, %v6721_v11  ;;  %v3487_v13 = vadd.f32 %v6700_v52, %v6725_v35  ;;  %v3488_v53 = vadd.f32 %v6703_v45, %v6731_v18  ;;  %v3538_v44 = vmax.f32 %v3482_v42, 0.0  ;;  %v3652_v11 = vld [vmem:[%s7063_s4 + $0x148] sm:$0xff]  ;;  %v3655_v57 = vld [vmem:[%s7063_s4 + $0x178] sm:$0x3f] }
 0x259   :  { %3591 = vst [vmem:[%s7063_s4 + $0xf0] sm:$0x3f] %v3535_v27  ;;  %3592 = vst.msk [vmem:[%s7063_s4 + $0xf8] sm:$0x3f] %vm148_vm2, %v3536_v1  ;;  %v3539_v26 = vmax.f32 %v3483_v20, 0.0  ;;  %v3540_v5 = vmax.f32 %v3484_v54, 0.0  ;;  %v3422_v4 = vmul.f32 %v6575_v51, %v5917_v21  ;;  %v3423_v35 = vmul.f32 %v3652_v11, %v6578_v19 }
 0x25a   :  { %v3541_v49 = vmax.f32 %v3485_v61, 0.0  ;;  %v3542_v22 = vmax.f32 %v3486_v36, 0.0  ;;  %v3543_v23 = vmax.f32 %v3487_v13, 0.0  ;;  %v3544_v29 = vmax.f32 %v3488_v53, 0.0  ;;  %3593 = vst [vmem:[%s7063_s4 + $0x100] sm:$0xff] %v3537_v30  ;;  %3594 = vst.msk [vmem:[%s7063_s4 + $0x108] sm:$0xff] %vm18_vm0, %v3538_v44 }
 0x25b   :  { %3595 = vst [vmem:[%s7063_s4 + $0x110] sm:$0x3f] %v3539_v26  ;;  %3596 = vst.msk [vmem:[%s7063_s4 + $0x118] sm:$0x3f] %vm148_vm2, %v3540_v5  ;;  %v3424_v18 = vmul.f32 %v6575_v51, %v6365_v34  ;;  %v3425_v31 = vmul.f32 %v3653_v41, %v6578_v19  ;;  %v3426_v21 = vmul.f32 %v6575_v51, %v6029_v16  ;;  %v3654_v34 = vld [vmem:[%s7063_s4 + $0x168] sm:$0xff] }
 0x25c   :  { %3597 = vst [vmem:[%s7063_s4 + $0x120] sm:$0xff] %v3541_v49  ;;  %3598 = vst.msk [vmem:[%s7063_s4 + $0x128] sm:$0xff] %vm18_vm0, %v3542_v22  ;;  %v3427_v6 = vmul.f32 %v3654_v34, %v6578_v19  ;;  %v3428_v47 = vmul.f32 %v6575_v51, %v6381_v9  ;;  %v3429_v15 = vmul.f32 %v3655_v57, %v6578_v19  ;;  %v3657_v3 = vld [vmem:[%s7063_s4 + $0x198] sm:$0x3f]  ;;  %v3658_v39 = vld [vmem:[%s7063_s4 + $0x1a8] sm:$0xff] }
 0x25d   :  { %3599 = vst [vmem:[%s7063_s4 + $0x130] sm:$0x3f] %v3543_v23  ;;  %3600 = vst.msk [vmem:[%s7063_s4 + $0x138] sm:$0x3f] %vm148_vm2, %v3544_v29  ;;  %v3489_v40 = vadd.f32 %v6700_v52, %v3422_v4  ;;  %v3490_v56 = vadd.f32 %v6703_v45, %v3423_v35  ;;  %v3491_v16 = vadd.f32 %v6700_v52, %v3424_v18  ;;  %v7147_v32 = vld [vmem:[#allocation12_spill] sm:$0xff] }
 0x25e   :  { %v3492_v48 = vadd.f32 %v6703_v45, %v3425_v31  ;;  %v3493_v60 = vadd.f32 %v6700_v52, %v3426_v21  ;;  %v3494_v55 = vadd.f32 %v6703_v45, %v3427_v6  ;;  %v3495_v9 = vadd.f32 %v6700_v52, %v3428_v47  ;;  %v3659_v14 = vld [vmem:[%s7063_s4 + $0x1b8] sm:$0x3f] }
 0x25f   :  { %v3496_v33 = vadd.f32 %v6703_v45, %v3429_v15  ;;  %v3545_v59 = vmax.f32 %v3489_v40, 0.0  ;;  %v3546_v0 = vmax.f32 %v3490_v56, 0.0  ;;  %v3547_v43 = vmax.f32 %v3491_v16, 0.0 }
 0x260   :  { %v3548_v10 = vmax.f32 %v3492_v48, 0.0  ;;  %v3549_v37 = vmax.f32 %v3493_v60, 0.0  ;;  %v3550_v63 = vmax.f32 %v3494_v55, 0.0  ;;  %v3551_v58 = vmax.f32 %v3495_v9, 0.0 }
 0x261   :  { %v3552_v25 = vmax.f32 %v3496_v33, 0.0  ;;  %3601 = vst [vmem:[%s7063_s4 + $0x140] sm:$0xff] %v3545_v59  ;;  %3602 = vst.msk [vmem:[%s7063_s4 + $0x148] sm:$0xff] %vm18_vm0, %v3546_v0  ;;  %v3430_v38 = vmul.f32 %v6575_v51, %v6086_v46  ;;  %v3431_v62 = vmul.f32 %v3656_v50, %v6578_v19  ;;  %v3432_v8 = vmul.f32 %v6575_v51, %v6397_v28  ;;  %v7146_v46 = vld [vmem:[#allocation8_spill] sm:$0xff] }
 0x262   :  { %3603 = vst [vmem:[%s7063_s4 + $0x150] sm:$0x3f] %v3547_v43  ;;  %3604 = vst.msk [vmem:[%s7063_s4 + $0x158] sm:$0x3f] %vm148_vm2, %v3548_v10  ;;  %v3433_v12 = vmul.f32 %v3657_v3, %v6578_v19  ;;  %v3434_v28 = vmul.f32 %v6575_v51, %v7146_v46  ;;  %v3435_v24 = vmul.f32 %v3658_v39, %v6578_v19 }
 0x263   :  { %3605 = vst [vmem:[%s7063_s4 + $0x160] sm:$0xff] %v3549_v37  ;;  %3606 = vst.msk [vmem:[%s7063_s4 + $0x168] sm:$0xff] %vm18_vm0, %v3550_v63  ;;  %v3436_v2 = vmul.f32 %v6575_v51, %v7147_v32  ;;  %v3437_v17 = vmul.f32 %v3659_v14, %v6578_v19  ;;  %v3497_v27 = vadd.f32 %v6700_v52, %v3430_v38 }
 0x264   :  { %3607 = vst [vmem:[%s7063_s4 + $0x170] sm:$0x3f] %v3551_v58  ;;  %3608 = vst.msk [vmem:[%s7063_s4 + $0x178] sm:$0x3f] %vm148_vm2, %v3552_v25  ;;  %v3498_v1 = vadd.f32 %v6703_v45, %v3431_v62  ;;  %v3499_v7 = vadd.f32 %v6700_v52, %v3432_v8  ;;  %v3500_v42 = vadd.f32 %v6703_v45, %v3433_v12 }
 0x265   :  { %v3501_v20 = vadd.f32 %v6700_v52, %v3434_v28  ;;  %v3502_v54 = vadd.f32 %v6703_v45, %v3435_v24  ;;  %v3503_v51 = vadd.f32 %v6700_v52, %v3436_v2  ;;  %v3504_v61 = vadd.f32 %v6703_v45, %v3437_v17 }
 0x266   :  { %v3553_v36 = vmax.f32 %v3497_v27, 0.0  ;;  %v3554_v13 = vmax.f32 %v3498_v1, 0.0  ;;  %v3555_v53 = vmax.f32 %v3499_v7, 0.0  ;;  %v3556_v19 = vmax.f32 %v3500_v42, 0.0 }
 0x267   :  { %v3557_v30 = vmax.f32 %v3501_v20, 0.0  ;;  %v3558_v44 = vmax.f32 %v3502_v54, 0.0  ;;  %v3559_v26 = vmax.f32 %v3503_v51, 0.0  ;;  %v3560_v5 = vmax.f32 %v3504_v61, 0.0 }
 0x268   :  { %3609 = vst [vmem:[%s7063_s4 + $0x180] sm:$0xff] %v3553_v36  ;;  %3610 = vst.msk [vmem:[%s7063_s4 + $0x188] sm:$0xff] %vm18_vm0, %v3554_v13 }
 0x269   :  { %3611 = vst [vmem:[%s7063_s4 + $0x190] sm:$0x3f] %v3555_v53  ;;  %3612 = vst.msk [vmem:[%s7063_s4 + $0x198] sm:$0x3f] %vm148_vm2, %v3556_v19 }
 0x26a   :  { %3613 = vst [vmem:[%s7063_s4 + $0x1a0] sm:$0xff] %v3557_v30  ;;  %3614 = vst.msk [vmem:[%s7063_s4 + $0x1a8] sm:$0xff] %vm18_vm0, %v3558_v44 }
 0x26b   :  { %3615 = vst [vmem:[%s7063_s4 + $0x1b0] sm:$0x3f] %v3559_v26  ;;  %3616 = vst.msk [vmem:[%s7063_s4 + $0x1b8] sm:$0x3f] %vm148_vm2, %v3560_v5 }

</bundles_post_ra>
